<compile_context>
chip_gen: v6e
topology: v6e:2x2x1
jax: 0.10.0
libtpu: 0.0.40
codegen_flags: <defaults>
</compile_context>

<pallas_src>
import numpy as np
import jax
import jax.numpy as jnp
from jax.experimental import pallas as pl
from jax.experimental.pallas import tpu as pltpu

# Consts (the reference module reads these from a `Consts` namespace).
COMP_LENGTH = 64      # Consts.comp_length  (must be divisible by NUM_FEATURES)
NUM_FEATURES = 4      # Consts.num_features

L = COMP_LENGTH
F = NUM_FEATURES
D1 = 2 * F * L        # fc1_in_size  (512)
D2 = 4 * F * L        # fc2_in_size  (1024)
D3 = F * L            # fc3_in_size  (256)


# ----------------------------------------------------------------------------
# Kernel
# ----------------------------------------------------------------------------

def discriminator_kernel(x_ref,
                         wa_ref, ba_ref,     # folded conv1 @ fc1
                         wb_ref, bb_ref,     # folded conv2 @ fc2
                         wc_ref, bc_ref,     # folded conv3, 4 maxpool phases fused along N
                         wd_ref, bd_ref,     # fc3 first Linear
                         we_ref, be_ref,     # fc3 final Linear(256, 1)
                         out_ref):
    act_dtype = ba_ref.dtype            # bf16 on v6e/v7x, f32 on v5e/unknown

    def leaky(v):                       # LeakyReLU(0.2), stays in act_dtype
        return jnp.where(v > 0, v, 0.2 * v)

    def mxu(a):                         # bf16 operands for the MXU
        return a if a.dtype == jnp.bfloat16 else a.astype(jnp.bfloat16)

    def dot(a, w_ref):                  # bf16 MXU matmul, f32 accumulation
        return jnp.dot(mxu(a), w_ref[...], preferred_element_type=jnp.float32)

    x = x_ref[...]                                              # (TB, 256) bf16

    # conv1 ('same') folded with fc1 Linear, then LeakyReLU(0.2).
    h = leaky(dot(x, wa_ref).astype(act_dtype) + ba_ref[...])   # (TB, 512)
    # conv2 ('same') folded with fc2 Linear, then LeakyReLU(0.2).
    h = leaky(dot(h, wb_ref).astype(act_dtype) + bb_ref[...])   # (TB, 1024)

    # conv3 ('same') folded with the 4 MaxPool1d(4) phase selections, fused
    # into a single N=1024 dot; the max over the 4 contiguous 256-lane slabs
    # reproduces MaxPool1d(4) exactly.  The conv3 bias is constant within each
    # pooling window, so it is added once after the max.
    p4 = dot(h, wc_ref)                                         # (TB, 1024) f32
    p = p4[:, :D3]
    for r in range(1, F):
        p = jnp.maximum(p, p4[:, r * D3:(r + 1) * D3])
    p = p.astype(act_dtype) + bc_ref[...]                       # (TB, 256)

    # fc3: Linear -> Dropout -> LeakyReLU(0.2) -> Linear(256, 1) -> Sigmoid
    # TODO(synk): nn.Dropout(0.2) implemented as identity (eval-mode semantics).
    h = leaky(dot(p, wd_ref).astype(act_dtype) + bd_ref[...])   # (TB, 256)

    if out_ref.shape[0] == 1:
        # Lane-dense (1, TB) row output: (1,256) @ (256,TB) MXU matmul.
        z = jnp.dot(we_ref[...].astype(jnp.bfloat16), mxu(h).T,
                    preferred_element_type=jnp.float32) + be_ref[...]
    else:
        # (TB, 1) column output: VPU lane reduction (no wasted MXU columns).
        z = jnp.sum(h.astype(jnp.float32) * we_ref[...],
                    axis=-1, keepdims=True) + be_ref[...]
    out_ref[...] = pl.reciprocal(1.0 + jnp.exp(-z), approx=True)


# ----------------------------------------------------------------------------
# Offline "glue": fold PyTorch parameters into the kernel's dense matrices.
# ----------------------------------------------------------------------------

def conv1d_same_dense(w):
    """Fold PyTorch Conv1d(padding='same', zeros) weight (O,C,K) into a dense
    (C*L, O*L) matrix M so that y_flat = x_flat @ M, with flat index c*L + t."""
    O, C, K = w.shape
    left = (K - 1) // 2                  # PyTorch 'same' pads left = (K-1)//2
    M = np.zeros((C, L, O, L), dtype=np.float32)
    t_out = np.arange(L)
    for j in range(K):
        t_in = t_out + j - left
        valid = (t_in >= 0) & (t_in < L)
        ti, to = t_in[valid], t_out[valid]
        M[:, ti, :, to] = w[:, :, j].T[None, :, :]
    return M.reshape(C * L, O * L)


def build_kernel_params(P, act_dtype=jnp.float32):
    """Fold (conv1,fc1), (conv2,fc2), (conv3 + fused maxpool phases) offline.
    Big matrices -> bf16 (MXU dtype); biases -> act_dtype; final row -> f32."""
    c1 = conv1d_same_dense(P['w1'])                        # (256, 512)
    c2 = conv1d_same_dense(P['w2'])                        # (512, 1024)
    c3 = conv1d_same_dense(P['w3'])                        # (1024, 1024)

    b1r = np.repeat(P['b1'], L).astype(np.float32)         # (512,)
    b2r = np.repeat(P['b2'], L).astype(np.float32)         # (1024,)

    # conv1 ∘ fc1
    wa = c1 @ P['wfc1'].T                                  # (256, 512)
    ba = b1r @ P['wfc1'].T + P['bfc1']                     # (512,)
    # conv2 ∘ fc2
    wb = c2 @ P['wfc2'].T                                  # (512, 1024)
    bb = b2r @ P['wfc2'].T + P['bfc2']                     # (1024,)
    # conv3 ∘ maxpool: phase r picks conv3 columns o*L + F*u + r; concatenate
    # the 4 phase matrices along N (fused column index r*256 + (o*16 + u)).
    lp = L // F
    c3r = c3.reshape(D2, F * F, lp, F)
    wc = np.concatenate(
        [c3r[:, :, :, r].reshape(D2, D3) for r in range(F)], axis=1)  # (1024, 1024)
    bc = np.repeat(P['b3'], lp).astype(np.float32)         # (256,)
    # fc3
    wd = P['wfc3a'].T.copy()                               # (256, 256)
    bd = P['bfc3a']                                        # (256,)
    we = P['wfc3b'].astype(np.float32)                     # (1, 256)
    be = P['bfc3b'].reshape(1, 1).astype(np.float32)       # (1, 1)

    bf16 = lambda a: jnp.asarray(a, dtype=jnp.bfloat16)
    act = lambda a: jnp.asarray(a, dtype=act_dtype)
    f32 = lambda a: jnp.asarray(a, dtype=jnp.float32)
    return (bf16(wa), act(ba[None, :]),
            bf16(wb), act(bb[None, :]),
            bf16(wc), act(bc[None, :]),
            bf16(wd), act(bd[None, :]),
            f32(we), f32(be))


# ----------------------------------------------------------------------------
# Wrapper: batch-tiled grid with VMEM-resident weights.
# ----------------------------------------------------------------------------

def _activation_dtype():
    """bf16 elementwise only on chips with a bf16 VPU path (v6e / v7x)."""
    try:
        kind = jax.devices()[0].device_kind.lower()
    except Exception:
        return jnp.float32
    if "v6" in kind or "v7" in kind or "tpu7" in kind:
        return jnp.bfloat16
    return jnp.float32


def _cdiv(a, b):
    return -(-a // b)


def _round_up(a, m):
    return _cdiv(a, m) * m


def _choose_tiling(B, batch_tile):
    """Pick (tile_rows, num_tiles, padded_batch): >= 2 tiles whenever possible
    (so v7x's two TensorCores both get work), 8-row aligned so padding waste
    stays small."""
    nt = max(2, _cdiv(B, batch_tile))
    TB = _round_up(_cdiv(B, nt), 8)
    nt = max(1, _cdiv(B, TB))            # drop tiles that rounding made empty
    return TB, nt, TB * nt


def _vmem_limit_bytes(kernel_args, TB, act_dtype):
    weight_bytes = sum(int(a.size) * a.dtype.itemsize for a in kernel_args)
    act_itemsize = jnp.dtype(act_dtype).itemsize
    inter_cols = D1 + 2 * D2 + 2 * D3                 # 512 + 2048 + 512
    scaled = (2 * TB * (F * L) * 2                    # double-buffered bf16 x tiles
              + TB * inter_cols * (4 + act_itemsize)  # f32 MXU results + act copies
              + 2 * TB * 4)                           # output tile
    # Double-buffered resident weights + TB-scaled intermediates + headroom,
    # capped at v7x's 64 MiB per-TensorCore VMEM.
    return int(min(2 * weight_bytes + scaled + (16 << 20), 64 << 20))


def discriminator_forward(x, kernel_args, *, batch_tile=512):
    B = x.shape[0]
    act_dtype = kernel_args[1].dtype

    # NCL flatten: flat index = c*L + t (matches the folded matrices).  bf16
    # halves the only per-grid-step HBM->VMEM DMA; the first dot consumes bf16.
    x_flat = x.reshape(B, F * L).astype(jnp.bfloat16)

    TB, nt, Bp = _choose_tiling(B, batch_tile)
    if Bp != B:
        # 8-row alignment keeps this pad tiny (< 8 rows for most batch sizes).
        x_flat = jnp.pad(x_flat, ((0, Bp - B), (0, 0)))

    def resident(a):
        # Constant index_map -> DMA'd once, stays VMEM-resident across steps.
        return pl.BlockSpec(a.shape, lambda i, _nd=a.ndim: (0,) * _nd)

    in_specs = ([pl.BlockSpec((TB, F * L), lambda i: (i, 0))]
                + [resident(a) for a in kernel_args])

    # Lane-dense (1, Bp) row output whenever the tile width is 128-aligned
    # (always true for a single full-extent tile); else the proven (Bp, 1).
    lane_dense = (nt == 1) or (TB % 128 == 0)
    if lane_dense:
        out_shape = jax.ShapeDtypeStruct((1, Bp), jnp.float32)
        out_spec = pl.BlockSpec((1, TB), lambda i: (0, i))
    else:
        out_shape = jax.ShapeDtypeStruct((Bp, 1), jnp.float32)
        out_spec = pl.BlockSpec((TB, 1), lambda i: (i, 0))

    out = pl.pallas_call(
        discriminator_kernel,
        out_shape=out_shape,
        grid=(nt,),
        in_specs=in_specs,
        out_specs=out_spec,
        compiler_params=pltpu.CompilerParams(
            dimension_semantics=("parallel",),        # batch tiles shard on v7x
            vmem_limit_bytes=_vmem_limit_bytes(kernel_args, TB, act_dtype)),
    )(x_flat, *kernel_args)

    if lane_dense:
        return out[0, :B].reshape(B, 1)
    return out[:B]


# ----------------------------------------------------------------------------
# Pure-JAX f32 reference with identical PyTorch semantics (for validation).
# ----------------------------------------------------------------------------

def reference_forward(x, P):
    B = x.shape[0]

    def conv_same(h, w, b):
        K = w.shape[-1]
        left = (K - 1) // 2
        y = jax.lax.conv_general_dilated(
            h, jnp.asarray(w), window_strides=(1,),
            padding=[(left, K - 1 - left)],
            dimension_numbers=('NCH', 'OIH', 'NCH'))
        return y + jnp.asarray(b)[None, :, None]

    leaky = lambda v: jnp.where(v > 0, v, 0.2 * v)
    h = conv_same(x.reshape(B, F, L), P['w1'], P['b1']).reshape(B, D1)
    h = leaky(h @ jnp.asarray(P['wfc1']).T + jnp.asarray(P['bfc1']))
    h = conv_same(h.reshape(B, 2 * F, L), P['w2'], P['b2']).reshape(B, D2)
    h = leaky(h @ jnp.asarray(P['wfc2']).T + jnp.asarray(P['bfc2']))
    h = conv_same(h.reshape(B, 4 * F, L), P['w3'], P['b3'])             # (B, 16, 64)
    h = h.reshape(B, F * F, L // F, F).max(axis=-1).reshape(B, D3)      # MaxPool1d(4)
    h = leaky(h @ jnp.asarray(P['wfc3a']).T + jnp.asarray(P['bfc3a']))
    z = h @ jnp.asarray(P['wfc3b']).T + jnp.asarray(P['bfc3b'])
    return jax.nn.sigmoid(z)


if __name__ == "__main__":
    # Deterministic synthetic parameters (PyTorch-shaped).
    rng = np.random.default_rng(0)

    def uni(shape, fan_in):
        s = 1.0 / np.sqrt(fan_in)
        return rng.uniform(-s, s, size=shape).astype(np.float32)

    P = dict(
        w1=uni((2 * F, F, 32), F * 32),         b1=uni((2 * F,), F * 32),
        wfc1=uni((D1, D1), D1),                 bfc1=uni((D1,), D1),
        w2=uni((4 * F, 2 * F, 32), 2 * F * 32), b2=uni((4 * F,), 2 * F * 32),
        wfc2=uni((D2, D2), D2),                 bfc2=uni((D2,), D2),
        w3=uni((F * F, 4 * F, 8), 4 * F * 8),   b3=uni((F * F,), 4 * F * 8),
        wfc3a=uni((D3, D3), D3),                bfc3a=uni((D3,), D3),
        wfc3b=uni((1, D3), D3),                 bfc3b=uni((1,), D3),
    )
    act_dtype = _activation_dtype()
    kernel_args = build_kernel_params(P, act_dtype)

    # bf16 folded weights + (on v6e/v7x) bf16 elementwise dominate the error;
    # 3e-2 absolute on the sigmoid output is comfortably above that while still
    # catching any folding / tiling bug (those produce O(1e-1) errors).
    ATOL = 3e-2

    # Inputs are (batch, num_features, comp_length).  The three batches
    # exercise all tiling paths:
    #   B=2   -> single full-extent tile, lane-dense (1, Bp) output
    #   B=260 -> two 136-row tiles (12 pad rows), (Bp, 1) column output
    #   B=512 -> two 256-row tiles, lane-dense (1, Bp) output
    for i, B in enumerate((2, 260, 512)):
        xb = jax.random.normal(jax.random.PRNGKey(i), (B, F, L), dtype=jnp.float32)
        got = jax.block_until_ready(discriminator_forward(xb, kernel_args))
        ref = reference_forward(xb, P)
        np.testing.assert_allclose(np.asarray(got), np.asarray(ref),
                                   atol=ATOL, rtol=0)

    print("KERNEL_OK")
</pallas_src>

<mosaic_0001>
module attributes {stable_mosaic.version = 11 : i64} {
  func.func @discriminator_kernel(%arg0: i32, %arg1: memref<8x256xbf16, #tpu.memory_space<vmem>>, %arg2: memref<256x512xbf16, #tpu.memory_space<vmem>>, %arg3: memref<1x512xf32, #tpu.memory_space<vmem>>, %arg4: memref<512x1024xbf16, #tpu.memory_space<vmem>>, %arg5: memref<1x1024xf32, #tpu.memory_space<vmem>>, %arg6: memref<1024x1024xbf16, #tpu.memory_space<vmem>>, %arg7: memref<1x256xf32, #tpu.memory_space<vmem>>, %arg8: memref<256x256xbf16, #tpu.memory_space<vmem>>, %arg9: memref<1x256xf32, #tpu.memory_space<vmem>>, %arg10: memref<1x256xf32, #tpu.memory_space<vmem>>, %arg11: memref<1x1xf32, #tpu.memory_space<vmem>>, %arg12: memref<1x8xf32, #tpu.memory_space<vmem>>) attributes {dimension_semantics = [#tpu.dimension_semantics<parallel>], iteration_bounds = array<i64: 1>, scalar_prefetch = 0 : i64, scratch_operands = 0 : i64, tpu.core_type = #tpu.core_type<tc>, window_params = [{transform_indices = @transform_0, window_bounds = array<i64: 8, 256>}, {pipeline_mode = #tpu.pipeline_mode<synchronous>, transform_indices = @transform_1, window_bounds = array<i64: 256, 512>}, {pipeline_mode = #tpu.pipeline_mode<synchronous>, transform_indices = @transform_2, window_bounds = array<i64: 1, 512>}, {pipeline_mode = #tpu.pipeline_mode<synchronous>, transform_indices = @transform_3, window_bounds = array<i64: 512, 1024>}, {pipeline_mode = #tpu.pipeline_mode<synchronous>, transform_indices = @transform_4, window_bounds = array<i64: 1, 1024>}, {pipeline_mode = #tpu.pipeline_mode<synchronous>, transform_indices = @transform_5, window_bounds = array<i64: 1024, 1024>}, {pipeline_mode = #tpu.pipeline_mode<synchronous>, transform_indices = @transform_6, window_bounds = array<i64: 1, 256>}, {pipeline_mode = #tpu.pipeline_mode<synchronous>, transform_indices = @transform_7, window_bounds = array<i64: 256, 256>}, {pipeline_mode = #tpu.pipeline_mode<synchronous>, transform_indices = @transform_8, window_bounds = array<i64: 1, 256>}, {pipeline_mode = #tpu.pipeline_mode<synchronous>, transform_indices = @transform_9, window_bounds = array<i64: 1, 256>}, {pipeline_mode = #tpu.pipeline_mode<synchronous>, transform_indices = @transform_10, window_bounds = array<i64: 1, 1>}, {transform_indices = @transform_11, window_bounds = array<i64: 1, 8>}]} {
    %c0 = arith.constant 0 : index
    %c0_0 = arith.constant 0 : index
    %0 = vector.load %arg1[%c0, %c0_0] : memref<8x256xbf16, #tpu.memory_space<vmem>>, vector<8x256xbf16>
    %c0_1 = arith.constant 0 : index
    %c0_2 = arith.constant 0 : index
    %1 = vector.load %arg2[%c0_1, %c0_2] : memref<256x512xbf16, #tpu.memory_space<vmem>>, vector<256x512xbf16>
    %cst = arith.constant dense<0.000000e+00> : vector<8x512xf32>
    %2 = tpu.matmul %0, %1, %cst {dimension_numbers = #tpu.dot_dimension_numbers<[1], [0], [0], [1], [0, 0, 1, 1], [], []>} : vector<8x256xbf16>, vector<256x512xbf16>, vector<8x512xf32> -> vector<8x512xf32>
    %c0_3 = arith.constant 0 : index
    %c0_4 = arith.constant 0 : index
    %3 = vector.load %arg3[%c0_3, %c0_4] : memref<1x512xf32, #tpu.memory_space<vmem>>, vector<1x512xf32>
    %4 = vector.broadcast %3 : vector<1x512xf32> to vector<8x512xf32>
    %5 = arith.addf %2, %4 : vector<8x512xf32>
    %cst_5 = arith.constant 0.000000e+00 : f32
    %6 = vector.broadcast %cst_5 : f32 to vector<8x512xf32>
    %7 = arith.cmpf ogt, %5, %6 : vector<8x512xf32>
    %cst_6 = arith.constant 2.000000e-01 : f32
    %8 = vector.broadcast %cst_6 : f32 to vector<8x512xf32>
    %9 = arith.mulf %8, %5 : vector<8x512xf32>
    %10 = arith.select %7, %5, %9 : vector<8x512xi1>, vector<8x512xf32>
    %11 = arith.truncf %10 : vector<8x512xf32> to vector<8x512xbf16>
    %c0_7 = arith.constant 0 : index
    %c0_8 = arith.constant 0 : index
    %12 = vector.load %arg4[%c0_7, %c0_8] : memref<512x1024xbf16, #tpu.memory_space<vmem>>, vector<512x1024xbf16>
    %cst_9 = arith.constant dense<0.000000e+00> : vector<8x1024xf32>
    %13 = tpu.matmul %11, %12, %cst_9 {dimension_numbers = #tpu.dot_dimension_numbers<[1], [0], [0], [1], [0, 0, 1, 1], [], []>} : vector<8x512xbf16>, vector<512x1024xbf16>, vector<8x1024xf32> -> vector<8x1024xf32>
    %c0_10 = arith.constant 0 : index
    %c0_11 = arith.constant 0 : index
    %14 = vector.load %arg5[%c0_10, %c0_11] : memref<1x1024xf32, #tpu.memory_space<vmem>>, vector<1x1024xf32>
    %15 = vector.broadcast %14 : vector<1x1024xf32> to vector<8x1024xf32>
    %16 = arith.addf %13, %15 : vector<8x1024xf32>
    %cst_12 = arith.constant 0.000000e+00 : f32
    %17 = vector.broadcast %cst_12 : f32 to vector<8x1024xf32>
    %18 = arith.cmpf ogt, %16, %17 : vector<8x1024xf32>
    %cst_13 = arith.constant 2.000000e-01 : f32
    %19 = vector.broadcast %cst_13 : f32 to vector<8x1024xf32>
    %20 = arith.mulf %19, %16 : vector<8x1024xf32>
    %21 = arith.select %18, %16, %20 : vector<8x1024xi1>, vector<8x1024xf32>
    %22 = arith.truncf %21 : vector<8x1024xf32> to vector<8x1024xbf16>
    %c0_14 = arith.constant 0 : index
    %c0_15 = arith.constant 0 : index
    %23 = vector.load %arg6[%c0_14, %c0_15] : memref<1024x1024xbf16, #tpu.memory_space<vmem>>, vector<1024x1024xbf16>
    %cst_16 = arith.constant dense<0.000000e+00> : vector<8x1024xf32>
    %24 = tpu.matmul %22, %23, %cst_16 {dimension_numbers = #tpu.dot_dimension_numbers<[1], [0], [0], [1], [0, 0, 1, 1], [], []>} : vector<8x1024xbf16>, vector<1024x1024xbf16>, vector<8x1024xf32> -> vector<8x1024xf32>
    %25 = vector.extract_strided_slice %24 {offsets = [0, 0], sizes = [8, 256], strides = [1, 1]} : vector<8x1024xf32> to vector<8x256xf32>
    %26 = vector.extract_strided_slice %24 {offsets = [0, 256], sizes = [8, 256], strides = [1, 1]} : vector<8x1024xf32> to vector<8x256xf32>
    %27 = arith.maximumf %25, %26 : vector<8x256xf32>
    %28 = vector.extract_strided_slice %24 {offsets = [0, 512], sizes = [8, 256], strides = [1, 1]} : vector<8x1024xf32> to vector<8x256xf32>
    %29 = arith.maximumf %27, %28 : vector<8x256xf32>
    %30 = vector.extract_strided_slice %24 {offsets = [0, 768], sizes = [8, 256], strides = [1, 1]} : vector<8x1024xf32> to vector<8x256xf32>
    %31 = arith.maximumf %29, %30 : vector<8x256xf32>
    %c0_17 = arith.constant 0 : index
    %c0_18 = arith.constant 0 : index
    %32 = vector.load %arg7[%c0_17, %c0_18] : memref<1x256xf32, #tpu.memory_space<vmem>>, vector<1x256xf32>
    %33 = vector.broadcast %32 : vector<1x256xf32> to vector<8x256xf32>
    %34 = arith.addf %31, %33 : vector<8x256xf32>
    %35 = arith.truncf %34 : vector<8x256xf32> to vector<8x256xbf16>
    %c0_19 = arith.constant 0 : index
    %c0_20 = arith.constant 0 : index
    %36 = vector.load %arg8[%c0_19, %c0_20] : memref<256x256xbf16, #tpu.memory_space<vmem>>, vector<256x256xbf16>
    %cst_21 = arith.constant dense<0.000000e+00> : vector<8x256xf32>
    %37 = tpu.matmul %35, %36, %cst_21 {dimension_numbers = #tpu.dot_dimension_numbers<[1], [0], [0], [1], [0, 0, 1, 1], [], []>} : vector<8x256xbf16>, vector<256x256xbf16>, vector<8x256xf32> -> vector<8x256xf32>
    %c0_22 = arith.constant 0 : index
    %c0_23 = arith.constant 0 : index
    %38 = vector.load %arg9[%c0_22, %c0_23] : memref<1x256xf32, #tpu.memory_space<vmem>>, vector<1x256xf32>
    %39 = vector.broadcast %38 : vector<1x256xf32> to vector<8x256xf32>
    %40 = arith.addf %37, %39 : vector<8x256xf32>
    %cst_24 = arith.constant 0.000000e+00 : f32
    %41 = vector.broadcast %cst_24 : f32 to vector<8x256xf32>
    %42 = arith.cmpf ogt, %40, %41 : vector<8x256xf32>
    %cst_25 = arith.constant 2.000000e-01 : f32
    %43 = vector.broadcast %cst_25 : f32 to vector<8x256xf32>
    %44 = arith.mulf %43, %40 : vector<8x256xf32>
    %45 = arith.select %42, %40, %44 : vector<8x256xi1>, vector<8x256xf32>
    %c0_26 = arith.constant 0 : index
    %c0_27 = arith.constant 0 : index
    %46 = vector.load %arg10[%c0_26, %c0_27] : memref<1x256xf32, #tpu.memory_space<vmem>>, vector<1x256xf32>
    %47 = arith.truncf %46 : vector<1x256xf32> to vector<1x256xbf16>
    %48 = arith.truncf %45 : vector<8x256xf32> to vector<8x256xbf16>
    %49 = tpu.transpose %48, [1, 0] : vector<8x256xbf16> -> vector<256x8xbf16>
    %cst_28 = arith.constant dense<0.000000e+00> : vector<1x8xf32>
    %50 = tpu.matmul %47, %49, %cst_28 {dimension_numbers = #tpu.dot_dimension_numbers<[1], [0], [0], [1], [0, 0, 1, 1], [], []>} : vector<1x256xbf16>, vector<256x8xbf16>, vector<1x8xf32> -> vector<1x8xf32>
    %c0_29 = arith.constant 0 : index
    %c0_30 = arith.constant 0 : index
    %51 = vector.load %arg11[%c0_29, %c0_30] : memref<1x1xf32, #tpu.memory_space<vmem>>, vector<1x1xf32>
    %52 = vector.broadcast %51 : vector<1x1xf32> to vector<1x8xf32>
    %53 = arith.addf %50, %52 : vector<1x8xf32>
    %cst_31 = arith.constant 0.000000e+00 : f32
    %54 = vector.broadcast %cst_31 : f32 to vector<1x8xf32>
    %55 = arith.subf %54, %53 : vector<1x8xf32>
    %56 = math.exp %55 : vector<1x8xf32>
    %cst_32 = arith.constant 1.000000e+00 : f32
    %57 = vector.broadcast %cst_32 : f32 to vector<1x8xf32>
    %58 = arith.addf %57, %56 : vector<1x8xf32>
    %59 = tpu.reciprocal %58 {approx = true} : vector<1x8xf32> -> vector<1x8xf32>
    %c0_33 = arith.constant 0 : index
    %c0_34 = arith.constant 0 : index
    %60 = vector.load %arg12[%c0_33, %c0_34] : memref<1x8xf32, #tpu.memory_space<vmem>>, vector<1x8xf32>
    tpu.vector_store %arg12[%c0_33, %c0_34], %59 {strides = array<i32>} : memref<1x8xf32, #tpu.memory_space<vmem>>, vector<1x8xf32>,
    return
  }
  func.func @transform_0(%arg0: i32) -> (i32, i32) {
    %c0_i32 = arith.constant 0 : i32
    %c0_i32_0 = arith.constant 0 : i32
    return %arg0, %c0_i32 : i32, i32
  }
  func.func @transform_1(%arg0: i32) -> (i32, i32) {
    %c0_i32 = arith.constant 0 : i32
    %c0_i32_0 = arith.constant 0 : i32
    %c0_i32_1 = arith.constant 0 : i32
    return %c0_i32, %c0_i32_0 : i32, i32
  }
  func.func @transform_2(%arg0: i32) -> (i32, i32) {
    %c0_i32 = arith.constant 0 : i32
    %c0_i32_0 = arith.constant 0 : i32
    %c0_i32_1 = arith.constant 0 : i32
    return %c0_i32, %c0_i32_0 : i32, i32
  }
  func.func @transform_3(%arg0: i32) -> (i32, i32) {
    %c0_i32 = arith.constant 0 : i32
    %c0_i32_0 = arith.constant 0 : i32
    %c0_i32_1 = arith.constant 0 : i32
    return %c0_i32, %c0_i32_0 : i32, i32
  }
  func.func @transform_4(%arg0: i32) -> (i32, i32) {
    %c0_i32 = arith.constant 0 : i32
    %c0_i32_0 = arith.constant 0 : i32
    %c0_i32_1 = arith.constant 0 : i32
    return %c0_i32, %c0_i32_0 : i32, i32
  }
  func.func @transform_5(%arg0: i32) -> (i32, i32) {
    %c0_i32 = arith.constant 0 : i32
    %c0_i32_0 = arith.constant 0 : i32
    %c0_i32_1 = arith.constant 0 : i32
    return %c0_i32, %c0_i32_0 : i32, i32
  }
  func.func @transform_6(%arg0: i32) -> (i32, i32) {
    %c0_i32 = arith.constant 0 : i32
    %c0_i32_0 = arith.constant 0 : i32
    %c0_i32_1 = arith.constant 0 : i32
    return %c0_i32, %c0_i32_0 : i32, i32
  }
  func.func @transform_7(%arg0: i32) -> (i32, i32) {
    %c0_i32 = arith.constant 0 : i32
    %c0_i32_0 = arith.constant 0 : i32
    %c0_i32_1 = arith.constant 0 : i32
    return %c0_i32, %c0_i32_0 : i32, i32
  }
  func.func @transform_8(%arg0: i32) -> (i32, i32) {
    %c0_i32 = arith.constant 0 : i32
    %c0_i32_0 = arith.constant 0 : i32
    %c0_i32_1 = arith.constant 0 : i32
    return %c0_i32, %c0_i32_0 : i32, i32
  }
  func.func @transform_9(%arg0: i32) -> (i32, i32) {
    %c0_i32 = arith.constant 0 : i32
    %c0_i32_0 = arith.constant 0 : i32
    %c0_i32_1 = arith.constant 0 : i32
    return %c0_i32, %c0_i32_0 : i32, i32
  }
  func.func @transform_10(%arg0: i32) -> (i32, i32) {
    %c0_i32 = arith.constant 0 : i32
    %c0_i32_0 = arith.constant 0 : i32
    %c0_i32_1 = arith.constant 0 : i32
    return %c0_i32, %c0_i32_0 : i32, i32
  }
  func.func @transform_11(%arg0: i32) -> (i32, i32) {
    %c0_i32 = arith.constant 0 : i32
    %c0_i32_0 = arith.constant 0 : i32
    return %c0_i32, %arg0 : i32, i32
  }
}

</mosaic_0001>

<bundles_post_ra>
// kernel: tpu_custom_call.1
= control target key start
LH: loop header
LB: loop body
LE: loop exit
PB: predicated region body
PF: predicated region fallthrough
CT: control target
= control target key end

     0   :  { %s8303_s0 = inlined_call_operand.hbm [shape: bf16[8,256], index: 0, kind: input, shape index: {}]   ;;  %s8304_s1 = inlined_call_operand.hbm [shape: bf16[256,512], index: 1, kind: input, shape index: {}]   ;;  %s8305_s2 = inlined_call_operand.hbm [shape: f32[1,512], index: 2, kind: input, shape index: {}]   ;;  %s8306_s3 = inlined_call_operand.hbm [shape: bf16[512,1024], index: 3, kind: input, shape index: {}]   ;;  %s8307_s4 = inlined_call_operand.hbm [shape: f32[1,1024], index: 4, kind: input, shape index: {}]   ;;  %s8308_s5 = inlined_call_operand.hbm [shape: bf16[1024,1024], index: 5, kind: input, shape index: {}]   ;;  %s8309_s6 = inlined_call_operand.hbm [shape: f32[1,256], index: 6, kind: input, shape index: {}]   ;;  %s8310_s7 = inlined_call_operand.hbm [shape: bf16[256,256], index: 7, kind: input, shape index: {}]   ;;  %s8311_s8 = inlined_call_operand.hbm [shape: f32[1,256], index: 8, kind: input, shape index: {}]   ;;  %s8312_s9 = inlined_call_operand.hbm [shape: f32[1,256], index: 9, kind: input, shape index: {}]   ;;  %s8313_s10 = inlined_call_operand.<no memory space> [shape: f32[1,1], index: 10, kind: input, shape index: {}]   ;;  %s8314_s11 = inlined_call_operand.hbm [shape: f32[1,8], index: 11, kind: output, shape index: {}]  }
   0x1   :  { %v16_v0 = vstv %s8313_s10 }
   0x2   :  { %17 = vst [vmem:[#allocation2] sm:$0x1] %v16_v0 }
   0x3   :  { %18 = vsyncpa [#allocation4], 0 }
   0x4   :  { %19 = vsyncpa [#allocation7], 0 }
   0x5   :  { %20 = vsyncpa [#allocation10], 0 }
   0x6   :  { %21 = vsyncpa [#allocation13], 0 }
   0x7   :  { %22 = vsyncpa [#allocation16], 0 }
   0x8   :  { %23 = vsyncpa [#allocation19], 0 }
   0x9   :  { %24 = vsyncpa [#allocation5], 0  ;;  %s7980_s19 = smov [#allocation6]  }
   0xa   :  { %s40_s20 = sshll.u32 %s7980_s19, 4  ;;  %s41_s20 = int_to_ptr.vmem [resolvable:$true] %s40_s20 }
   0xb   :  { %s7754_s21 = scalar_lea.vmem %s41_s20, 8192  ;;  %p7759_p1 = scmp.lt.s32.totalorder %s41_s20, %s41_s20 }
   0xc   :  { %p7755_p0 = scmp.ne.s32.totalorder %s41_s20, %s7754_s21  ;;  %p7760_p2 = scmp.lt.s32.totalorder %s7754_s21, %s7754_s21 }
   0xe   :  { %p7761_p3 = por %p7760_p2, %p7759_p1 }
  0x10   :  { %p7762_p4 = pnand %p7761_p3, %p7755_p0 }
  0x12   :  { %7765 = shalt.err (!%p7762_p4)
}
  0x13   :  { %s7981_s22 = smov 256   ;;  %s7982_s10 = smov 16  }
  0x14   :  { %46 = dma.hbm_to_vmem [thread:$0]  %s8304_s1, 8192, %s41_s20, [#allocation7], %s7981_s22, %s7981_s22, %s7982_s10  }
  0x15   :  { %s7983_s25 = smov [#allocation9]  }
  0x16   :  { %s62_s26 = sshll.u32 %s7983_s25, 4  ;;  %s63_s26 = int_to_ptr.vmem [resolvable:$true] %s62_s26 }
  0x17   :  { %s7774_s27 = scalar_lea.vmem %s63_s26, 32768  ;;  %p7779_p6 = scmp.lt.s32.totalorder %s63_s26, %s63_s26 }
  0x18   :  { %p7775_p5 = scmp.ne.s32.totalorder %s63_s26, %s7774_s27  ;;  %p7780_p7 = scmp.lt.s32.totalorder %s7774_s27, %s7774_s27 }
  0x1a   :  { %p7781_p8 = por %p7780_p7, %p7779_p6 }
  0x1c   :  { %p7782_p9 = pnand %p7781_p8, %p7775_p5 }
  0x1e   :  { %7785 = shalt.err (!%p7782_p9)
}
  0x1f   :  { %s7984_s28 = smov 512   ;;  %s7985_s29 = smov 32  }
  0x20   :  { %68 = dma.hbm_to_vmem [thread:$0]  %s8306_s3, 32768, %s63_s26, [#allocation10], %s7984_s28, %s7984_s28, %s7985_s29  }
  0x21   :  { %s7986_s13 = smov [#allocation12]   ;;  %s7987_s15 = smov [#allocation15]  }
  0x22   :  { %s84_s14 = sshll.u32 %s7986_s13, 4  ;;  %s106_s1 = sshll.u32 %s7987_s15, 4  ;;  %s85_s14 = int_to_ptr.vmem [resolvable:$true] %s84_s14  ;;  %s107_s1 = int_to_ptr.vmem [resolvable:$true] %s106_s1 }
  0x23   :  { %s7794_s16 = scalar_lea.vmem %s85_s14, 65536  ;;  %p7799_p11 = scmp.lt.s32.totalorder %s85_s14, %s85_s14 }
  0x24   :  { %p7795_p10 = scmp.ne.s32.totalorder %s85_s14, %s7794_s16  ;;  %p7800_p12 = scmp.lt.s32.totalorder %s7794_s16, %s7794_s16 }
  0x26   :  { %p7801_p13 = por %p7800_p12, %p7799_p11 }
  0x28   :  { %p7802_p0 = pnand %p7801_p13, %p7795_p10 }
  0x2a   :  { %7805 = shalt.err (!%p7802_p0)
}
  0x2b   :  { %90 = dma.hbm_to_vmem [thread:$0]  %s8308_s5, 65536, %s85_s14, [#allocation13], %s7984_s28, %s7984_s28, %s7985_s29  }
  0x2c   :  { %s7814_s19 = scalar_lea.vmem %s107_s1, 4096  ;;  %p7819_p2 = scmp.lt.s32.totalorder %s107_s1, %s107_s1 }
  0x2d   :  { %p7815_p1 = scmp.ne.s32.totalorder %s107_s1, %s7814_s19  ;;  %p7820_p3 = scmp.lt.s32.totalorder %s7814_s19, %s7814_s19 }
  0x2f   :  { %p7821_p4 = por %p7820_p3, %p7819_p2 }
  0x31   :  { %p7822_p5 = pnand %p7821_p4, %p7815_p1 }
  0x33   :  { %7825 = shalt.err (!%p7822_p5)
}
  0x34   :  { %s7988_s3 = smov 128   ;;  %s7989_s20 = smov 8  }
  0x35   :  { %112 = dma.hbm_to_vmem [thread:$0]  %s8310_s7, 4096, %s107_s1, [#allocation16], %s7988_s3, %s7988_s3, %s7989_s20  }
  0x36   :  { %s7990_s10 = smov [#allocation3]   ;;  %s7991_s24 = smov [#allocation8]  }
  0x37   :  { %s31_s23 = sshll.u32 %s7990_s10, 4  ;;  %s53_s25 = sshll.u32 %s7991_s24, 4  ;;  %s32_s23 = int_to_ptr.vmem [resolvable:$true] %s31_s23  ;;  %s54_s25 = int_to_ptr.vmem [resolvable:$true] %s53_s25 }
  0x38   :  { %s7834_s5 = scalar_lea.vmem %s32_s23, 128  ;;  %p7839_p7 = scmp.lt.s32.totalorder %s32_s23, %s32_s23 }
  0x39   :  { %p7835_p6 = scmp.ne.s32.totalorder %s32_s23, %s7834_s5  ;;  %p7840_p8 = scmp.lt.s32.totalorder %s7834_s5, %s7834_s5 }
  0x3b   :  { %p7841_p9 = por %p7840_p8, %p7839_p7 }
  0x3d   :  { %p7842_p10 = pnand %p7841_p9, %p7835_p6 }
  0x3f   :  { %7845 = shalt.err (!%p7842_p10)
}
  0x40   :  { %34 = dma.hbm_to_vmem [thread:$0]  %s8303_s0, 128, %s32_s23, [#allocation4]  }
  0x41   :  { %s7854_s28 = scalar_lea.vmem %s54_s25, 64  ;;  %p7859_p12 = scmp.lt.s32.totalorder %s54_s25, %s54_s25 }
  0x42   :  { %p7855_p11 = scmp.ne.s32.totalorder %s54_s25, %s7854_s28  ;;  %p7860_p13 = scmp.lt.s32.totalorder %s7854_s28, %s7854_s28 }
  0x44   :  { %p7861_p0 = por %p7860_p13, %p7859_p12 }
  0x46   :  { %p7862_p1 = pnand %p7861_p0, %p7855_p11 }
  0x48   :  { %7865 = shalt.err (!%p7862_p1)
}
  0x49   :  { %56 = dma.hbm_to_vmem [thread:$0]  %s8305_s2, 64, %s54_s25, [#allocation7]  }
  0x4a   :  { %s7992_s30 = smov [#allocation11]   ;;  %s7993_s13 = smov [#allocation14]  }
  0x4b   :  { %s75_s12 = sshll.u32 %s7992_s30, 4  ;;  %s97_s14 = sshll.u32 %s7993_s13, 4  ;;  %s76_s12 = int_to_ptr.vmem [resolvable:$true] %s75_s12  ;;  %s98_s14 = int_to_ptr.vmem [resolvable:$true] %s97_s14 }
  0x4c   :  { %s7874_s15 = scalar_lea.vmem %s76_s12, 128  ;;  %p7879_p3 = scmp.lt.s32.totalorder %s76_s12, %s76_s12 }
  0x4d   :  { %p7875_p2 = scmp.ne.s32.totalorder %s76_s12, %s7874_s15  ;;  %p7880_p4 = scmp.lt.s32.totalorder %s7874_s15, %s7874_s15 }
  0x4f   :  { %p7881_p5 = por %p7880_p4, %p7879_p3 }
  0x51   :  { %p7882_p6 = pnand %p7881_p5, %p7875_p2 }
  0x53   :  { %7885 = shalt.err (!%p7882_p6)
}
  0x54   :  { %78 = dma.hbm_to_vmem [thread:$0]  %s8307_s4, 128, %s76_s12, [#allocation10]  }
  0x55   :  { %s7894_s16 = scalar_lea.vmem %s98_s14, 32  ;;  %p7899_p8 = scmp.lt.s32.totalorder %s98_s14, %s98_s14 }
  0x56   :  { %p7895_p7 = scmp.ne.s32.totalorder %s98_s14, %s7894_s16  ;;  %p7900_p9 = scmp.lt.s32.totalorder %s7894_s16, %s7894_s16 }
  0x58   :  { %p7901_p10 = por %p7900_p9, %p7899_p8 }
  0x5a   :  { %p7902_p11 = pnand %p7901_p10, %p7895_p7 }
  0x5c   :  { %7905 = shalt.err (!%p7902_p11)
}
  0x5d   :  { %100 = dma.hbm_to_vmem [thread:$0]  %s8309_s6, 32, %s98_s14, [#allocation13]  }
  0x5e   :  { %s7994_s18 = smov [#allocation17]   ;;  %s7995_s3 = smov [#allocation18]  }
  0x5f   :  { %s119_s19 = sshll.u32 %s7994_s18, 4  ;;  %s129_s20 = sshll.u32 %s7995_s3, 4  ;;  %s120_s19 = int_to_ptr.vmem [resolvable:$true] %s119_s19  ;;  %s130_s20 = int_to_ptr.vmem [resolvable:$true] %s129_s20 }
  0x60   :  { %s7914_s21 = scalar_lea.vmem %s120_s19, 32  ;;  %p7919_p13 = scmp.lt.s32.totalorder %s120_s19, %s120_s19 }
  0x61   :  { %p7915_p12 = scmp.ne.s32.totalorder %s120_s19, %s7914_s21  ;;  %p7920_p0 = scmp.lt.s32.totalorder %s7914_s21, %s7914_s21 }
  0x63   :  { %p7921_p1 = por %p7920_p0, %p7919_p13 }
  0x65   :  { %p7922_p2 = pnand %p7921_p1, %p7915_p12 }
  0x67   :  { %7925 = shalt.err (!%p7922_p2)
}
  0x68   :  { %122 = dma.hbm_to_vmem [thread:$0]  %s8311_s8, 32, %s120_s19, [#allocation16]  }
  0x69   :  { %s7934_s10 = scalar_lea.vmem %s130_s20, 32  ;;  %p7939_p4 = scmp.lt.s32.totalorder %s130_s20, %s130_s20 }
  0x6a   :  { %p7935_p3 = scmp.ne.s32.totalorder %s130_s20, %s7934_s10  ;;  %p7940_p5 = scmp.lt.s32.totalorder %s7934_s10, %s7934_s10 }
  0x6c   :  { %p7941_p6 = por %p7940_p5, %p7939_p4 }
  0x6e   :  { %p7942_p7 = pnand %p7941_p6, %p7935_p3 }
  0x70   :  { %7945 = shalt.err (!%p7942_p7)
}
  0x71   :  { %132 = dma.hbm_to_vmem [thread:$0]  %s8312_s9, 32, %s130_s20, [#allocation19]  }
  0x72   :  { %7966 = dma.done.wait [#allocation4], 128  }
  0x73   :  { %7967 = vsyncadd [#allocation4], 4294967168 }
  0x74   :  { %7968 = dma.done.wait [#allocation7], 8256  }
  0x75   :  { %7969 = vsyncadd [#allocation7], 4294959040 }
  0x76   :  { %7970 = dma.done.wait [#allocation10], 32896  }
  0x77   :  { %7971 = vsyncadd [#allocation10], 4294934400 }
  0x78   :  { %7972 = dma.done.wait [#allocation13], 65568  }
  0x79   :  { %7973 = vsyncadd [#allocation13], 4294901728 }
  0x7a   :  { %7974 = dma.done.wait [#allocation16], 4128  }
  0x7b   :  { %7975 = vsyncadd [#allocation16], 4294963168 }
  0x7c   :  { %7976 = dma.done.wait [#allocation19], 32  }
  0x7d   :  { %7977 = vsyncadd [#allocation19], 4294967264  ;;  %v7595_v1 = vld [vmem:[#allocation6 + $0xe4] ss:$16 sps:$4 sm:$0xff]   ;;  %v7597_v2 = vld [vmem:[#allocation6 + $0xec] ss:$16 sps:$4 sm:$0xff]  }
  0x7e   :  { %580 = vmatprep.subr.bf16.mxu0 %v7595_v1  ;;  %v7599_v3 = vld [vmem:[#allocation6 + $0xe0] ss:$16 sps:$4 sm:$0xff]   ;;  %v7600_v4 = vld [vmem:[#allocation6 + $0xe8] ss:$16 sps:$4 sm:$0xff]   ;;  %621 = vmatprep.subr.bf16.mxu1 %v7597_v2  ;;  %v7601_v5 = vld [vmem:[#allocation6 + $0xc4] ss:$16 sps:$4 sm:$0xff]  }
  0x7f   :  { %581 = vmatpush1.bf16.msra.mxu0 %v7599_v3  ;;  %622 = vmatpush1.bf16.msra.mxu1 %v7600_v4  ;;  %v7603_v6 = vld [vmem:[#allocation6 + $0xcc] ss:$16 sps:$4 sm:$0xff]   ;;  %v7605_v7 = vld [vmem:[#allocation6 + $0xc0] ss:$16 sps:$4 sm:$0xff]   ;;  %v7606_v8 = vld [vmem:[#allocation6 + $0xc8] ss:$16 sps:$4 sm:$0xff]  }
  0x80   :  { %582 = vmatprep.subr.bf16.mxu0 %v7601_v5  ;;  %623 = vmatprep.subr.bf16.mxu1 %v7603_v6  ;;  %v7607_v9 = vld [vmem:[#allocation6 + $0xa4] ss:$16 sps:$4 sm:$0xff]   ;;  %v7609_v10 = vld [vmem:[#allocation6 + $0xac] ss:$16 sps:$4 sm:$0xff]   ;;  %v7611_v11 = vld [vmem:[#allocation6 + $0xa0] ss:$16 sps:$4 sm:$0xff]  }
  0x81   :  { %v7612_v12 = vld [vmem:[#allocation6 + $0xa8] ss:$16 sps:$4 sm:$0xff]   ;;  %v7613_v13 = vld [vmem:[#allocation6 + $0x84] ss:$16 sps:$4 sm:$0xff]   ;;  %v7615_v14 = vld [vmem:[#allocation6 + $0x8c] ss:$16 sps:$4 sm:$0xff]  }
  0x82   :  { %v7617_v15 = vld [vmem:[#allocation6 + $0x80] ss:$16 sps:$4 sm:$0xff]   ;;  %v7618_v16 = vld [vmem:[#allocation6 + $0x88] ss:$16 sps:$4 sm:$0xff]   ;;  %v7619_v17 = vld [vmem:[#allocation6 + $0x64] ss:$16 sps:$4 sm:$0xff]  }
  0x83   :  { %583 = vmatpush1.bf16.msra.mxu0 %v7605_v7  ;;  %624 = vmatpush1.bf16.msra.mxu1 %v7606_v8  ;;  %v7621_v18 = vld [vmem:[#allocation6 + $0x6c] ss:$16 sps:$4 sm:$0xff]   ;;  %v7623_v19 = vld [vmem:[#allocation6 + $0x60] ss:$16 sps:$4 sm:$0xff]   ;;  %v7624_v20 = vld [vmem:[#allocation6 + $0x68] ss:$16 sps:$4 sm:$0xff]  }
  0x84   :  { %584 = vmatprep.subr.bf16.mxu0 %v7607_v9  ;;  %625 = vmatprep.subr.bf16.mxu1 %v7609_v10  ;;  %v7625_v21 = vld [vmem:[#allocation6 + $0x44] ss:$16 sps:$4 sm:$0xff]   ;;  %v7627_v22 = vld [vmem:[#allocation6 + $0x4c] ss:$16 sps:$4 sm:$0xff]   ;;  %v7629_v23 = vld [vmem:[#allocation6 + $0x40] ss:$16 sps:$4 sm:$0xff]  }
  0x85   :  { %v7630_v24 = vld [vmem:[#allocation6 + $0x48] ss:$16 sps:$4 sm:$0xff]   ;;  %v7631_v25 = vld [vmem:[#allocation6 + $0x24] ss:$16 sps:$4 sm:$0xff]   ;;  %v7633_v26 = vld [vmem:[#allocation6 + $0x2c] ss:$16 sps:$4 sm:$0xff]  }
  0x86   :  { %v7635_v27 = vld [vmem:[#allocation6 + $0x20] ss:$16 sps:$4 sm:$0xff]   ;;  %v7636_v28 = vld [vmem:[#allocation6 + $0x28] ss:$16 sps:$4 sm:$0xff]   ;;  %v7637_v29 = vld [vmem:[#allocation6 + $0x4] ss:$16 sps:$4 sm:$0xff]  }
  0x87   :  { %585 = vmatpush1.bf16.msra.mxu0 %v7611_v11  ;;  %626 = vmatpush1.bf16.msra.mxu1 %v7612_v12  ;;  %v7639_v30 = vld [vmem:[#allocation6 + $0xc] ss:$16 sps:$4 sm:$0xff]   ;;  %v7641_v31 = vld [vmem:[#allocation6] ss:$16 sps:$4 sm:$0xff]   ;;  %v7642_v32 = vld [vmem:[#allocation6 + $0x8] ss:$16 sps:$4 sm:$0xff]  }
  0x88   :  { %586 = vmatprep.subr.bf16.mxu0 %v7613_v13  ;;  %627 = vmatprep.subr.bf16.mxu1 %v7615_v14  ;;  %v7643_v33 = vld [vmem:[#allocation6 + $0x1e4] ss:$16 sps:$4 sm:$0xff]   ;;  %v7645_v34 = vld [vmem:[#allocation6 + $0x1ec] ss:$16 sps:$4 sm:$0xff]   ;;  %v7647_v35 = vld [vmem:[#allocation6 + $0x1e0] ss:$16 sps:$4 sm:$0xff]  }
  0x89   :  { %v7648_v36 = vld [vmem:[#allocation6 + $0x1e8] ss:$16 sps:$4 sm:$0xff]   ;;  %v7649_v37 = vld [vmem:[#allocation6 + $0x1c4] ss:$16 sps:$4 sm:$0xff]   ;;  %v7651_v38 = vld [vmem:[#allocation6 + $0x1cc] ss:$16 sps:$4 sm:$0xff]  }
  0x8a   :  { %v7653_v39 = vld [vmem:[#allocation6 + $0x1c0] ss:$16 sps:$4 sm:$0xff]   ;;  %v7654_v40 = vld [vmem:[#allocation6 + $0x1c8] ss:$16 sps:$4 sm:$0xff]   ;;  %v7655_v41 = vld [vmem:[#allocation6 + $0x1a4] ss:$16 sps:$4 sm:$0xff]  }
  0x8b   :  { %587 = vmatpush1.bf16.msra.mxu0 %v7617_v15  ;;  %628 = vmatpush1.bf16.msra.mxu1 %v7618_v16  ;;  %v7657_v42 = vld [vmem:[#allocation6 + $0x1ac] ss:$16 sps:$4 sm:$0xff]   ;;  %v7659_v43 = vld [vmem:[#allocation6 + $0x1a0] ss:$16 sps:$4 sm:$0xff]   ;;  %v7660_v44 = vld [vmem:[#allocation6 + $0x1a8] ss:$16 sps:$4 sm:$0xff]  }
  0x8c   :  { %588 = vmatprep.subr.bf16.mxu0 %v7619_v17  ;;  %629 = vmatprep.subr.bf16.mxu1 %v7621_v18  ;;  %v7661_v45 = vld [vmem:[#allocation6 + $0x184] ss:$16 sps:$4 sm:$0xff]   ;;  %v7663_v46 = vld [vmem:[#allocation6 + $0x18c] ss:$16 sps:$4 sm:$0xff]   ;;  %v7665_v49 = vld [vmem:[#allocation6 + $0x180] ss:$16 sps:$4 sm:$0xff]  }
  0x8d   :  { %v166_v47 = vld [vmem:[#allocation3] sm:$0xff]  ;;  %v7667_v51 = vld [vmem:[#allocation6 + $0x164] ss:$16 sps:$4 sm:$0xff]   ;;  %v7671_v53 = vld [vmem:[#allocation6 + $0x160] ss:$16 sps:$4 sm:$0xff]   ;;  %s7997_s8 = smov [#allocation20]  }
  0x8e   :  { %v6711_v48 = vcombine.high %v166_v47, %v166_v47  ;;  %v7666_v50 = vld [vmem:[#allocation6 + $0x188] ss:$16 sps:$4 sm:$0xff]   ;;  %v7669_v52 = vld [vmem:[#allocation6 + $0x16c] ss:$16 sps:$4 sm:$0xff]   ;;  %v7673_v55 = vld [vmem:[#allocation6 + $0x144] ss:$16 sps:$4 sm:$0xff]   ;;  %v6710_v13 = vcombine.low %v166_v47, %v166_v47 }
  0x8f   :  { %589 = vmatpush1.bf16.msra.mxu0 %v7623_v19  ;;  %630 = vmatpush1.bf16.msra.mxu1 %v7624_v20  ;;  %v7672_v54 = vld [vmem:[#allocation6 + $0x168] ss:$16 sps:$4 sm:$0xff]   ;;  %v7675_v56 = vld [vmem:[#allocation6 + $0x14c] ss:$16 sps:$4 sm:$0xff]   ;;  %v7677_v57 = vld [vmem:[#allocation6 + $0x140] ss:$16 sps:$4 sm:$0xff]  }
  0x90   :  { %590 = vmatprep.subr.bf16.mxu0 %v7625_v21  ;;  %631 = vmatprep.subr.bf16.mxu1 %v7627_v22  ;;  %v7678_v58 = vld [vmem:[#allocation6 + $0x148] ss:$16 sps:$4 sm:$0xff]   ;;  %v7679_v59 = vld [vmem:[#allocation6 + $0x124] ss:$16 sps:$4 sm:$0xff]   ;;  %v7681_v60 = vld [vmem:[#allocation6 + $0x12c] ss:$16 sps:$4 sm:$0xff]  }
  0x91   :  { %612 = vmatprep.mubr.bf16.mxu0 %v6711_v48  ;;  %653 = vmatprep.mubr.bf16.mxu1 %v6711_v48  ;;  %v7683_v61 = vld [vmem:[#allocation6 + $0x120] ss:$16 sps:$4 sm:$0xff]   ;;  %v7684_v62 = vld [vmem:[#allocation6 + $0x128] ss:$16 sps:$4 sm:$0xff]   ;;  %v7685_v63 = vld [vmem:[#allocation6 + $0x104] ss:$16 sps:$4 sm:$0xff]  }
  0x92   :  { %v7687_v0 = vld [vmem:[#allocation6 + $0x10c] ss:$16 sps:$4 sm:$0xff]   ;;  %v734_v1 = vld [vmem:[#allocation9 + $0x1c0] sm:$0xff]  ;;  %v7689_v5 = vld [vmem:[#allocation6 + $0x100] ss:$16 sps:$4 sm:$0xff]   ;;  %s6696_s9 = sshll.u32 %s7997_s8, 4  ;;  %s6697_s9 = int_to_ptr.vmem [resolvable:$true] %s6696_s9 }
  0x93   :  { %591 = vmatpush1.bf16.msra.mxu0 %v7629_v23  ;;  %632 = vmatpush1.bf16.msra.mxu1 %v7630_v24  ;;  %v738_v2 = vld [vmem:[#allocation9 + $0x1e0] sm:$0xff]  ;;  %vm6688_vm14 = vcmask 57344   ;;  %s7946_s24 = scalar_lea.vmem %s6697_s9, 16  ;;  %s7950_s25 = scalar_lea.vmem %s6697_s9, 32 }
  0x94   :  { %592 = vmatprep.subr.bf16.mxu0 %v7631_v25  ;;  %633 = vmatprep.subr.bf16.mxu1 %v7633_v26  ;;  %v862_v3 = vld [vmem:[#allocation9 + $0x5c0] sm:$0xff]  ;;  %v6833_v8 = vcombine.high %v734_v1, %v738_v2  ;;  %v6832_v14 = vcombine.low %v734_v1, %v738_v2  ;;  %p7947_p8 = scmp.ne.s32.totalorder %s6697_s9, %s7946_s24  ;;  %p7951_p9 = scmp.lt.s32.totalorder %s6697_s9, %s6697_s9 }
  0x95   :  { %v866_v4 = vld [vmem:[#allocation9 + $0x5e0] sm:$0xff]  ;;  %p7952_p10 = scmp.lt.s32.totalorder %s7950_s25, %s7946_s24 }
  0x96   :  { %v7690_v6 = vld [vmem:[#allocation6 + $0x108] ss:$16 sps:$4 sm:$0xff]   ;;  %v6961_v9 = vcombine.high %v862_v3, %v866_v4  ;;  %v6960_v15 = vcombine.low %v862_v3, %v866_v4 }
  0x97   :  { %593 = vmatpush1.bf16.msra.mxu0 %v7635_v27  ;;  %634 = vmatpush1.bf16.msra.mxu1 %v7636_v28  ;;  %v726_v7 = vld [vmem:[#allocation9 + $0x180] sm:$0xff]  ;;  %p7953_p11 = por %p7952_p10, %p7951_p9 }
  0x98   :  { %594 = vmatprep.subr.bf16.mxu0 %v7637_v29  ;;  %635 = vmatprep.subr.bf16.mxu1 %v7639_v30  ;;  %v730_v10 = vld [vmem:[#allocation9 + $0x1a0] sm:$0xff] }
  0x99   :  { %v854_v11 = vld [vmem:[#allocation9 + $0x580] sm:$0xff]  ;;  %v6825_v20 = vcombine.high %v726_v7, %v730_v10  ;;  %v6824_v22 = vcombine.low %v726_v7, %v730_v10  ;;  %p7954_p12 = pnand %p7953_p11, %p7947_p8 }
  0x9a   :  { %v858_v12 = vld [vmem:[#allocation9 + $0x5a0] sm:$0xff] }
  0x9b   :  { %595 = vmatpush1.bf16.msra.mxu0 %v7641_v31  ;;  %636 = vmatpush1.bf16.msra.mxu1 %v7642_v32  ;;  %v718_v16 = vld [vmem:[#allocation9 + $0x140] sm:$0xff]  ;;  %v6953_v21 = vcombine.high %v854_v11, %v858_v12  ;;  %v6952_v23 = vcombine.low %v854_v11, %v858_v12 }
  0x9c   :  { %596 = vmatprep.subr.bf16.mxu0 %v7643_v33  ;;  %637 = vmatprep.subr.bf16.mxu1 %v7645_v34  ;;  %v722_v17 = vld [vmem:[#allocation9 + $0x160] sm:$0xff] }
  0x9d   :  { %v846_v18 = vld [vmem:[#allocation9 + $0x540] sm:$0xff]  ;;  %v6817_v28 = vcombine.high %v718_v16, %v722_v17  ;;  %v6816_v30 = vcombine.low %v718_v16, %v722_v17 }
  0x9e   :  { %v850_v19 = vld [vmem:[#allocation9 + $0x560] sm:$0xff] }
  0x9f   :  { %597 = vmatpush2.bf16.msra.mxu0 %v7647_v35  ;;  %638 = vmatpush2.bf16.msra.mxu1 %v7648_v36  ;;  %v710_v24 = vld [vmem:[#allocation9 + $0x100] sm:$0xff]  ;;  %v6945_v29 = vcombine.high %v846_v18, %v850_v19  ;;  %v6944_v31 = vcombine.low %v846_v18, %v850_v19 }
  0xa0   :  { %598 = vmatprep.subr.bf16.mxu0 %v7649_v37  ;;  %639 = vmatprep.subr.bf16.mxu1 %v7651_v38  ;;  %v714_v25 = vld [vmem:[#allocation9 + $0x120] sm:$0xff] }
  0xa1   :  { %v838_v26 = vld [vmem:[#allocation9 + $0x500] sm:$0xff]  ;;  %v6809_v32 = vcombine.high %v710_v24, %v714_v25  ;;  %v6808_v38 = vcombine.low %v710_v24, %v714_v25 }
  0xa2   :  { %v842_v27 = vld [vmem:[#allocation9 + $0x520] sm:$0xff] }
  0xa3   :  { %599 = vmatpush2.bf16.msra.mxu0 %v7653_v39  ;;  %640 = vmatpush2.bf16.msra.mxu1 %v7654_v40  ;;  %v6937_v33 = vcombine.high %v838_v26, %v842_v27  ;;  %v702_v34 = vld [vmem:[#allocation9 + $0xc0] sm:$0xff]  ;;  %v6936_v39 = vcombine.low %v838_v26, %v842_v27 }
  0xa4   :  { %600 = vmatprep.subr.bf16.mxu0 %v7655_v41  ;;  %641 = vmatprep.subr.bf16.mxu1 %v7657_v42  ;;  %v706_v35 = vld [vmem:[#allocation9 + $0xe0] sm:$0xff] }
  0xa5   :  { %v830_v36 = vld [vmem:[#allocation9 + $0x4c0] sm:$0xff]  ;;  %v6801_v40 = vcombine.high %v702_v34, %v706_v35 }
  0xa6   :  { %v834_v37 = vld [vmem:[#allocation9 + $0x4e0] sm:$0xff] }
  0xa7   :  { %601 = vmatpush2.bf16.msra.mxu0 %v7659_v43  ;;  %642 = vmatpush2.bf16.msra.mxu1 %v7660_v44  ;;  %v6929_v41 = vcombine.high %v830_v36, %v834_v37  ;;  %v694_v42 = vld [vmem:[#allocation9 + $0x80] sm:$0xff]  ;;  %v6928_v47 = vcombine.low %v830_v36, %v834_v37 }
  0xa8   :  { %602 = vmatprep.subr.bf16.mxu0 %v7661_v45  ;;  %643 = vmatprep.subr.bf16.mxu1 %v7663_v46  ;;  %v698_v43 = vld [vmem:[#allocation9 + $0xa0] sm:$0xff]  ;;  %v6800_v46 = vcombine.low %v702_v34, %v706_v35 }
  0xa9   :  { %v822_v44 = vld [vmem:[#allocation9 + $0x480] sm:$0xff]  ;;  %v6793_v48 = vcombine.high %v694_v42, %v698_v43 }
  0xaa   :  { %v826_v45 = vld [vmem:[#allocation9 + $0x4a0] sm:$0xff] }
  0xab   :  { %603 = vmatpush2.bf16.msra.mxu0 %v7665_v49  ;;  %644 = vmatpush2.bf16.msra.mxu1 %v7666_v50  ;;  %v6921_v49 = vcombine.high %v822_v44, %v826_v45  ;;  %v686_v50 = vld [vmem:[#allocation9 + $0x40] sm:$0xff] }
  0xac   :  { %604 = vmatprep.subr.bf16.mxu0 %v7667_v51  ;;  %645 = vmatprep.subr.bf16.mxu1 %v7669_v52  ;;  %v690_v51 = vld [vmem:[#allocation9 + $0x60] sm:$0xff] }
  0xad   :  { %v814_v52 = vld [vmem:[#allocation9 + $0x440] sm:$0xff] }
  0xae   :  { %v798_v2 = vld [vmem:[#allocation9 + $0x3c0] sm:$0xff] }
  0xaf   :  { %605 = vmatpush2.bf16.msra.mxu0 %v7671_v53  ;;  %646 = vmatpush2.bf16.msra.mxu1 %v7672_v54  ;;  %v818_v53 = vld [vmem:[#allocation9 + $0x460] sm:$0xff]  ;;  %v6792_v54 = vcombine.low %v694_v42, %v698_v43 }
  0xb0   :  { %606 = vmatprep.subr.bf16.mxu0 %v7673_v55  ;;  %647 = vmatprep.subr.bf16.mxu1 %v7675_v56  ;;  %v6920_v55 = vcombine.low %v822_v44, %v826_v45  ;;  %v6785_v56 = vcombine.high %v686_v50, %v690_v51  ;;  %v802_v3 = vld [vmem:[#allocation9 + $0x3e0] sm:$0xff] }
  0xb1   :  { %v926_v4 = vld [vmem:[#allocation9 + $0x7c0] sm:$0xff] }
  0xb2   :  { %v790_v10 = vld [vmem:[#allocation9 + $0x380] sm:$0xff] }
  0xb3   :  { %607 = vmatpush2.bf16.msra.mxu0 %v7677_v57  ;;  %648 = vmatpush2.bf16.msra.mxu1 %v7678_v58  ;;  %v6913_v57 = vcombine.high %v814_v52, %v818_v53  ;;  %v678_v58 = vld [vmem:[#allocation9] sm:$0xff] }
  0xb4   :  { %608 = vmatprep.subr.bf16.mxu0 %v7679_v59  ;;  %649 = vmatprep.subr.bf16.mxu1 %v7681_v60  ;;  %v682_v59 = vld [vmem:[#allocation9 + $0x20] sm:$0xff] }
  0xb5   :  { %v806_v60 = vld [vmem:[#allocation9 + $0x400] sm:$0xff] }
  0xb6   :  { %v794_v11 = vld [vmem:[#allocation9 + $0x3a0] sm:$0xff] }
  0xb7   :  { %609 = vmatpush2.bf16.msra.mxu0 %v7683_v61  ;;  %650 = vmatpush2.bf16.msra.mxu1 %v7684_v62  ;;  %v810_v61 = vld [vmem:[#allocation9 + $0x420] sm:$0xff]  ;;  %v6784_v62 = vcombine.low %v686_v50, %v690_v51  ;;  %v6889_v16 = vcombine.high %v790_v10, %v794_v11 }
  0xb8   :  { %610 = vmatprep.subr.bf16.mxu0 %v7685_v63  ;;  %651 = vmatprep.subr.bf16.mxu1 %v7687_v0  ;;  %v6912_v63 = vcombine.low %v814_v52, %v818_v53  ;;  %v6777_v0 = vcombine.high %v678_v58, %v682_v59  ;;  %v6905_v1 = vcombine.high %v806_v60, %v810_v61  ;;  %v918_v12 = vld [vmem:[#allocation9 + $0x780] sm:$0xff] }
  0xb9   :  { %v6904_v7 = vcombine.low %v806_v60, %v810_v61  ;;  %v782_v18 = vld [vmem:[#allocation9 + $0x340] sm:$0xff] }
  0xba   :  { %v786_v19 = vld [vmem:[#allocation9 + $0x360] sm:$0xff] }
  0xbb   :  { %611 = vmatpush2.bf16.msra.mxu0 %v7689_v5  ;;  %652 = vmatpush2.bf16.msra.mxu1 %v7690_v6  ;;  %v930_v5 = vld [vmem:[#allocation9 + $0x7e0] sm:$0xff]  ;;  %v6776_v6 = vcombine.low %v678_v58, %v682_v59  ;;  %v6881_v24 = vcombine.high %v782_v18, %v786_v19 }
  0xbc   :  { %2256 = vmatprep.subr.bf16.mxu0 %v6833_v8  ;;  %2297 = vmatprep.subr.bf16.mxu1 %v6961_v9  ;;  %v6897_v8 = vcombine.high %v798_v2, %v802_v3  ;;  %v7025_v9 = vcombine.high %v926_v4, %v930_v5  ;;  %v774_v26 = vld [vmem:[#allocation9 + $0x300] sm:$0xff] }
  0xbd   :  { %v778_v27 = vld [vmem:[#allocation9 + $0x320] sm:$0xff] }
  0xbe   :  { %613 = vmatmul.mubr.bf16.vlgmr.msra.gmra.mxu0 %v6710_v13  ;;  %654 = vmatmul.mubr.bf16.vlgmr.msra.gmra.mxu1 %v6710_v13  ;;  %v922_v13 = vld [vmem:[#allocation9 + $0x7a0] sm:$0xff] }
  0xbf   :  { %2257 = vmatpush1.bf16.msra.mxu0 %v6832_v14  ;;  %2298 = vmatpush1.bf16.msra.mxu1 %v6960_v15  ;;  %v6896_v14 = vcombine.low %v798_v2, %v802_v3  ;;  %v7024_v15 = vcombine.low %v926_v4, %v930_v5  ;;  %v7017_v17 = vcombine.high %v918_v12, %v922_v13  ;;  %v766_v34 = vld [vmem:[#allocation9 + $0x2c0] sm:$0xff]  ;;  %v8091_v4 = vld [vmem:[#allocation9 + $0x1c8] sm:$0xff] }
  0xc0   :  { %2258 = vmatprep.subr.bf16.mxu0 %v6825_v20  ;;  %2299 = vmatprep.subr.bf16.mxu1 %v6953_v21  ;;  %v910_v20 = vld [vmem:[#allocation9 + $0x740] sm:$0xff]  ;;  %v8093_v5 = vld [vmem:[#allocation9 + $0x1e8] sm:$0xff] }
  0xc1   :  { %v914_v21 = vld [vmem:[#allocation9 + $0x760] sm:$0xff] }
  0xc2   :  { %v7009_v25 = vcombine.high %v910_v20, %v914_v21  ;;  %v770_v35 = vld [vmem:[#allocation9 + $0x2e0] sm:$0xff] }
  0xc3   :  { %2259 = vmatpush1.bf16.msra.mxu0 %v6824_v22  ;;  %2300 = vmatpush1.bf16.msra.mxu1 %v6952_v23  ;;  %v6888_v22 = vcombine.low %v790_v10, %v794_v11  ;;  %v7016_v23 = vcombine.low %v918_v12, %v922_v13  ;;  %v894_v36 = vld [vmem:[#allocation9 + $0x6c0] sm:$0xff]  ;;  %v233_v12 = vlaneseq }
  0xc4   :  { %2260 = vmatprep.subr.bf16.mxu0 %v6817_v28  ;;  %2301 = vmatprep.subr.bf16.mxu1 %v6945_v29  ;;  %v902_v28 = vld [vmem:[#allocation9 + $0x700] sm:$0xff] }
  0xc5   :  { %v906_v29 = vld [vmem:[#allocation9 + $0x720] sm:$0xff]  ;;  %v8103_v13 = vshrl.u32 %v233_v12, 7 }
  0xc6   :  { %v898_v37 = vld [vmem:[#allocation9 + $0x6e0] sm:$0xff] }
  0xc7   :  { %2261 = vmatpush1.bf16.msra.mxu0 %v6816_v30  ;;  %2302 = vmatpush1.bf16.msra.mxu1 %v6944_v31  ;;  %v6880_v30 = vcombine.low %v782_v18, %v786_v19  ;;  %v7008_v31 = vcombine.low %v910_v20, %v914_v21  ;;  %v758_v42 = vld [vmem:[#allocation9 + $0x280] sm:$0xff]  ;;  %v247_v18 = vsub.s32 3, %v8103_v13 }
  0xc8   :  { %2262 = vmatprep.subr.bf16.mxu0 %v6809_v32  ;;  %2303 = vmatprep.subr.bf16.mxu1 %v6937_v33  ;;  %v6873_v32 = vcombine.high %v774_v26, %v778_v27  ;;  %v7001_v33 = vcombine.high %v902_v28, %v906_v29  ;;  %v762_v43 = vld [vmem:[#allocation9 + $0x2a0] sm:$0xff] }
  0xc9   :  { %v886_v44 = vld [vmem:[#allocation9 + $0x680] sm:$0xff]  ;;  %v6856_v50 = vcombine.low %v758_v42, %v762_v43 }
  0xca   :  { %v890_v45 = vld [vmem:[#allocation9 + $0x6a0] sm:$0xff] }
  0xcb   :  { %2263 = vmatpush1.bf16.msra.mxu0 %v6808_v38  ;;  %2304 = vmatpush1.bf16.msra.mxu1 %v6936_v39  ;;  %v6872_v38 = vcombine.low %v774_v26, %v778_v27  ;;  %v7000_v39 = vcombine.low %v902_v28, %v906_v29  ;;  %v6984_v51 = vcombine.low %v886_v44, %v890_v45  ;;  %v750_v52 = vld [vmem:[#allocation9 + $0x240] sm:$0xff] }
  0xcc   :  { %2264 = vmatprep.subr.bf16.mxu0 %v6801_v40  ;;  %2305 = vmatprep.subr.bf16.mxu1 %v6929_v41  ;;  %v6865_v40 = vcombine.high %v766_v34, %v770_v35  ;;  %v6993_v41 = vcombine.high %v894_v36, %v898_v37  ;;  %v754_v53 = vld [vmem:[#allocation9 + $0x260] sm:$0xff] }
  0xcd   :  { %v742_v60 = vld [vmem:[#allocation9 + $0x200] sm:$0xff] }
  0xce   :  { %v746_v61 = vld [vmem:[#allocation9 + $0x220] sm:$0xff] }
  0xcf   :  { %2265 = vmatpush1.bf16.msra.mxu0 %v6800_v46  ;;  %2306 = vmatpush1.bf16.msra.mxu1 %v6928_v47  ;;  %v6864_v46 = vcombine.low %v766_v34, %v770_v35  ;;  %v6992_v47 = vcombine.low %v894_v36, %v898_v37 }
  0xd0   :  { %2266 = vmatprep.subr.bf16.mxu0 %v6793_v48  ;;  %2307 = vmatprep.subr.bf16.mxu1 %v6921_v49  ;;  %v6857_v48 = vcombine.high %v758_v42, %v762_v43  ;;  %v6985_v49 = vcombine.high %v886_v44, %v890_v45  ;;  %v727_v42 = vld [vmem:[#allocation9 + $0x188] sm:$0xff] }
  0xd1   :  { %v731_v43 = vld [vmem:[#allocation9 + $0x1a8] sm:$0xff] }
  0xd3   :  { %2267 = vmatpush1.bf16.msra.mxu0 %v6792_v54  ;;  %2308 = vmatpush1.bf16.msra.mxu1 %v6920_v55  ;;  %v878_v54 = vld [vmem:[#allocation9 + $0x640] sm:$0xff]  ;;  %v6849_v55 = vcombine.high %v750_v52, %v754_v53 }
  0xd4   :  { %2268 = vmatprep.subr.bf16.mxu0 %v6785_v56  ;;  %2309 = vmatprep.subr.bf16.mxu1 %v6913_v57  ;;  %v882_v56 = vld [vmem:[#allocation9 + $0x660] sm:$0xff]  ;;  %v6848_v57 = vcombine.low %v750_v52, %v754_v53  ;;  %v719_v52 = vld [vmem:[#allocation9 + $0x148] sm:$0xff] }
  0xd5   :  { %v6976_v58 = vcombine.low %v878_v54, %v882_v56  ;;  %v6977_v59 = vcombine.high %v878_v54, %v882_v56  ;;  %v723_v53 = vld [vmem:[#allocation9 + $0x168] sm:$0xff] }
  0xd6   :  { %v851_v56 = vld [vmem:[#allocation9 + $0x568] sm:$0xff] }
  0xd7   :  { %2269 = vmatpush1.bf16.msra.mxu0 %v6784_v62  ;;  %2310 = vmatpush1.bf16.msra.mxu1 %v6912_v63  ;;  %v870_v62 = vld [vmem:[#allocation9 + $0x600] sm:$0xff]  ;;  %v6841_v63 = vcombine.high %v742_v60, %v746_v61 }
  0xd8   :  { %2270 = vmatprep.subr.bf16.mxu0 %v6777_v0  ;;  %2311 = vmatprep.subr.bf16.mxu1 %v6905_v1  ;;  %v874_v0 = vld [vmem:[#allocation9 + $0x620] sm:$0xff]  ;;  %v6840_v1 = vcombine.low %v742_v60, %v746_v61  ;;  %v711_v61 = vld [vmem:[#allocation9 + $0x108] sm:$0xff] }
  0xd9   :  { %v6968_v2 = vcombine.low %v870_v62, %v874_v0  ;;  %v6969_v3 = vcombine.high %v870_v62, %v874_v0  ;;  %v715_v62 = vld [vmem:[#allocation9 + $0x128] sm:$0xff] }
  0xda   :  { %v843_v0 = vld [vmem:[#allocation9 + $0x528] sm:$0xff] }
  0xdb   :  { %2271 = vmatpush1.bf16.msra.mxu0 %v6776_v6  ;;  %2312 = vmatpush1.bf16.msra.mxu1 %v6904_v7  ;;  %v8095_v6 = vld [vmem:[#allocation9 + $0x5c8] sm:$0xff]  ;;  %v6835_v7 = vcombine.high %v8091_v4, %v8093_v5 }
  0xdc   :  { %2272 = vmatprep.subr.bf16.mxu0 %v6897_v8  ;;  %2313 = vmatprep.subr.bf16.mxu1 %v7025_v9  ;;  %v867_v8 = vld [vmem:[#allocation9 + $0x5e8] sm:$0xff]  ;;  %v6834_v9 = vcombine.low %v8091_v4, %v8093_v5 }
  0xdd   :  { %v6962_v10 = vcombine.low %v8095_v6, %v867_v8  ;;  %v6963_v11 = vcombine.high %v8095_v6, %v867_v8  ;;  %v703_v5 = vld [vmem:[#allocation9 + $0xc8] sm:$0xff] }
  0xde   :  { %v707_v6 = vld [vmem:[#allocation9 + $0xe8] sm:$0xff] }
  0xdf   :  { %2273 = vmatpush2.bf16.msra.mxu0 %v6896_v14  ;;  %2314 = vmatpush2.bf16.msra.mxu1 %v7024_v15  ;;  %v8106_v14 = vsub.s32 0, %v8103_v13  ;;  %v243_v15 = vsub.s32 2, %v8103_v13  ;;  %v835_v8 = vld [vmem:[#allocation9 + $0x4e8] sm:$0xff] }
  0xe0   :  { %2274 = vmatprep.subr.bf16.mxu0 %v6889_v16  ;;  %2315 = vmatprep.subr.bf16.mxu1 %v7017_v17  ;;  %v231_v16 = vld [vmem:[#allocation8] sm:$0xf]  ;;  %v8110_v17 = vsub.s32 1, %v8103_v13 }
  0xe1   :  { %v236_v19 = vrot.slane %v231_v16, %v8106_v14  ;;  %v244_v20 = vrot.slane %v231_v16, %v243_v15 }
  0xe3   :  { %2275 = vmatpush2.bf16.msra.mxu0 %v6888_v22  ;;  %2316 = vmatpush2.bf16.msra.mxu1 %v7016_v23  ;;  %v240_v23 = vrot.slane %v231_v16, %v8110_v17 }
  0xe4   :  { %2276 = vmatprep.subr.bf16.mxu0 %v6881_v24  ;;  %2317 = vmatprep.subr.bf16.mxu1 %v7009_v25  ;;  %v248_v24 = vrot.slane %v231_v16, %v247_v18  ;;  %v695_v16 = vld [vmem:[#allocation9 + $0x88] sm:$0xff] }
  0xe7   :  { %2277 = vmatpush2.bf16.msra.mxu0 %v6880_v30  ;;  %2318 = vmatpush2.bf16.msra.mxu1 %v7008_v31 }
  0xe8   :  { %2278 = vmatprep.subr.bf16.mxu0 %v6873_v32  ;;  %2319 = vmatprep.subr.bf16.mxu1 %v7001_v33 }
  0xeb   :  { %2279 = vmatpush2.bf16.msra.mxu0 %v6872_v38  ;;  %2320 = vmatpush2.bf16.msra.mxu1 %v7000_v39 }
  0xec   :  { %2280 = vmatprep.subr.bf16.mxu0 %v6865_v40  ;;  %2321 = vmatprep.subr.bf16.mxu1 %v6993_v41 }
  0xef   :  { %2281 = vmatpush2.bf16.msra.mxu0 %v6864_v46  ;;  %2322 = vmatpush2.bf16.msra.mxu1 %v6992_v47  ;;  %v855_v46 = vld [vmem:[#allocation9 + $0x588] sm:$0xff] }
  0xf0   :  { %2282 = vmatprep.subr.bf16.mxu0 %v6857_v48  ;;  %2323 = vmatprep.subr.bf16.mxu1 %v6985_v49  ;;  %v859_v47 = vld [vmem:[#allocation9 + $0x5a8] sm:$0xff] }
  0xf1   :  { %v6955_v54 = vcombine.high %v855_v46, %v859_v47 }
  0xf3   :  { %2283 = vmatpush2.bf16.msra.mxu0 %v6856_v50  ;;  %2324 = vmatpush2.bf16.msra.mxu1 %v6984_v51  ;;  %v6827_v51 = vcombine.high %v727_v42, %v731_v43 }
  0xf4   :  { %2284 = vmatprep.subr.bf16.mxu0 %v6849_v55  ;;  %2325 = vmatprep.subr.bf16.mxu1 %v6977_v59  ;;  %v847_v55 = vld [vmem:[#allocation9 + $0x548] sm:$0xff]  ;;  %v6819_v59 = vcombine.high %v719_v52, %v723_v53 }
  0xf5   :  { %v6947_v60 = vcombine.high %v847_v55, %v851_v56 }
  0xf7   :  { %2285 = vmatpush2.bf16.msra.mxu0 %v6848_v57  ;;  %2326 = vmatpush2.bf16.msra.mxu1 %v6976_v58  ;;  %v6826_v57 = vcombine.low %v727_v42, %v731_v43  ;;  %v6954_v58 = vcombine.low %v855_v46, %v859_v47  ;;  %v799_v42 = vld [vmem:[#allocation9 + $0x3c8] sm:$0xff] }
  0xf8   :  { %2286 = vmatprep.subr.bf16.mxu0 %v6841_v63  ;;  %2327 = vmatprep.subr.bf16.mxu1 %v6969_v3  ;;  %v839_v63 = vld [vmem:[#allocation9 + $0x508] sm:$0xff]  ;;  %v6811_v3 = vcombine.high %v711_v61, %v715_v62 }
  0xf9   :  { %v6939_v4 = vcombine.high %v839_v63, %v843_v0  ;;  %v803_v43 = vld [vmem:[#allocation9 + $0x3e8] sm:$0xff] }
  0xfa   :  { %v931_v46 = vld [vmem:[#allocation9 + $0x7e8] sm:$0xff] }
  0xfb   :  { %2287 = vmatpush2.bf16.msra.mxu0 %v6840_v1  ;;  %2328 = vmatpush2.bf16.msra.mxu1 %v6968_v2  ;;  %v6818_v1 = vcombine.low %v719_v52, %v723_v53  ;;  %v6946_v2 = vcombine.low %v847_v55, %v851_v56  ;;  %v6899_v52 = vcombine.high %v799_v42, %v803_v43  ;;  %v795_v55 = vld [vmem:[#allocation9 + $0x3a8] sm:$0xff] }
  0xfc   :  { %2338 = vmatprep.subr.bf16.mxu0 %v6835_v7  ;;  %2379 = vmatprep.subr.bf16.mxu1 %v6963_v11  ;;  %v831_v7 = vld [vmem:[#allocation9 + $0x4c8] sm:$0xff]  ;;  %v6803_v11 = vcombine.high %v703_v5, %v707_v6 }
  0xfd   :  { %v6931_v12 = vcombine.high %v831_v7, %v835_v8  ;;  %v919_v56 = vld [vmem:[#allocation9 + $0x788] sm:$0xff] }
 0x17e   :  { %v614_v21 = vpop.f32.mrf.mxu0  ;;  %v655_v22 = vpop.f32.mrf.mxu1 }
 0x17f   :  { %v615_v25 = vadd.f32 %v614_v21, %v236_v19  ;;  %v656_v26 = vadd.f32 %v655_v22, %v244_v20  ;;  %v699_v19 = vld [vmem:[#allocation9 + $0xa8] sm:$0xff]  ;;  %v6802_v22 = vcombine.low %v703_v5, %v707_v6 }
 0x180   :  { %v616_v27 = vpop.f32.mrf.mxu0  ;;  %v657_v28 = vpop.f32.mrf.mxu1  ;;  %v823_v20 = vld [vmem:[#allocation9 + $0x488] sm:$0xff] }
 0x181   :  { %v666_v29 = vmul.f32 0.2, %v615_v25  ;;  %vm662_vm0 = vcmp.gt.f32.partialorder %v615_v25, 0.0  ;;  %v668_v30 = vmul.f32 0.2, %v656_v26  ;;  %v617_v31 = vadd.f32 %v616_v27, %v240_v23  ;;  %v827_v21 = vld [vmem:[#allocation9 + $0x4a8] sm:$0xff] }
 0x182   :  { %v658_v32 = vadd.f32 %v657_v28, %v248_v24  ;;  %v618_v33 = vpop.f32.mrf.mxu0  ;;  %v659_v34 = vpop.f32.mrf.mxu1  ;;  %vm664_vm1 = vcmp.gt.f32.partialorder %v656_v26, 0.0  ;;  %v6930_v23 = vcombine.low %v831_v7, %v835_v8  ;;  %v6795_v24 = vcombine.high %v695_v16, %v699_v19  ;;  %v691_v27 = vld [vmem:[#allocation9 + $0x68] sm:$0xff] }
 0x183   :  { %vm663_vm2 = vcmp.gt.f32.partialorder %v617_v31, 0.0  ;;  %v667_v35 = vmul.f32 0.2, %v617_v31  ;;  %v670_v38 = vsel %vm662_vm0, %v615_v25, %v666_v29  ;;  %v672_v40 = vsel %vm664_vm1, %v656_v26, %v668_v30  ;;  %v687_v26 = vld [vmem:[#allocation9 + $0x48] sm:$0xff] }
 0x184   :  { %v619_v36 = vpop.f32.mrf.mxu0  ;;  %v660_v37 = vpop.f32.mrf.mxu1  ;;  %vm665_vm3 = vcmp.gt.f32.partialorder %v658_v32, 0.0  ;;  %v669_v39 = vmul.f32 0.2, %v658_v32  ;;  %v8121_v48 = vpack.c.bf16 %v670_v38, %v670_v38  ;;  %v8125_v50 = vpack.c.bf16 %v672_v40, %v672_v40  ;;  %v815_v28 = vld [vmem:[#allocation9 + $0x448] sm:$0xff] }
 0x185   :  { %v671_v41 = vsel %vm663_vm2, %v617_v31, %v667_v35  ;;  %v6923_v25 = vcombine.high %v823_v20, %v827_v21  ;;  %v819_v29 = vld [vmem:[#allocation9 + $0x468] sm:$0xff]  ;;  %v6794_v30 = vcombine.low %v695_v16, %v699_v19  ;;  %v6922_v31 = vcombine.low %v823_v20, %v827_v21 }
 0x186   :  { %v8119_v44 = vpack.c.bf16 %v671_v41, %v671_v41  ;;  %v673_v45 = vsel %vm665_vm3, %v658_v32, %v669_v39  ;;  %v6787_v32 = vcombine.high %v687_v26, %v691_v27  ;;  %v6915_v33 = vcombine.high %v815_v28, %v819_v29  ;;  %v679_v34 = vld [vmem:[#allocation9 + $0x8] sm:$0xff] }
 0x187   :  { %v8123_v49 = vpack.c.bf16 %v673_v45, %v673_v45  ;;  %v683_v35 = vld [vmem:[#allocation9 + $0x28] sm:$0xff]  ;;  %v6786_v38 = vcombine.low %v687_v26, %v691_v27  ;;  %v6914_v39 = vcombine.low %v815_v28, %v819_v29 }
 0x188   :  { %2288 = vmatprep.mubr.bf16.mxu0 %v8119_v44  ;;  %v807_v36 = vld [vmem:[#allocation9 + $0x408] sm:$0xff]  ;;  %v6779_v40 = vcombine.high %v679_v34, %v683_v35  ;;  %v6778_v47 = vcombine.low %v679_v34, %v683_v35 }
 0x189   :  { %2329 = vmatprep.mubr.bf16.mxu1 %v8123_v49  ;;  %2289 = vmatmul.mubr.bf16.vlgmr.msra.gmra.mxu0 %v8121_v48  ;;  %v811_v37 = vld [vmem:[#allocation9 + $0x428] sm:$0xff] }
 0x18a   :  { %2330 = vmatmul.mubr.bf16.vlgmr.msra.gmra.mxu1 %v8125_v50  ;;  %2339 = vmatpush1.bf16.msra.mxu0 %v6834_v9  ;;  %v6810_v9 = vcombine.low %v711_v61, %v715_v62  ;;  %v6907_v41 = vcombine.high %v807_v36, %v811_v37  ;;  %v927_v45 = vld [vmem:[#allocation9 + $0x7c8] sm:$0xff] }
 0x18b   :  { %2380 = vmatpush1.bf16.msra.mxu1 %v6962_v10  ;;  %2370 = vmatprep.mubr.bf16.mxu0 %v8119_v44  ;;  %v6938_v10 = vcombine.low %v839_v63, %v843_v0  ;;  %v7027_v53 = vcombine.high %v927_v45, %v931_v46  ;;  %v783_v62 = vld [vmem:[#allocation9 + $0x348] sm:$0xff] }
 0x18c   :  { %2411 = vmatprep.mubr.bf16.mxu1 %v8123_v49  ;;  %2340 = vmatprep.subr.bf16.mxu0 %v6827_v51  ;;  %v6906_v51 = vcombine.low %v807_v36, %v811_v37  ;;  %v787_v63 = vld [vmem:[#allocation9 + $0x368] sm:$0xff] }
 0x18d   :  { %2381 = vmatprep.subr.bf16.mxu1 %v6955_v54  ;;  %v791_v54 = vld [vmem:[#allocation9 + $0x388] sm:$0xff] }
 0x18e   :  { %2341 = vmatpush1.bf16.msra.mxu0 %v6826_v57  ;;  %v923_v57 = vld [vmem:[#allocation9 + $0x7a8] sm:$0xff] }
 0x18f   :  { %2382 = vmatpush1.bf16.msra.mxu1 %v6954_v58  ;;  %2342 = vmatprep.subr.bf16.mxu0 %v6819_v59  ;;  %v6898_v58 = vcombine.low %v799_v42, %v803_v43  ;;  %v7026_v59 = vcombine.low %v927_v45, %v931_v46  ;;  %v7019_v61 = vcombine.high %v919_v56, %v923_v57  ;;  %v911_v0 = vld [vmem:[#allocation9 + $0x748] sm:$0xff] }
 0x190   :  { %2383 = vmatprep.subr.bf16.mxu1 %v6947_v60  ;;  %v6891_v60 = vcombine.high %v791_v54, %v795_v55  ;;  %v775_v6 = vld [vmem:[#allocation9 + $0x308] sm:$0xff] }
 0x191   :  { %v779_v7 = vld [vmem:[#allocation9 + $0x328] sm:$0xff] }
 0x192   :  { %2343 = vmatpush1.bf16.msra.mxu0 %v6818_v1  ;;  %v915_v1 = vld [vmem:[#allocation9 + $0x768] sm:$0xff] }
 0x193   :  { %2384 = vmatpush1.bf16.msra.mxu1 %v6946_v2  ;;  %2344 = vmatprep.subr.bf16.mxu0 %v6811_v3  ;;  %v6890_v2 = vcombine.low %v791_v54, %v795_v55  ;;  %v7018_v3 = vcombine.low %v919_v56, %v923_v57  ;;  %v7011_v5 = vcombine.high %v911_v0, %v915_v1  ;;  %v903_v8 = vld [vmem:[#allocation9 + $0x708] sm:$0xff]  ;;  %v736_v55 = vld [vmem:[#allocation9 + $0x1d0] sm:$0xff] }
 0x194   :  { %2385 = vmatprep.subr.bf16.mxu1 %v6939_v4  ;;  %v6883_v4 = vcombine.high %v783_v62, %v787_v63  ;;  %v767_v19 = vld [vmem:[#allocation9 + $0x2c8] sm:$0xff]  ;;  %v740_v56 = vld [vmem:[#allocation9 + $0x1f0] sm:$0xff] }
 0x195   :  { %v771_v20 = vld [vmem:[#allocation9 + $0x2e8] sm:$0xff]  ;;  %v864_v57 = vld [vmem:[#allocation9 + $0x5d0] sm:$0xff] }
 0x196   :  { %2345 = vmatpush1.bf16.msra.mxu0 %v6810_v9  ;;  %v907_v9 = vld [vmem:[#allocation9 + $0x728] sm:$0xff] }
 0x197   :  { %2386 = vmatpush1.bf16.msra.mxu1 %v6938_v10  ;;  %2346 = vmatprep.subr.bf16.mxu0 %v6803_v11  ;;  %v6882_v10 = vcombine.low %v783_v62, %v787_v63  ;;  %v7010_v11 = vcombine.low %v911_v0, %v915_v1  ;;  %v7003_v16 = vcombine.high %v903_v8, %v907_v9  ;;  %v895_v21 = vld [vmem:[#allocation9 + $0x6c8] sm:$0xff]  ;;  %v728_v63 = vld [vmem:[#allocation9 + $0x190] sm:$0xff] }
 0x198   :  { %2387 = vmatprep.subr.bf16.mxu1 %v6931_v12  ;;  %v6875_v12 = vcombine.high %v775_v6, %v779_v7  ;;  %v759_v27 = vld [vmem:[#allocation9 + $0x288] sm:$0xff]  ;;  %v732_v0 = vld [vmem:[#allocation9 + $0x1b0] sm:$0xff]  ;;  %v6836_v1 = vcombine.low %v736_v55, %v740_v56 }
 0x199   :  { %v763_v28 = vld [vmem:[#allocation9 + $0x2a8] sm:$0xff] }
 0x19a   :  { %2347 = vmatpush1.bf16.msra.mxu0 %v6802_v22  ;;  %v899_v22 = vld [vmem:[#allocation9 + $0x6e8] sm:$0xff] }
 0x19b   :  { %2388 = vmatpush1.bf16.msra.mxu1 %v6930_v23  ;;  %2348 = vmatprep.subr.bf16.mxu0 %v6795_v24  ;;  %v6874_v23 = vcombine.low %v775_v6, %v779_v7  ;;  %v7002_v24 = vcombine.low %v903_v8, %v907_v9  ;;  %v6995_v26 = vcombine.high %v895_v21, %v899_v22  ;;  %v887_v29 = vld [vmem:[#allocation9 + $0x688] sm:$0xff]  ;;  %v720_v6 = vld [vmem:[#allocation9 + $0x150] sm:$0xff] }
 0x19c   :  { %2389 = vmatprep.subr.bf16.mxu1 %v6923_v25  ;;  %v6867_v25 = vcombine.high %v767_v19, %v771_v20  ;;  %v751_v35 = vld [vmem:[#allocation9 + $0x248] sm:$0xff]  ;;  %v724_v7 = vld [vmem:[#allocation9 + $0x170] sm:$0xff] }
 0x19d   :  { %v755_v36 = vld [vmem:[#allocation9 + $0x268] sm:$0xff]  ;;  %v848_v9 = vld [vmem:[#allocation9 + $0x550] sm:$0xff] }
 0x19e   :  { %2349 = vmatpush1.bf16.msra.mxu0 %v6794_v30  ;;  %v891_v30 = vld [vmem:[#allocation9 + $0x6a8] sm:$0xff] }
 0x19f   :  { %2390 = vmatpush1.bf16.msra.mxu1 %v6922_v31  ;;  %2350 = vmatprep.subr.bf16.mxu0 %v6787_v32  ;;  %v6866_v31 = vcombine.low %v767_v19, %v771_v20  ;;  %v6994_v32 = vcombine.low %v895_v21, %v899_v22  ;;  %v6987_v34 = vcombine.high %v887_v29, %v891_v30  ;;  %v879_v37 = vld [vmem:[#allocation9 + $0x648] sm:$0xff]  ;;  %v712_v20 = vld [vmem:[#allocation9 + $0x110] sm:$0xff] }
 0x1a0   :  { %2391 = vmatprep.subr.bf16.mxu1 %v6915_v33  ;;  %v6859_v33 = vcombine.high %v759_v27, %v763_v28  ;;  %v743_v43 = vld [vmem:[#allocation9 + $0x208] sm:$0xff]  ;;  %v716_v21 = vld [vmem:[#allocation9 + $0x130] sm:$0xff] }
 0x1a1   :  { %v747_v45 = vld [vmem:[#allocation9 + $0x228] sm:$0xff]  ;;  %v840_v22 = vld [vmem:[#allocation9 + $0x510] sm:$0xff] }
 0x1a2   :  { %2351 = vmatpush1.bf16.msra.mxu0 %v6786_v38  ;;  %v883_v38 = vld [vmem:[#allocation9 + $0x668] sm:$0xff] }
 0x1a3   :  { %2392 = vmatpush1.bf16.msra.mxu1 %v6914_v39  ;;  %2352 = vmatprep.subr.bf16.mxu0 %v6779_v40  ;;  %v6858_v39 = vcombine.low %v759_v27, %v763_v28  ;;  %v6986_v40 = vcombine.low %v887_v29, %v891_v30  ;;  %v6979_v42 = vcombine.high %v879_v37, %v883_v38  ;;  %v871_v46 = vld [vmem:[#allocation9 + $0x608] sm:$0xff]  ;;  %v704_v28 = vld [vmem:[#allocation9 + $0xd0] sm:$0xff] }
 0x1a4   :  { %2393 = vmatprep.subr.bf16.mxu1 %v6907_v41  ;;  %v6851_v41 = vcombine.high %v751_v35, %v755_v36  ;;  %v708_v29 = vld [vmem:[#allocation9 + $0xf0] sm:$0xff] }
 0x1a5   :  { %v832_v30 = vld [vmem:[#allocation9 + $0x4d0] sm:$0xff] }
 0x1a6   :  { %2353 = vmatpush1.bf16.msra.mxu0 %v6778_v47  ;;  %v875_v47 = vld [vmem:[#allocation9 + $0x628] sm:$0xff] }
 0x1a7   :  { %2394 = vmatpush1.bf16.msra.mxu1 %v6906_v51  ;;  %2354 = vmatprep.subr.bf16.mxu0 %v6899_v52  ;;  %v6850_v51 = vcombine.low %v751_v35, %v755_v36  ;;  %v6978_v52 = vcombine.low %v879_v37, %v883_v38  ;;  %v6971_v54 = vcombine.high %v871_v46, %v875_v47  ;;  %v696_v36 = vld [vmem:[#allocation9 + $0x90] sm:$0xff] }
 0x1a8   :  { %2395 = vmatprep.subr.bf16.mxu1 %v7027_v53  ;;  %v6843_v53 = vcombine.high %v743_v43, %v747_v45  ;;  %v700_v37 = vld [vmem:[#allocation9 + $0xb0] sm:$0xff] }
 0x1a9   :  { %v824_v38 = vld [vmem:[#allocation9 + $0x490] sm:$0xff] }
 0x1aa   :  { %2355 = vmatpush2.bf16.msra.mxu0 %v6898_v58  ;;  %v868_v58 = vld [vmem:[#allocation9 + $0x5f0] sm:$0xff] }
 0x1ab   :  { %2396 = vmatpush2.bf16.msra.mxu1 %v7026_v59  ;;  %2356 = vmatprep.subr.bf16.mxu0 %v6891_v60  ;;  %v6842_v59 = vcombine.low %v743_v43, %v747_v45  ;;  %v6970_v60 = vcombine.low %v871_v46, %v875_v47  ;;  %v6965_v62 = vcombine.high %v864_v57, %v868_v58  ;;  %v688_v45 = vld [vmem:[#allocation9 + $0x50] sm:$0xff] }
 0x1ac   :  { %2397 = vmatprep.subr.bf16.mxu1 %v7019_v61  ;;  %v6837_v61 = vcombine.high %v736_v55, %v740_v56  ;;  %v692_v46 = vld [vmem:[#allocation9 + $0x70] sm:$0xff] }
 0x1ad   :  { %v816_v47 = vld [vmem:[#allocation9 + $0x450] sm:$0xff] }
 0x1ae   :  { %2357 = vmatpush2.bf16.msra.mxu0 %v6890_v2  ;;  %v856_v2 = vld [vmem:[#allocation9 + $0x590] sm:$0xff] }
 0x1af   :  { %2398 = vmatpush2.bf16.msra.mxu1 %v7018_v3  ;;  %2358 = vmatprep.subr.bf16.mxu0 %v6883_v4  ;;  %v860_v3 = vld [vmem:[#allocation9 + $0x5b0] sm:$0xff]  ;;  %v6964_v4 = vcombine.low %v864_v57, %v868_v58 }
 0x1b0   :  { %2399 = vmatprep.subr.bf16.mxu1 %v7011_v5  ;;  %v6829_v5 = vcombine.high %v728_v63, %v732_v0  ;;  %v6957_v8 = vcombine.high %v856_v2, %v860_v3  ;;  %v680_v56 = vld [vmem:[#allocation9 + $0x10] sm:$0xff] }
 0x1b1   :  { %v684_v57 = vld [vmem:[#allocation9 + $0x30] sm:$0xff] }
 0x1b2   :  { %2359 = vmatpush2.bf16.msra.mxu0 %v6882_v10  ;;  %v852_v10 = vld [vmem:[#allocation9 + $0x570] sm:$0xff] }
 0x1b3   :  { %2400 = vmatpush2.bf16.msra.mxu1 %v7010_v11  ;;  %2360 = vmatprep.subr.bf16.mxu0 %v6875_v12  ;;  %v6828_v11 = vcombine.low %v728_v63, %v732_v0  ;;  %v6956_v12 = vcombine.low %v856_v2, %v860_v3  ;;  %v6949_v19 = vcombine.high %v848_v9, %v852_v10  ;;  %v808_v58 = vld [vmem:[#allocation9 + $0x410] sm:$0xff] }
 0x1b4   :  { %2401 = vmatprep.subr.bf16.mxu1 %v7003_v16  ;;  %v6821_v16 = vcombine.high %v720_v6, %v724_v7  ;;  %v800_v0 = vld [vmem:[#allocation9 + $0x3d0] sm:$0xff] }
 0x1b5   :  { %v928_v2 = vld [vmem:[#allocation9 + $0x7d0] sm:$0xff] }
 0x1b6   :  { %2361 = vmatpush2.bf16.msra.mxu0 %v6874_v23  ;;  %v844_v23 = vld [vmem:[#allocation9 + $0x530] sm:$0xff] }
 0x1b7   :  { %2402 = vmatpush2.bf16.msra.mxu1 %v7002_v24  ;;  %2362 = vmatprep.subr.bf16.mxu0 %v6867_v25  ;;  %v6820_v24 = vcombine.low %v720_v6, %v724_v7  ;;  %v6948_v25 = vcombine.low %v848_v9, %v852_v10  ;;  %v6941_v27 = vcombine.high %v840_v22, %v844_v23  ;;  %v932_v3 = vld [vmem:[#allocation9 + $0x7f0] sm:$0xff] }
 0x1b8   :  { %2403 = vmatprep.subr.bf16.mxu1 %v6995_v26  ;;  %v6813_v26 = vcombine.high %v712_v20, %v716_v21  ;;  %v7029_v7 = vcombine.high %v928_v2, %v932_v3  ;;  %v796_v9 = vld [vmem:[#allocation9 + $0x3b0] sm:$0xff] }
 0x1b9   :  { %v920_v10 = vld [vmem:[#allocation9 + $0x790] sm:$0xff] }
 0x1ba   :  { %2363 = vmatpush2.bf16.msra.mxu0 %v6866_v31  ;;  %v836_v31 = vld [vmem:[#allocation9 + $0x4f0] sm:$0xff] }
 0x1bb   :  { %2404 = vmatpush2.bf16.msra.mxu1 %v6994_v32  ;;  %2364 = vmatprep.subr.bf16.mxu0 %v6859_v33  ;;  %v6812_v32 = vcombine.low %v712_v20, %v716_v21  ;;  %v6940_v33 = vcombine.low %v840_v22, %v844_v23  ;;  %v6933_v35 = vcombine.high %v832_v30, %v836_v31  ;;  %v784_v21 = vld [vmem:[#allocation9 + $0x350] sm:$0xff] }
 0x1bc   :  { %2405 = vmatprep.subr.bf16.mxu1 %v6987_v34  ;;  %v6805_v34 = vcombine.high %v704_v28, %v708_v29  ;;  %v788_v22 = vld [vmem:[#allocation9 + $0x370] sm:$0xff] }
 0x1bd   :  { %v912_v23 = vld [vmem:[#allocation9 + $0x750] sm:$0xff] }
 0x1be   :  { %2365 = vmatpush2.bf16.msra.mxu0 %v6858_v39  ;;  %v828_v39 = vld [vmem:[#allocation9 + $0x4b0] sm:$0xff] }
 0x1bf   :  { %2406 = vmatpush2.bf16.msra.mxu1 %v6986_v40  ;;  %2366 = vmatprep.subr.bf16.mxu0 %v6851_v41  ;;  %v6804_v40 = vcombine.low %v704_v28, %v708_v29  ;;  %v6932_v41 = vcombine.low %v832_v30, %v836_v31  ;;  %v6925_v43 = vcombine.high %v824_v38, %v828_v39  ;;  %v776_v29 = vld [vmem:[#allocation9 + $0x310] sm:$0xff] }
 0x1c0   :  { %2407 = vmatprep.subr.bf16.mxu1 %v6979_v42  ;;  %v6797_v42 = vcombine.high %v696_v36, %v700_v37  ;;  %v780_v30 = vld [vmem:[#allocation9 + $0x330] sm:$0xff] }
 0x1c1   :  { %v904_v31 = vld [vmem:[#allocation9 + $0x710] sm:$0xff] }
 0x1c2   :  { %2367 = vmatpush2.bf16.msra.mxu0 %v6850_v51  ;;  %v820_v51 = vld [vmem:[#allocation9 + $0x470] sm:$0xff] }
 0x1c3   :  { %2408 = vmatpush2.bf16.msra.mxu1 %v6978_v52  ;;  %2368 = vmatprep.subr.bf16.mxu0 %v6843_v53  ;;  %v6796_v52 = vcombine.low %v696_v36, %v700_v37  ;;  %v6924_v53 = vcombine.low %v824_v38, %v828_v39  ;;  %v6917_v55 = vcombine.high %v816_v47, %v820_v51  ;;  %v768_v37 = vld [vmem:[#allocation9 + $0x2d0] sm:$0xff] }
 0x1c4   :  { %2409 = vmatprep.subr.bf16.mxu1 %v6971_v54  ;;  %v6789_v54 = vcombine.high %v688_v45, %v692_v46  ;;  %v772_v38 = vld [vmem:[#allocation9 + $0x2f0] sm:$0xff] }
 0x1c5   :  { %v896_v39 = vld [vmem:[#allocation9 + $0x6d0] sm:$0xff] }
 0x1c6   :  { %2369 = vmatpush2.bf16.msra.mxu0 %v6842_v59  ;;  %v812_v59 = vld [vmem:[#allocation9 + $0x430] sm:$0xff] }
 0x1c7   :  { %2410 = vmatpush2.bf16.msra.mxu1 %v6970_v60  ;;  %2420 = vmatprep.subr.bf16.mxu0 %v6837_v61  ;;  %v6788_v60 = vcombine.low %v688_v45, %v692_v46  ;;  %v6916_v61 = vcombine.low %v816_v47, %v820_v51  ;;  %v6909_v63 = vcombine.high %v808_v58, %v812_v59  ;;  %v760_v46 = vld [vmem:[#allocation9 + $0x290] sm:$0xff] }
 0x1c8   :  { %2461 = vmatprep.subr.bf16.mxu1 %v6965_v62  ;;  %v6781_v62 = vcombine.high %v680_v56, %v684_v57  ;;  %v764_v47 = vld [vmem:[#allocation9 + $0x2b0] sm:$0xff] }
 0x1c9   :  { %2371 = vmatmul.mubr.bf16.vlgmr.msra.gmra.mxu0 %v8121_v48  ;;  %v888_v51 = vld [vmem:[#allocation9 + $0x690] sm:$0xff] }
 0x1ca   :  { %2412 = vmatmul.mubr.bf16.vlgmr.msra.gmra.mxu1 %v8125_v50  ;;  %2421 = vmatpush1.bf16.msra.mxu0 %v6836_v1  ;;  %v804_v1 = vld [vmem:[#allocation9 + $0x3f0] sm:$0xff] }
 0x1cb   :  { %2452 = vmatprep.mubr.bf16.mxu0 %v8119_v44  ;;  %2462 = vmatpush1.bf16.msra.mxu1 %v6964_v4  ;;  %v6780_v4 = vcombine.low %v680_v56, %v684_v57  ;;  %v6901_v6 = vcombine.high %v800_v0, %v804_v1  ;;  %v752_v57 = vld [vmem:[#allocation9 + $0x250] sm:$0xff] }
 0x1cc   :  { %2493 = vmatprep.mubr.bf16.mxu1 %v8123_v49  ;;  %2422 = vmatprep.subr.bf16.mxu0 %v6829_v5  ;;  %v6908_v5 = vcombine.low %v808_v58, %v812_v59  ;;  %v756_v58 = vld [vmem:[#allocation9 + $0x270] sm:$0xff] }
 0x1cd   :  { %2463 = vmatprep.subr.bf16.mxu1 %v6957_v8  ;;  %v792_v8 = vld [vmem:[#allocation9 + $0x390] sm:$0xff] }
 0x1ce   :  { %2423 = vmatpush1.bf16.msra.mxu0 %v6828_v11  ;;  %v924_v11 = vld [vmem:[#allocation9 + $0x7b0] sm:$0xff] }
 0x1cf   :  { %2464 = vmatpush1.bf16.msra.mxu1 %v6956_v12  ;;  %2424 = vmatprep.subr.bf16.mxu0 %v6821_v16  ;;  %v6900_v12 = vcombine.low %v800_v0, %v804_v1  ;;  %v7028_v16 = vcombine.low %v928_v2, %v932_v3  ;;  %v7021_v20 = vcombine.high %v920_v10, %v924_v11  ;;  %v880_v59 = vld [vmem:[#allocation9 + $0x650] sm:$0xff] }
 0x1d0   :  { %2465 = vmatprep.subr.bf16.mxu1 %v6949_v19  ;;  %v6893_v19 = vcombine.high %v792_v8, %v796_v9  ;;  %v744_v1 = vld [vmem:[#allocation9 + $0x210] sm:$0xff] }
 0x1d1   :  { %v748_v2 = vld [vmem:[#allocation9 + $0x230] sm:$0xff] }
 0x1d2   :  { %2425 = vmatpush1.bf16.msra.mxu0 %v6820_v24  ;;  %v916_v24 = vld [vmem:[#allocation9 + $0x770] sm:$0xff] }
 0x1d3   :  { %2466 = vmatpush1.bf16.msra.mxu1 %v6948_v25  ;;  %2426 = vmatprep.subr.bf16.mxu0 %v6813_v26  ;;  %v6892_v25 = vcombine.low %v792_v8, %v796_v9  ;;  %v7020_v26 = vcombine.low %v920_v10, %v924_v11  ;;  %v7013_v28 = vcombine.high %v912_v23, %v916_v24  ;;  %v872_v3 = vld [vmem:[#allocation9 + $0x610] sm:$0xff]  ;;  %v737_v9 = vld [vmem:[#allocation9 + $0x1d8] sm:$0xff] }
 0x1d4   :  { %2467 = vmatprep.subr.bf16.mxu1 %v6941_v27  ;;  %v6885_v27 = vcombine.high %v784_v21, %v788_v22  ;;  %v741_v10 = vld [vmem:[#allocation9 + $0x1f8] sm:$0xff] }
 0x1d5   :  { %v865_v11 = vld [vmem:[#allocation9 + $0x5d8] sm:$0xff] }
 0x1d6   :  { %2427 = vmatpush1.bf16.msra.mxu0 %v6812_v32  ;;  %v908_v32 = vld [vmem:[#allocation9 + $0x730] sm:$0xff] }
 0x1d7   :  { %2468 = vmatpush1.bf16.msra.mxu1 %v6940_v33  ;;  %2428 = vmatprep.subr.bf16.mxu0 %v6805_v34  ;;  %v6884_v33 = vcombine.low %v784_v21, %v788_v22  ;;  %v7012_v34 = vcombine.low %v912_v23, %v916_v24  ;;  %v7005_v36 = vcombine.high %v904_v31, %v908_v32  ;;  %v729_v22 = vld [vmem:[#allocation9 + $0x198] sm:$0xff] }
 0x1d8   :  { %2469 = vmatprep.subr.bf16.mxu1 %v6933_v35  ;;  %v6877_v35 = vcombine.high %v776_v29, %v780_v30  ;;  %v733_v23 = vld [vmem:[#allocation9 + $0x1b8] sm:$0xff]  ;;  %v6838_v24 = vcombine.low %v737_v9, %v741_v10 }
 0x1da   :  { %2429 = vmatpush1.bf16.msra.mxu0 %v6804_v40  ;;  %v900_v40 = vld [vmem:[#allocation9 + $0x6f0] sm:$0xff] }
 0x1db   :  { %2470 = vmatpush1.bf16.msra.mxu1 %v6932_v41  ;;  %2430 = vmatprep.subr.bf16.mxu0 %v6797_v42  ;;  %v6876_v41 = vcombine.low %v776_v29, %v780_v30  ;;  %v7004_v42 = vcombine.low %v904_v31, %v908_v32  ;;  %v6997_v45 = vcombine.high %v896_v39, %v900_v40  ;;  %v721_v29 = vld [vmem:[#allocation9 + $0x158] sm:$0xff] }
 0x1dc   :  { %2471 = vmatprep.subr.bf16.mxu1 %v6925_v43  ;;  %v6869_v43 = vcombine.high %v768_v37, %v772_v38  ;;  %v725_v30 = vld [vmem:[#allocation9 + $0x178] sm:$0xff] }
 0x1dd   :  { %v849_v32 = vld [vmem:[#allocation9 + $0x558] sm:$0xff] }
 0x1de   :  { %2431 = vmatpush1.bf16.msra.mxu0 %v6796_v52  ;;  %v892_v52 = vld [vmem:[#allocation9 + $0x6b0] sm:$0xff] }
 0x1df   :  { %2472 = vmatpush1.bf16.msra.mxu1 %v6924_v53  ;;  %2432 = vmatprep.subr.bf16.mxu0 %v6789_v54  ;;  %v6868_v53 = vcombine.low %v768_v37, %v772_v38  ;;  %v6996_v54 = vcombine.low %v896_v39, %v900_v40  ;;  %v6989_v56 = vcombine.high %v888_v51, %v892_v52  ;;  %v713_v38 = vld [vmem:[#allocation9 + $0x118] sm:$0xff] }
 0x1e0   :  { %2473 = vmatprep.subr.bf16.mxu1 %v6917_v55  ;;  %v6861_v55 = vcombine.high %v760_v46, %v764_v47  ;;  %v717_v39 = vld [vmem:[#allocation9 + $0x138] sm:$0xff] }
 0x1e1   :  { %v841_v40 = vld [vmem:[#allocation9 + $0x518] sm:$0xff] }
 0x1e2   :  { %2433 = vmatpush1.bf16.msra.mxu0 %v6788_v60  ;;  %v884_v60 = vld [vmem:[#allocation9 + $0x670] sm:$0xff] }
 0x1e3   :  { %2474 = vmatpush1.bf16.msra.mxu1 %v6916_v61  ;;  %2434 = vmatprep.subr.bf16.mxu0 %v6781_v62  ;;  %v6860_v61 = vcombine.low %v760_v46, %v764_v47  ;;  %v6988_v62 = vcombine.low %v888_v51, %v892_v52  ;;  %v6981_v0 = vcombine.high %v880_v59, %v884_v60  ;;  %v705_v46 = vld [vmem:[#allocation9 + $0xd8] sm:$0xff] }
 0x1e4   :  { %2475 = vmatprep.subr.bf16.mxu1 %v6909_v63  ;;  %v6853_v63 = vcombine.high %v752_v57, %v756_v58  ;;  %v709_v47 = vld [vmem:[#allocation9 + $0xf8] sm:$0xff] }
 0x1e5   :  { %v833_v51 = vld [vmem:[#allocation9 + $0x4d8] sm:$0xff] }
 0x1e6   :  { %2435 = vmatpush1.bf16.msra.mxu0 %v6780_v4  ;;  %v876_v4 = vld [vmem:[#allocation9 + $0x630] sm:$0xff]  ;;  %v837_v52 = vld [vmem:[#allocation9 + $0x4f8] sm:$0xff] }
 0x1e7   :  { %2476 = vmatpush1.bf16.msra.mxu1 %v6908_v5  ;;  %2436 = vmatprep.subr.bf16.mxu0 %v6901_v6  ;;  %v6852_v5 = vcombine.low %v752_v57, %v756_v58  ;;  %v6980_v6 = vcombine.low %v880_v59, %v884_v60  ;;  %v6973_v8 = vcombine.high %v872_v3, %v876_v4  ;;  %v701_v57 = vld [vmem:[#allocation9 + $0xb8] sm:$0xff] }
 0x1e8   :  { %2477 = vmatprep.subr.bf16.mxu1 %v7029_v7  ;;  %v6845_v7 = vcombine.high %v744_v1, %v748_v2  ;;  %v825_v58 = vld [vmem:[#allocation9 + $0x498] sm:$0xff]  ;;  %v6806_v60 = vcombine.low %v705_v46, %v709_v47 }
 0x1e9   :  { %v829_v59 = vld [vmem:[#allocation9 + $0x4b8] sm:$0xff] }
 0x1ea   :  { %2437 = vmatpush2.bf16.msra.mxu0 %v6900_v12  ;;  %v869_v12 = vld [vmem:[#allocation9 + $0x5f8] sm:$0xff] }
 0x1eb   :  { %2478 = vmatpush2.bf16.msra.mxu1 %v7028_v16  ;;  %2438 = vmatprep.subr.bf16.mxu0 %v6893_v19  ;;  %v6844_v16 = vcombine.low %v744_v1, %v748_v2  ;;  %v6972_v19 = vcombine.low %v872_v3, %v876_v4  ;;  %v6967_v21 = vcombine.high %v865_v11, %v869_v12  ;;  %v693_v1 = vld [vmem:[#allocation9 + $0x78] sm:$0xff] }
 0x1ec   :  { %2479 = vmatprep.subr.bf16.mxu1 %v7021_v20  ;;  %v6839_v20 = vcombine.high %v737_v9, %v741_v10  ;;  %v817_v2 = vld [vmem:[#allocation9 + $0x458] sm:$0xff] }
 0x1ed   :  { %v821_v3 = vld [vmem:[#allocation9 + $0x478] sm:$0xff] }
 0x1ee   :  { %2439 = vmatpush2.bf16.msra.mxu0 %v6892_v25  ;;  %v857_v25 = vld [vmem:[#allocation9 + $0x598] sm:$0xff] }
 0x1ef   :  { %2480 = vmatpush2.bf16.msra.mxu1 %v7020_v26  ;;  %2440 = vmatprep.subr.bf16.mxu0 %v6885_v27  ;;  %v861_v26 = vld [vmem:[#allocation9 + $0x5b8] sm:$0xff]  ;;  %v6966_v27 = vcombine.low %v865_v11, %v869_v12 }
 0x1f0   :  { %2481 = vmatprep.subr.bf16.mxu1 %v7013_v28  ;;  %v6831_v28 = vcombine.high %v729_v22, %v733_v23  ;;  %v6959_v31 = vcombine.high %v857_v25, %v861_v26  ;;  %v685_v9 = vld [vmem:[#allocation9 + $0x38] sm:$0xff] }
 0x1f1   :  { %v809_v10 = vld [vmem:[#allocation9 + $0x418] sm:$0xff] }
 0x1f2   :  { %2441 = vmatpush2.bf16.msra.mxu0 %v6884_v33  ;;  %v853_v33 = vld [vmem:[#allocation9 + $0x578] sm:$0xff] }
 0x1f3   :  { %2482 = vmatpush2.bf16.msra.mxu1 %v7012_v34  ;;  %2442 = vmatprep.subr.bf16.mxu0 %v6877_v35  ;;  %v6830_v34 = vcombine.low %v729_v22, %v733_v23  ;;  %v6958_v35 = vcombine.low %v857_v25, %v861_v26  ;;  %v6951_v37 = vcombine.high %v849_v32, %v853_v33  ;;  %v813_v11 = vld [vmem:[#allocation9 + $0x438] sm:$0xff] }
 0x1f4   :  { %2483 = vmatprep.subr.bf16.mxu1 %v7005_v36  ;;  %v6823_v36 = vcombine.high %v721_v29, %v725_v30  ;;  %v805_v22 = vld [vmem:[#allocation9 + $0x3f8] sm:$0xff]  ;;  %v6910_v26 = vcombine.low %v809_v10, %v813_v11 }
 0x1f5   :  { %v929_v23 = vld [vmem:[#allocation9 + $0x7d8] sm:$0xff] }
 0x1f6   :  { %2443 = vmatpush2.bf16.msra.mxu0 %v6876_v41  ;;  %v845_v41 = vld [vmem:[#allocation9 + $0x538] sm:$0xff] }
 0x1f7   :  { %2484 = vmatpush2.bf16.msra.mxu1 %v7004_v42  ;;  %2444 = vmatprep.subr.bf16.mxu0 %v6869_v43  ;;  %v6822_v42 = vcombine.low %v721_v29, %v725_v30  ;;  %v6950_v43 = vcombine.low %v849_v32, %v853_v33  ;;  %v793_v29 = vld [vmem:[#allocation9 + $0x398] sm:$0xff] }
 0x1f8   :  { %2485 = vmatprep.subr.bf16.mxu1 %v6997_v45  ;;  %v6815_v45 = vcombine.high %v713_v38, %v717_v39  ;;  %v797_v30 = vld [vmem:[#allocation9 + $0x3b8] sm:$0xff] }
 0x1f9   :  { %v925_v32 = vld [vmem:[#allocation9 + $0x7b8] sm:$0xff] }
 0x1fa   :  { %2445 = vmatpush2.bf16.msra.mxu0 %v6868_v53  ;;  %v6942_v53 = vcombine.low %v841_v40, %v845_v41 }
 0x1fb   :  { %2486 = vmatpush2.bf16.msra.mxu1 %v6996_v54  ;;  %2446 = vmatprep.subr.bf16.mxu0 %v6861_v55  ;;  %v6807_v54 = vcombine.high %v705_v46, %v709_v47  ;;  %v6935_v55 = vcombine.high %v833_v51, %v837_v52  ;;  %v781_v46 = vld [vmem:[#allocation9 + $0x338] sm:$0xff] }
 0x1fc   :  { %2487 = vmatprep.subr.bf16.mxu1 %v6989_v56  ;;  %v697_v56 = vld [vmem:[#allocation9 + $0x98] sm:$0xff] }
 0x1fd   :  { %v6798_v4 = vcombine.low %v697_v56, %v701_v57  ;;  %v905_v47 = vld [vmem:[#allocation9 + $0x718] sm:$0xff] }
 0x1fe   :  { %2447 = vmatpush2.bf16.msra.mxu0 %v6860_v61  ;;  %v6934_v61 = vcombine.low %v833_v51, %v837_v52  ;;  %v909_v51 = vld [vmem:[#allocation9 + $0x738] sm:$0xff] }
 0x1ff   :  { %2488 = vmatpush2.bf16.msra.mxu1 %v6988_v62  ;;  %2448 = vmatprep.subr.bf16.mxu0 %v6853_v63  ;;  %v6799_v62 = vcombine.high %v697_v56, %v701_v57  ;;  %v6927_v63 = vcombine.high %v825_v58, %v829_v59  ;;  %v773_v56 = vld [vmem:[#allocation9 + $0x2f8] sm:$0xff] }
 0x200   :  { %2489 = vmatprep.subr.bf16.mxu1 %v6981_v0  ;;  %v689_v0 = vld [vmem:[#allocation9 + $0x58] sm:$0xff] }
 0x201   :  { %v6790_v12 = vcombine.low %v689_v0, %v693_v1  ;;  %v897_v57 = vld [vmem:[#allocation9 + $0x6d8] sm:$0xff] }
 0x202   :  { %2449 = vmatpush2.bf16.msra.mxu0 %v6852_v5  ;;  %v6926_v5 = vcombine.low %v825_v58, %v829_v59  ;;  %v901_v58 = vld [vmem:[#allocation9 + $0x6f8] sm:$0xff] }
 0x203   :  { %2490 = vmatpush2.bf16.msra.mxu1 %v6980_v6  ;;  %2450 = vmatprep.subr.bf16.mxu0 %v6845_v7  ;;  %v6791_v6 = vcombine.high %v689_v0, %v693_v1  ;;  %v6919_v7 = vcombine.high %v817_v2, %v821_v3  ;;  %v765_v0 = vld [vmem:[#allocation9 + $0x2b8] sm:$0xff] }
 0x204   :  { %2491 = vmatprep.subr.bf16.mxu1 %v6973_v8  ;;  %v681_v8 = vld [vmem:[#allocation9 + $0x18] sm:$0xff] }
 0x205   :  { %v6782_v25 = vcombine.low %v681_v8, %v685_v9  ;;  %v889_v1 = vld [vmem:[#allocation9 + $0x698] sm:$0xff] }
 0x206   :  { %2451 = vmatpush2.bf16.msra.mxu0 %v6844_v16  ;;  %v6918_v16 = vcombine.low %v817_v2, %v821_v3  ;;  %v893_v2 = vld [vmem:[#allocation9 + $0x6b8] sm:$0xff] }
 0x207   :  { %2492 = vmatpush2.bf16.msra.mxu1 %v6972_v19  ;;  %2502 = vmatprep.subr.bf16.mxu0 %v6839_v20  ;;  %v6783_v19 = vcombine.high %v681_v8, %v685_v9  ;;  %v6911_v20 = vcombine.high %v809_v10, %v813_v11  ;;  %v757_v8 = vld [vmem:[#allocation9 + $0x278] sm:$0xff] }
 0x208   :  { %2543 = vmatprep.subr.bf16.mxu1 %v6967_v21  ;;  %v801_v21 = vld [vmem:[#allocation9 + $0x3d8] sm:$0xff] }
 0x209   :  { %2453 = vmatmul.mubr.bf16.vlgmr.msra.gmra.mxu0 %v8121_v48  ;;  %v6902_v33 = vcombine.low %v801_v21, %v805_v22  ;;  %v881_v9 = vld [vmem:[#allocation9 + $0x658] sm:$0xff] }
 0x20a   :  { %2494 = vmatmul.mubr.bf16.vlgmr.msra.gmra.mxu1 %v8125_v50  ;;  %2503 = vmatpush1.bf16.msra.mxu0 %v6838_v24  ;;  %v933_v24 = vld [vmem:[#allocation9 + $0x7f8] sm:$0xff] }
 0x20b   :  { %2534 = vmatprep.mubr.bf16.mxu0 %v8119_v44  ;;  %2544 = vmatpush1.bf16.msra.mxu1 %v6966_v27  ;;  %v6943_v44 = vcombine.high %v841_v40, %v845_v41  ;;  %v6903_v27 = vcombine.high %v801_v21, %v805_v22  ;;  %v917_v40 = vld [vmem:[#allocation9 + $0x778] sm:$0xff]  ;;  %v6894_v41 = vcombine.low %v793_v29, %v797_v30 }
 0x20c   :  { %2575 = vmatprep.mubr.bf16.mxu1 %v8123_v49  ;;  %2504 = vmatprep.subr.bf16.mxu0 %v6831_v28  ;;  %v6814_v49 = vcombine.low %v713_v38, %v717_v39  ;;  %v7031_v28 = vcombine.high %v929_v23, %v933_v24  ;;  %v789_v38 = vld [vmem:[#allocation9 + $0x378] sm:$0xff] }
 0x20d   :  { %2545 = vmatprep.subr.bf16.mxu1 %v6959_v31  ;;  %v921_v31 = vld [vmem:[#allocation9 + $0x798] sm:$0xff] }
 0x20e   :  { %2505 = vmatpush1.bf16.msra.mxu0 %v6830_v34  ;;  %v7030_v34 = vcombine.low %v929_v23, %v933_v24  ;;  %v913_v39 = vld [vmem:[#allocation9 + $0x758] sm:$0xff] }
 0x20f   :  { %2546 = vmatpush1.bf16.msra.mxu1 %v6958_v35  ;;  %2506 = vmatprep.subr.bf16.mxu0 %v6823_v36  ;;  %v6895_v35 = vcombine.high %v793_v29, %v797_v30  ;;  %v7023_v36 = vcombine.high %v921_v31, %v925_v32  ;;  %v885_v10 = vld [vmem:[#allocation9 + $0x678] sm:$0xff]  ;;  %v2676_v29 = vld [vmem:[#allocation12 + $0x1e0] sm:$0xff] }
 0x210   :  { %2547 = vmatprep.subr.bf16.mxu1 %v6951_v37  ;;  %v785_v37 = vld [vmem:[#allocation9 + $0x358] sm:$0xff]  ;;  %v2800_v30 = vld [vmem:[#allocation12 + $0x5c0] sm:$0xff] }
 0x211   :  { %v6886_v52 = vcombine.low %v785_v37, %v789_v38  ;;  %v749_v21 = vld [vmem:[#allocation9 + $0x238] sm:$0xff] }
 0x212   :  { %2507 = vmatpush1.bf16.msra.mxu0 %v6822_v42  ;;  %v7022_v42 = vcombine.low %v921_v31, %v925_v32  ;;  %v873_v22 = vld [vmem:[#allocation9 + $0x618] sm:$0xff]  ;;  %v2804_v31 = vld [vmem:[#allocation12 + $0x5e0] sm:$0xff] }
 0x213   :  { %2548 = vmatpush1.bf16.msra.mxu1 %v6950_v43  ;;  %2508 = vmatprep.subr.bf16.mxu0 %v6815_v45  ;;  %v6887_v43 = vcombine.high %v785_v37, %v789_v38  ;;  %v7015_v45 = vcombine.high %v913_v39, %v917_v40  ;;  %v877_v23 = vld [vmem:[#allocation9 + $0x638] sm:$0xff]  ;;  %v7217_v37 = vcombine.high %v2800_v30, %v2804_v31  ;;  %v2792_v38 = vld [vmem:[#allocation12 + $0x580] sm:$0xff] }
 0x214   :  { %2549 = vmatprep.subr.bf16.mxu1 %v6943_v44  ;;  %v777_v44 = vld [vmem:[#allocation9 + $0x318] sm:$0xff] }
 0x215   :  { %v6878_v59 = vcombine.low %v777_v44, %v781_v46 }
 0x216   :  { %2509 = vmatpush1.bf16.msra.mxu0 %v6814_v49  ;;  %v7014_v49 = vcombine.low %v913_v39, %v917_v40  ;;  %v2796_v39 = vld [vmem:[#allocation12 + $0x5a0] sm:$0xff] }
 0x217   :  { %2550 = vmatpush1.bf16.msra.mxu1 %v6942_v53  ;;  %2510 = vmatprep.subr.bf16.mxu0 %v6807_v54  ;;  %v6879_v53 = vcombine.high %v777_v44, %v781_v46  ;;  %v7007_v54 = vcombine.high %v905_v47, %v909_v51  ;;  %v2656_v44 = vld [vmem:[#allocation12 + $0x140] sm:$0xff] }
 0x218   :  { %2551 = vmatprep.subr.bf16.mxu1 %v6935_v55  ;;  %v769_v55 = vld [vmem:[#allocation9 + $0x2d8] sm:$0xff]  ;;  %v2660_v46 = vld [vmem:[#allocation12 + $0x160] sm:$0xff] }
 0x219   :  { %v6870_v3 = vcombine.low %v769_v55, %v773_v56 }
 0x21a   :  { %2511 = vmatpush1.bf16.msra.mxu0 %v6806_v60  ;;  %v7006_v60 = vcombine.low %v905_v47, %v909_v51  ;;  %v7209_v47 = vcombine.high %v2792_v38, %v2796_v39 }
 0x21b   :  { %2552 = vmatpush1.bf16.msra.mxu1 %v6934_v61  ;;  %2512 = vmatprep.subr.bf16.mxu0 %v6799_v62  ;;  %v6871_v61 = vcombine.high %v769_v55, %v773_v56  ;;  %v6999_v62 = vcombine.high %v897_v57, %v901_v58  ;;  %v7073_v56 = vcombine.high %v2656_v44, %v2660_v46 }
 0x21c   :  { %2553 = vmatprep.subr.bf16.mxu1 %v6927_v63  ;;  %v761_v63 = vld [vmem:[#allocation9 + $0x298] sm:$0xff] }
 0x21d   :  { %v6862_v11 = vcombine.low %v761_v63, %v765_v0 }
 0x21e   :  { %2513 = vmatpush1.bf16.msra.mxu0 %v6798_v4  ;;  %v6998_v4 = vcombine.low %v897_v57, %v901_v58  ;;  %v7208_v57 = vcombine.low %v2792_v38, %v2796_v39  ;;  %v2616_v39 = vld [vmem:[#allocation12] sm:$0xff] }
 0x21f   :  { %2554 = vmatpush1.bf16.msra.mxu1 %v6926_v5  ;;  %2514 = vmatprep.subr.bf16.mxu0 %v6791_v6  ;;  %v6863_v5 = vcombine.high %v761_v63, %v765_v0  ;;  %v6991_v6 = vcombine.high %v889_v1, %v893_v2  ;;  %v2776_v63 = vld [vmem:[#allocation12 + $0x500] sm:$0xff] }
 0x220   :  { %2555 = vmatprep.subr.bf16.mxu1 %v6919_v7  ;;  %v753_v7 = vld [vmem:[#allocation9 + $0x258] sm:$0xff]  ;;  %v2780_v0 = vld [vmem:[#allocation12 + $0x520] sm:$0xff] }
 0x221   :  { %v6854_v24 = vcombine.low %v753_v7, %v757_v8 }
 0x222   :  { %2515 = vmatpush1.bf16.msra.mxu0 %v6790_v12  ;;  %v6990_v12 = vcombine.low %v889_v1, %v893_v2  ;;  %v7072_v2 = vcombine.low %v2656_v44, %v2660_v46 }
 0x223   :  { %2556 = vmatpush1.bf16.msra.mxu1 %v6918_v16  ;;  %2516 = vmatprep.subr.bf16.mxu0 %v6783_v19  ;;  %v6855_v16 = vcombine.high %v753_v7, %v757_v8  ;;  %v6983_v19 = vcombine.high %v881_v9, %v885_v10  ;;  %v2640_v8 = vld [vmem:[#allocation12 + $0xc0] sm:$0xff] }
 0x224   :  { %2557 = vmatprep.subr.bf16.mxu1 %v6911_v20  ;;  %v745_v20 = vld [vmem:[#allocation9 + $0x218] sm:$0xff] }
 0x225   :  { %v6846_v32 = vcombine.low %v745_v20, %v749_v21 }
 0x226   :  { %2517 = vmatpush1.bf16.msra.mxu0 %v6782_v25  ;;  %v6982_v25 = vcombine.low %v881_v9, %v885_v10  ;;  %v2644_v9 = vld [vmem:[#allocation12 + $0xe0] sm:$0xff]  ;;  %v7193_v10 = vcombine.high %v2776_v63, %v2780_v0 }
 0x227   :  { %2558 = vmatpush1.bf16.msra.mxu1 %v6910_v26  ;;  %2518 = vmatprep.subr.bf16.mxu0 %v6903_v27  ;;  %v6847_v26 = vcombine.high %v745_v20, %v749_v21  ;;  %v6975_v27 = vcombine.high %v873_v22, %v877_v23  ;;  %v7057_v21 = vcombine.high %v2640_v8, %v2644_v9 }
 0x228   :  { %2559 = vmatprep.subr.bf16.mxu1 %v7031_v28  ;;  %v2672_v28 = vld [vmem:[#allocation12 + $0x1c0] sm:$0xff] }
 0x229   :  { %v7088_v40 = vcombine.low %v2672_v28, %v2676_v29 }
 0x22a   :  { %2519 = vmatpush2.bf16.msra.mxu0 %v6902_v33  ;;  %v6974_v33 = vcombine.low %v873_v22, %v877_v23  ;;  %v7192_v22 = vcombine.low %v2776_v63, %v2780_v0  ;;  %v2632_v23 = vld [vmem:[#allocation12 + $0x80] sm:$0xff] }
 0x22b   :  { %2560 = vmatpush2.bf16.msra.mxu1 %v7030_v34  ;;  %2520 = vmatprep.subr.bf16.mxu0 %v6895_v35  ;;  %v7089_v34 = vcombine.high %v2672_v28, %v2676_v29  ;;  %v2664_v35 = vld [vmem:[#allocation12 + $0x180] sm:$0xff]  ;;  %v7056_v28 = vcombine.low %v2640_v8, %v2644_v9 }
 0x22c   :  { %2561 = vmatprep.subr.bf16.mxu1 %v7023_v36  ;;  %v2668_v36 = vld [vmem:[#allocation12 + $0x1a0] sm:$0xff] }
 0x22d   :  { %v2860_v63 = vld [vmem:[#allocation12 + $0x7a0] sm:$0xff] }
 0x22e   :  { %2521 = vmatpush2.bf16.msra.mxu0 %v6894_v41  ;;  %v8141_v41 = vld [vmem:[#allocation11] sm:$0xff] }
 0x22f   :  { %2562 = vmatpush2.bf16.msra.mxu1 %v7022_v42  ;;  %2522 = vmatprep.subr.bf16.mxu0 %v6887_v43  ;;  %v7081_v42 = vcombine.high %v2664_v35, %v2668_v36  ;;  %v7216_v43 = vcombine.low %v2800_v30, %v2804_v31  ;;  %v2624_v31 = vld [vmem:[#allocation12 + $0x40] sm:$0xff] }
 0x230   :  { %2563 = vmatprep.subr.bf16.mxu1 %v7015_v45  ;;  %v943_v45 = vrot.slane %v8141_v41, %v8110_v17 }
 0x232   :  { %2523 = vmatpush2.bf16.msra.mxu0 %v6886_v52  ;;  %v2784_v52 = vld [vmem:[#allocation12 + $0x540] sm:$0xff] }
 0x233   :  { %2564 = vmatpush2.bf16.msra.mxu1 %v7014_v49  ;;  %2524 = vmatprep.subr.bf16.mxu0 %v6879_v53  ;;  %v2788_v49 = vld [vmem:[#allocation12 + $0x560] sm:$0xff] }
 0x234   :  { %2565 = vmatprep.subr.bf16.mxu1 %v7007_v54  ;;  %v7080_v54 = vcombine.low %v2664_v35, %v2668_v36  ;;  %v2756_v35 = vld [vmem:[#allocation12 + $0x460] sm:$0xff] }
 0x236   :  { %2525 = vmatpush2.bf16.msra.mxu0 %v6878_v59 }
 0x237   :  { %2566 = vmatpush2.bf16.msra.mxu1 %v7006_v60  ;;  %2526 = vmatprep.subr.bf16.mxu0 %v6871_v61  ;;  %v2648_v60 = vld [vmem:[#allocation12 + $0x100] sm:$0xff] }
 0x238   :  { %2567 = vmatprep.subr.bf16.mxu1 %v6999_v62  ;;  %v2652_v61 = vld [vmem:[#allocation12 + $0x120] sm:$0xff] }
 0x23a   :  { %2527 = vmatpush2.bf16.msra.mxu0 %v6870_v3 }
 0x23b   :  { %2568 = vmatpush2.bf16.msra.mxu1 %v6998_v4  ;;  %2528 = vmatprep.subr.bf16.mxu0 %v6863_v5  ;;  %v7065_v4 = vcombine.high %v2648_v60, %v2652_v61  ;;  %v7200_v5 = vcombine.low %v2784_v52, %v2788_v49 }
 0x23c   :  { %2569 = vmatprep.subr.bf16.mxu1 %v6991_v6 }
 0x23e   :  { %2529 = vmatpush2.bf16.msra.mxu0 %v6862_v11  ;;  %v2768_v11 = vld [vmem:[#allocation12 + $0x4c0] sm:$0xff] }
 0x23f   :  { %2570 = vmatpush2.bf16.msra.mxu1 %v6990_v12  ;;  %2530 = vmatprep.subr.bf16.mxu0 %v6855_v16  ;;  %v2772_v12 = vld [vmem:[#allocation12 + $0x4e0] sm:$0xff] }
 0x240   :  { %2571 = vmatprep.subr.bf16.mxu1 %v6983_v19  ;;  %v7064_v19 = vcombine.low %v2648_v60, %v2652_v61  ;;  %v7184_v30 = vcombine.low %v2768_v11, %v2772_v12  ;;  %v2728_v60 = vld [vmem:[#allocation12 + $0x380] sm:$0xff] }
 0x241   :  { %v2732_v61 = vld [vmem:[#allocation12 + $0x3a0] sm:$0xff] }
 0x242   :  { %2531 = vmatpush2.bf16.msra.mxu0 %v6854_v24  ;;  %v2636_v24 = vld [vmem:[#allocation12 + $0xa0] sm:$0xff] }
 0x243   :  { %2572 = vmatpush2.bf16.msra.mxu1 %v6982_v25  ;;  %2532 = vmatprep.subr.bf16.mxu0 %v6847_v26  ;;  %v7185_v25 = vcombine.high %v2768_v11, %v2772_v12  ;;  %v2760_v26 = vld [vmem:[#allocation12 + $0x480] sm:$0xff]  ;;  %v7049_v29 = vcombine.high %v2632_v23, %v2636_v24  ;;  %v7048_v36 = vcombine.low %v2632_v23, %v2636_v24 }
 0x244   :  { %2573 = vmatprep.subr.bf16.mxu1 %v6975_v27  ;;  %v2764_v27 = vld [vmem:[#allocation12 + $0x4a0] sm:$0xff] }
 0x245   :  { %v7176_v38 = vcombine.low %v2760_v26, %v2764_v27  ;;  %v2716_v11 = vld [vmem:[#allocation12 + $0x320] sm:$0xff] }
 0x246   :  { %2533 = vmatpush2.bf16.msra.mxu0 %v6846_v32  ;;  %v2628_v32 = vld [vmem:[#allocation12 + $0x60] sm:$0xff] }
 0x247   :  { %2574 = vmatpush2.bf16.msra.mxu1 %v6974_v33  ;;  %5688 = vmatprep.subr.bf16.mxu0 %v7089_v34  ;;  %v7177_v33 = vcombine.high %v2760_v26, %v2764_v27  ;;  %v2752_v34 = vld [vmem:[#allocation12 + $0x440] sm:$0xff]  ;;  %v7040_v44 = vcombine.low %v2624_v31, %v2628_v32 }
 0x248   :  { %5729 = vmatprep.subr.bf16.mxu1 %v7217_v37  ;;  %v7041_v37 = vcombine.high %v2624_v31, %v2628_v32  ;;  %v2704_v24 = vld [vmem:[#allocation12 + $0x2c0] sm:$0xff]  ;;  %v939_v32 = vrot.slane %v8141_v41, %v8106_v14 }
 0x249   :  { %2535 = vmatmul.mubr.bf16.vlgmr.msra.gmra.mxu0 %v8121_v48  ;;  %v8146_v51 = vpop.f32.mrf.mxu0  ;;  %v7201_v48 = vcombine.high %v2784_v52, %v2788_v49  ;;  %v2736_v52 = vld [vmem:[#allocation12 + $0x3c0] sm:$0xff] }
 0x24a   :  { %2576 = vmatmul.mubr.bf16.vlgmr.msra.gmra.mxu1 %v8125_v50  ;;  %v8149_v53 = vpop.f32.mrf.mxu1  ;;  %5689 = vmatpush1.bf16.msra.mxu0 %v7088_v40  ;;  %v2620_v40 = vld [vmem:[#allocation12 + $0x20] sm:$0xff] }
 0x24b   :  { %v2292_v55 = vpop.f32.mrf.mxu0  ;;  %5690 = vmatprep.subr.bf16.mxu0 %v7081_v42  ;;  %5730 = vmatpush1.bf16.msra.mxu1 %v7216_v43  ;;  %v7169_v42 = vcombine.high %v2752_v34, %v2756_v35  ;;  %v2744_v43 = vld [vmem:[#allocation12 + $0x400] sm:$0xff]  ;;  %v7033_v46 = vcombine.high %v2616_v39, %v2620_v40 }
 0x24c   :  { %v2293_v58 = vadd.f32 %v2292_v55, %v943_v45  ;;  %v2333_v59 = vpop.f32.mrf.mxu1  ;;  %5731 = vmatprep.subr.bf16.mxu1 %v7209_v47  ;;  %v2748_v45 = vld [vmem:[#allocation12 + $0x420] sm:$0xff]  ;;  %v7168_v47 = vcombine.low %v2752_v34, %v2756_v35 }
 0x24d   :  { %v2294_v62 = vpop.f32.mrf.mxu0  ;;  %v2740_v49 = vld [vmem:[#allocation12 + $0x3e0] sm:$0xff] }
 0x24e   :  { %v2334_v1 = vadd.f32 %v2333_v59, %v2293_v58  ;;  %v2335_v50 = vpop.f32.mrf.mxu1  ;;  %5691 = vmatpush1.bf16.msra.mxu0 %v7080_v54  ;;  %v7161_v54 = vcombine.high %v2744_v43, %v2748_v45  ;;  %v2864_v55 = vld [vmem:[#allocation12 + $0x7c0] sm:$0xff]  ;;  %v7153_v58 = vcombine.high %v2736_v52, %v2740_v49  ;;  %v7160_v59 = vcombine.low %v2744_v43, %v2748_v45 }
 0x24f   :  { %v2295_v3 = vpop.f32.mrf.mxu0  ;;  %5692 = vmatprep.subr.bf16.mxu0 %v7073_v56  ;;  %5732 = vmatpush1.bf16.msra.mxu1 %v7208_v57  ;;  %v2868_v56 = vld [vmem:[#allocation12 + $0x7e0] sm:$0xff]  ;;  %v7032_v57 = vcombine.low %v2616_v39, %v2620_v40  ;;  %v7152_v0 = vcombine.low %v2736_v52, %v2740_v49 }
 0x250   :  { %vm2585_vm4 = vcmp.gt.f32.partialorder %v2334_v1, 0.0  ;;  %v2593_v6 = vmul.f32 0.2, %v2334_v1  ;;  %v2336_v7 = vpop.f32.mrf.mxu1  ;;  %5733 = vmatprep.subr.bf16.mxu1 %v7201_v48  ;;  %v7281_v48 = vcombine.high %v2864_v55, %v2868_v56  ;;  %v2856_v62 = vld [vmem:[#allocation12 + $0x780] sm:$0xff]  ;;  %v7280_v50 = vcombine.low %v2864_v55, %v2868_v56 }
 0x251   :  { %v2724_v3 = vld [vmem:[#allocation12 + $0x360] sm:$0xff]  ;;  %v7144_v7 = vcombine.low %v2728_v60, %v2732_v61  ;;  %v7272_v9 = vcombine.low %v2856_v62, %v2860_v63 }
 0x252   :  { %v2601_v16 = vsel %vm2585_vm4, %v2334_v1, %v2593_v6  ;;  %5693 = vmatpush1.bf16.msra.mxu0 %v7072_v2  ;;  %v7145_v1 = vcombine.high %v2728_v60, %v2732_v61  ;;  %v2720_v2 = vld [vmem:[#allocation12 + $0x340] sm:$0xff] }
 0x253   :  { %v8151_v20 = vpack.c.bf16 %v2601_v16, %v2601_v16  ;;  %5694 = vmatprep.subr.bf16.mxu0 %v7065_v4  ;;  %5734 = vmatpush1.bf16.msra.mxu1 %v7200_v5  ;;  %v7273_v4 = vcombine.high %v2856_v62, %v2860_v63  ;;  %v2848_v5 = vld [vmem:[#allocation12 + $0x740] sm:$0xff]  ;;  %v7137_v8 = vcombine.high %v2720_v2, %v2724_v3 }
 0x254   :  { %5735 = vmatprep.subr.bf16.mxu1 %v7193_v10  ;;  %v2852_v6 = vld [vmem:[#allocation12 + $0x760] sm:$0xff] }
 0x255   :  { %5720 = vmatprep.mubr.bf16.mxu0 %v8151_v20  ;;  %v2712_v10 = vld [vmem:[#allocation12 + $0x300] sm:$0xff]  ;;  %v7265_v12 = vcombine.high %v2848_v5, %v2852_v6  ;;  %v7264_v23 = vcombine.low %v2848_v5, %v2852_v6 }
 0x256   :  { %5695 = vmatpush1.bf16.msra.mxu0 %v7064_v19  ;;  %v2840_v16 = vld [vmem:[#allocation12 + $0x700] sm:$0xff] }
 0x257   :  { %5696 = vmatprep.subr.bf16.mxu0 %v7057_v21  ;;  %5736 = vmatpush1.bf16.msra.mxu1 %v7192_v22  ;;  %v2844_v19 = vld [vmem:[#allocation12 + $0x720] sm:$0xff]  ;;  %v7136_v21 = vcombine.low %v2720_v2, %v2724_v3  ;;  %v7129_v22 = vcombine.high %v2712_v10, %v2716_v11 }
 0x258   :  { %5737 = vmatprep.subr.bf16.mxu1 %v7185_v25  ;;  %v2708_v25 = vld [vmem:[#allocation12 + $0x2e0] sm:$0xff]  ;;  %v7257_v26 = vcombine.high %v2840_v16, %v2844_v19  ;;  %v7256_v31 = vcombine.low %v2840_v16, %v2844_v19  ;;  %v951_v16 = vrot.slane %v8141_v41, %v247_v18 }
 0x259   :  { %v2832_v27 = vld [vmem:[#allocation12 + $0x6c0] sm:$0xff] }
 0x25a   :  { %5697 = vmatpush1.bf16.msra.mxu0 %v7056_v28  ;;  %v2836_v28 = vld [vmem:[#allocation12 + $0x6e0] sm:$0xff] }
 0x25b   :  { %5698 = vmatprep.subr.bf16.mxu0 %v7049_v29  ;;  %5738 = vmatpush1.bf16.msra.mxu1 %v7184_v30  ;;  %v7128_v29 = vcombine.low %v2712_v10, %v2716_v11  ;;  %v7121_v30 = vcombine.high %v2704_v24, %v2708_v25  ;;  %v2700_v34 = vld [vmem:[#allocation12 + $0x2a0] sm:$0xff]  ;;  %v7249_v35 = vcombine.high %v2832_v27, %v2836_v28 }
 0x25c   :  { %5739 = vmatprep.subr.bf16.mxu1 %v7177_v33  ;;  %v2696_v33 = vld [vmem:[#allocation12 + $0x280] sm:$0xff]  ;;  %v7248_v40 = vcombine.low %v2832_v27, %v2836_v28 }
 0x25d   :  { %v7113_v39 = vcombine.high %v2696_v33, %v2700_v34  ;;  %v2688_v43 = vld [vmem:[#allocation12 + $0x240] sm:$0xff]  ;;  %v7112_v52 = vcombine.low %v2696_v33, %v2700_v34 }
 0x25e   :  { %5699 = vmatpush1.bf16.msra.mxu0 %v7048_v36  ;;  %v2824_v36 = vld [vmem:[#allocation12 + $0x680] sm:$0xff] }
 0x25f   :  { %5700 = vmatprep.subr.bf16.mxu0 %v7041_v37  ;;  %5740 = vmatpush1.bf16.msra.mxu1 %v7176_v38  ;;  %v2828_v37 = vld [vmem:[#allocation12 + $0x6a0] sm:$0xff]  ;;  %v7120_v38 = vcombine.low %v2704_v24, %v2708_v25 }
 0x260   :  { %5741 = vmatprep.subr.bf16.mxu1 %v7169_v42  ;;  %v2291_v42 = vadd.f32 %v8146_v51, %v939_v32  ;;  %v2692_v45 = vld [vmem:[#allocation12 + $0x260] sm:$0xff] }
 0x261   :  { %v7105_v49 = vcombine.high %v2688_v43, %v2692_v45  ;;  %v2680_v56 = vld [vmem:[#allocation12 + $0x200] sm:$0xff]  ;;  %v7104_v60 = vcombine.low %v2688_v43, %v2692_v45 }
 0x262   :  { %5701 = vmatpush1.bf16.msra.mxu0 %v7040_v44  ;;  %v7241_v44 = vcombine.high %v2824_v36, %v2828_v37  ;;  %v2332_v55 = vadd.f32 %v8149_v53, %v2291_v42  ;;  %v2812_v51 = vld [vmem:[#allocation12 + $0x620] sm:$0xff] }
 0x263   :  { %5702 = vmatprep.subr.bf16.mxu0 %v7033_v46  ;;  %5742 = vmatpush1.bf16.msra.mxu1 %v7168_v47  ;;  %v2816_v46 = vld [vmem:[#allocation12 + $0x640] sm:$0xff] }
 0x264   :  { %5743 = vmatprep.subr.bf16.mxu1 %v7161_v54  ;;  %v2820_v47 = vld [vmem:[#allocation12 + $0x660] sm:$0xff]  ;;  %v7240_v54 = vcombine.low %v2824_v36, %v2828_v37  ;;  %v2592_v62 = vmul.f32 0.2, %v2332_v55  ;;  %vm2584_vm5 = vcmp.gt.f32.partialorder %v2332_v55, 0.0 }
 0x265   :  { %v8160_v53 = vld [vmem:[#allocation12 + $0xde0] sm:$0xff] }
 0x266   :  { %5703 = vmatpush1.bf16.msra.mxu0 %v7032_v57  ;;  %v2684_v57 = vld [vmem:[#allocation12 + $0x220] sm:$0xff]  ;;  %v2600_v5 = vsel %vm2584_vm5, %v2332_v55, %v2592_v62 }
 0x267   :  { %5704 = vmatprep.subr.bf16.mxu0 %v7153_v58  ;;  %5744 = vmatpush1.bf16.msra.mxu1 %v7160_v59  ;;  %v7233_v58 = vcombine.high %v2816_v46, %v2820_v47  ;;  %v2808_v59 = vld [vmem:[#allocation12 + $0x600] sm:$0xff]  ;;  %v7097_v61 = vcombine.high %v2680_v56, %v2684_v57  ;;  %v7096_v2 = vcombine.low %v2680_v56, %v2684_v57 }
 0x268   :  { %5745 = vmatprep.subr.bf16.mxu1 %v7281_v48  ;;  %v7232_v48 = vcombine.low %v2816_v46, %v2820_v47  ;;  %v7225_v63 = vcombine.high %v2808_v59, %v2812_v51  ;;  %v7224_v3 = vcombine.low %v2808_v59, %v2812_v51  ;;  %v2920_v6 = vld [vmem:[#allocation12 + $0x980] sm:$0xff]  ;;  %v8167_v11 = vpack.c.bf16 %v2600_v5, %v2600_v5  ;;  %v8179_v59 = vld [vmem:[#allocation12 + $0x5c8] sm:$0xff] }
 0x269   :  { %v2912_v19 = vld [vmem:[#allocation12 + $0x940] sm:$0xff]  ;;  %v8181_v51 = vld [vmem:[#allocation12 + $0x5e8] sm:$0xff] }
 0x26a   :  { %5705 = vmatpush2.bf16.msra.mxu0 %v7152_v0  ;;  %v2928_v0 = vld [vmem:[#allocation12 + $0x9c0] sm:$0xff]  ;;  %v7218_v62 = vcombine.low %v8179_v59, %v8181_v51 }
 0x26b   :  { %5706 = vmatprep.subr.bf16.mxu0 %v7145_v1  ;;  %5746 = vmatpush2.bf16.msra.mxu1 %v7280_v50  ;;  %v2932_v1 = vld [vmem:[#allocation12 + $0x9e0] sm:$0xff] }
 0x26c   :  { %5747 = vmatprep.subr.bf16.mxu1 %v7273_v4  ;;  %v8158_v50 = vld [vmem:[#allocation12 + $0xdc0] sm:$0xff]  ;;  %v7345_v4 = vcombine.high %v2928_v0, %v2932_v1  ;;  %v7344_v10 = vcombine.low %v2928_v0, %v2932_v1 }
 0x26d   :  { %v2900_v42 = vld [vmem:[#allocation12 + $0x8e0] sm:$0xff]  ;;  %v7472_v55 = vcombine.low %v8158_v50, %v8160_v53 }
 0x26e   :  { %5707 = vmatpush2.bf16.msra.mxu0 %v7144_v7  ;;  %v2924_v7 = vld [vmem:[#allocation12 + $0x9a0] sm:$0xff] }
 0x26f   :  { %5708 = vmatprep.subr.bf16.mxu0 %v7137_v8  ;;  %5748 = vmatpush2.bf16.msra.mxu1 %v7272_v9  ;;  %v7473_v8 = vcombine.high %v8158_v50, %v8160_v53  ;;  %v947_v9 = vrot.slane %v8141_v41, %v243_v15  ;;  %v7336_v15 = vcombine.low %v2920_v6, %v2924_v7  ;;  %v3048_v45 = vld [vmem:[#allocation12 + $0xd80] sm:$0xff] }
 0x270   :  { %5749 = vmatprep.subr.bf16.mxu1 %v7265_v12  ;;  %v7337_v12 = vcombine.high %v2920_v6, %v2924_v7  ;;  %v2892_v57 = vld [vmem:[#allocation12 + $0x8a0] sm:$0xff] }
 0x271   :  { %v2880_v1 = vld [vmem:[#allocation12 + $0x840] sm:$0xff] }
 0x272   :  { %5709 = vmatpush2.bf16.msra.mxu0 %v7136_v21  ;;  %v2916_v21 = vld [vmem:[#allocation12 + $0x960] sm:$0xff] }
 0x273   :  { %5710 = vmatprep.subr.bf16.mxu0 %v7129_v22  ;;  %5750 = vmatpush2.bf16.msra.mxu1 %v7264_v23  ;;  %v2884_v50 = vld [vmem:[#allocation12 + $0x860] sm:$0xff] }
 0x274   :  { %5751 = vmatprep.subr.bf16.mxu1 %v7257_v26  ;;  %v7329_v26 = vcombine.high %v2912_v19, %v2916_v21  ;;  %v7297_v5 = vcombine.high %v2880_v1, %v2884_v50  ;;  %v2872_v7 = vld [vmem:[#allocation12 + $0x800] sm:$0xff] }
 0x276   :  { %5711 = vmatpush2.bf16.msra.mxu0 %v7128_v29 }
 0x277   :  { %5712 = vmatprep.subr.bf16.mxu0 %v7121_v30  ;;  %5752 = vmatpush2.bf16.msra.mxu1 %v7256_v31  ;;  %v2904_v30 = vld [vmem:[#allocation12 + $0x900] sm:$0xff] }
 0x278   :  { %5753 = vmatprep.subr.bf16.mxu1 %v7249_v35  ;;  %v2908_v31 = vld [vmem:[#allocation12 + $0x920] sm:$0xff]  ;;  %v7328_v35 = vcombine.low %v2912_v19, %v2916_v21 }
 0x279   :  { %v7321_v37 = vcombine.high %v2904_v30, %v2908_v31  ;;  %v7320_v47 = vcombine.low %v2904_v30, %v2908_v31  ;;  %v2988_v30 = vld [vmem:[#allocation12 + $0xba0] sm:$0xff] }
 0x27a   :  { %5713 = vmatpush2.bf16.msra.mxu0 %v7120_v38 }
 0x27b   :  { %5714 = vmatprep.subr.bf16.mxu0 %v7113_v39  ;;  %5754 = vmatpush2.bf16.msra.mxu1 %v7248_v40  ;;  %v2896_v40 = vld [vmem:[#allocation12 + $0x8c0] sm:$0xff] }
 0x27c   :  { %5755 = vmatprep.subr.bf16.mxu1 %v7241_v44  ;;  %v3052_v44 = vld [vmem:[#allocation12 + $0xda0] sm:$0xff] }
 0x27d   :  { %v7464_v0 = vcombine.low %v3048_v45, %v3052_v44 }
 0x27e   :  { %5715 = vmatpush2.bf16.msra.mxu0 %v7112_v52 }
 0x27f   :  { %5716 = vmatprep.subr.bf16.mxu0 %v7105_v49  ;;  %5756 = vmatpush2.bf16.msra.mxu1 %v7240_v54  ;;  %v7313_v49 = vcombine.high %v2896_v40, %v2900_v42  ;;  %v2888_v54 = vld [vmem:[#allocation12 + $0x880] sm:$0xff] }
 0x280   :  { %5757 = vmatprep.subr.bf16.mxu1 %v7233_v58  ;;  %v7465_v58 = vcombine.high %v3048_v45, %v3052_v44  ;;  %v2968_v44 = vld [vmem:[#allocation12 + $0xb00] sm:$0xff] }
 0x282   :  { %5717 = vmatpush2.bf16.msra.mxu0 %v7104_v60  ;;  %v3040_v60 = vld [vmem:[#allocation12 + $0xd40] sm:$0xff] }
 0x283   :  { %5718 = vmatprep.subr.bf16.mxu0 %v7097_v61  ;;  %5758 = vmatpush2.bf16.msra.mxu1 %v7232_v48  ;;  %v3044_v61 = vld [vmem:[#allocation12 + $0xd60] sm:$0xff]  ;;  %v7312_v48 = vcombine.low %v2896_v40, %v2900_v42 }
 0x284   :  { %5759 = vmatprep.subr.bf16.mxu1 %v7225_v63  ;;  %v7305_v63 = vcombine.high %v2888_v54, %v2892_v57  ;;  %v7457_v53 = vcombine.high %v3040_v60, %v3044_v61  ;;  %v7456_v6 = vcombine.low %v3040_v60, %v3044_v61  ;;  %v3004_v40 = vld [vmem:[#allocation12 + $0xc20] sm:$0xff] }
 0x285   :  { %v2960_v60 = vld [vmem:[#allocation12 + $0xac0] sm:$0xff] }
 0x286   :  { %5719 = vmatpush2.bf16.msra.mxu0 %v7096_v2  ;;  %v3032_v2 = vld [vmem:[#allocation12 + $0xd00] sm:$0xff] }
 0x287   :  { %5760 = vmatpush2.bf16.msra.mxu1 %v7224_v3  ;;  %5770 = vmatprep.subr.bf16.mxu0 %v7345_v4  ;;  %v3036_v3 = vld [vmem:[#allocation12 + $0xd20] sm:$0xff]  ;;  %v7304_v4 = vcombine.low %v2888_v54, %v2892_v57 }
 0x288   :  { %5811 = vmatprep.subr.bf16.mxu1 %v7473_v8  ;;  %v2876_v8 = vld [vmem:[#allocation12 + $0x820] sm:$0xff]  ;;  %v7448_v21 = vcombine.low %v3032_v2, %v3036_v3 }
 0x289   :  { %v2372_v22 = vpop.f32.mrf.mxu0  ;;  %5721 = vmatmul.mubr.bf16.vlgmr.msra.gmra.mxu0 %v8167_v11  ;;  %v7289_v19 = vcombine.high %v2872_v7, %v2876_v8  ;;  %v3124_v54 = vld [vmem:[#allocation12 + $0xfe0] sm:$0xff] }
 0x28a   :  { %v2373_v23 = vadd.f32 %v2372_v22, %v947_v9  ;;  %v2413_v24 = vpop.f32.mrf.mxu1  ;;  %5771 = vmatpush1.bf16.msra.mxu0 %v7344_v10  ;;  %v7449_v9 = vcombine.high %v3032_v2, %v3036_v3  ;;  %v3024_v10 = vld [vmem:[#allocation12 + $0xcc0] sm:$0xff] }
 0x28b   :  { %v2374_v25 = vpop.f32.mrf.mxu0  ;;  %5772 = vmatprep.subr.bf16.mxu0 %v7337_v12  ;;  %v3028_v12 = vld [vmem:[#allocation12 + $0xce0] sm:$0xff] }
 0x28c   :  { %v2414_v27 = vadd.f32 %v2413_v24, %v2373_v23  ;;  %v2375_v28 = vadd.f32 %v2374_v25, %v951_v16  ;;  %v2415_v29 = vpop.f32.mrf.mxu1  ;;  %v7296_v16 = vcombine.low %v2880_v1, %v2884_v50  ;;  %v2992_v22 = vld [vmem:[#allocation12 + $0xbc0] sm:$0xff]  ;;  %v7441_v24 = vcombine.high %v3024_v10, %v3028_v12 }
 0x28d   :  { %v2376_v32 = vpop.f32.mrf.mxu0  ;;  %v2996_v23 = vld [vmem:[#allocation12 + $0xbe0] sm:$0xff] }
 0x28e   :  { %vm2586_vm6 = vcmp.gt.f32.partialorder %v2414_v27, 0.0  ;;  %v2594_v18 = vmul.f32 0.2, %v2414_v27  ;;  %v2416_v33 = vadd.f32 %v2415_v29, %v2375_v28  ;;  %v2417_v34 = vpop.f32.mrf.mxu1  ;;  %5773 = vmatpush1.bf16.msra.mxu0 %v7336_v15  ;;  %v3016_v15 = vld [vmem:[#allocation12 + $0xc80] sm:$0xff]  ;;  %v7440_v28 = vcombine.low %v3024_v10, %v3028_v12 }
 0x28f   :  { %v2377_v36 = vpop.f32.mrf.mxu0  ;;  %5774 = vmatprep.subr.bf16.mxu0 %v7329_v26  ;;  %v3020_v25 = vld [vmem:[#allocation12 + $0xca0] sm:$0xff]  ;;  %v7288_v26 = vcombine.low %v2872_v7, %v2876_v8 }
 0x290   :  { %vm2587_vm7 = vcmp.gt.f32.partialorder %v2416_v33, 0.0  ;;  %v2595_v38 = vmul.f32 0.2, %v2416_v33  ;;  %v2418_v39 = vpop.f32.mrf.mxu1  ;;  %v2602_v43 = vsel %vm2586_vm6, %v2414_v27, %v2594_v18  ;;  %v7409_v27 = vcombine.high %v2992_v22, %v2996_v23  ;;  %v2984_v29 = vld [vmem:[#allocation12 + $0xb80] sm:$0xff] }
 0x291   :  { %v8177_v56 = vpack.c.bf16 %v2602_v43, %v2602_v43  ;;  %v7433_v31 = vcombine.high %v3016_v15, %v3020_v25  ;;  %v3008_v32 = vld [vmem:[#allocation12 + $0xc40] sm:$0xff]  ;;  %v7401_v34 = vcombine.high %v2984_v29, %v2988_v30  ;;  %v7400_v42 = vcombine.low %v2984_v29, %v2988_v30 }
 0x292   :  { %v2603_v46 = vsel %vm2587_vm7, %v2416_v33, %v2595_v38  ;;  %5775 = vmatpush1.bf16.msra.mxu0 %v7328_v35  ;;  %v3012_v18 = vld [vmem:[#allocation12 + $0xc60] sm:$0xff]  ;;  %v7408_v33 = vcombine.low %v2992_v22, %v2996_v23  ;;  %v7432_v35 = vcombine.low %v3016_v15, %v3020_v25 }
 0x293   :  { %v8173_v52 = vpack.c.bf16 %v2603_v46, %v2603_v46  ;;  %5776 = vmatprep.subr.bf16.mxu0 %v7321_v37  ;;  %v2976_v36 = vld [vmem:[#allocation12 + $0xb40] sm:$0xff]  ;;  %v7425_v38 = vcombine.high %v3008_v32, %v3012_v18  ;;  %v7424_v45 = vcombine.low %v3008_v32, %v3012_v18  ;;  %v8187_v32 = vld [vmem:[#allocation12 + $0x1c8] sm:$0xff] }
 0x294   :  { %v2980_v37 = vld [vmem:[#allocation12 + $0xb60] sm:$0xff]  ;;  %v8189_v18 = vld [vmem:[#allocation12 + $0x1e8] sm:$0xff] }
 0x295   :  { %5761 = vmatprep.mubr.bf16.mxu1 %v8173_v52  ;;  %v3000_v39 = vld [vmem:[#allocation12 + $0xc00] sm:$0xff]  ;;  %v7393_v43 = vcombine.high %v2976_v36, %v2980_v37 }
 0x296   :  { %5762 = vmatmul.mubr.bf16.vlgmr.msra.gmra.mxu1 %v8177_v56  ;;  %5777 = vmatpush1.bf16.msra.mxu0 %v7320_v47  ;;  %v2972_v46 = vld [vmem:[#allocation12 + $0xb20] sm:$0xff]  ;;  %v7417_v47 = vcombine.high %v3000_v39, %v3004_v40 }
 0x297   :  { %5778 = vmatprep.subr.bf16.mxu0 %v7313_v49  ;;  %5812 = vmatpush1.bf16.msra.mxu1 %v7472_v55  ;;  %v3120_v49 = vld [vmem:[#allocation12 + $0xfc0] sm:$0xff]  ;;  %v7392_v55 = vcombine.low %v2976_v36, %v2980_v37  ;;  %v7385_v57 = vcombine.high %v2968_v44, %v2972_v46  ;;  %v7384_v1 = vcombine.low %v2968_v44, %v2972_v46  ;;  %v954_v36 = vsub.s32 4, %v8103_v13 }
 0x298   :  { %5813 = vmatprep.subr.bf16.mxu1 %v7465_v58  ;;  %v7416_v58 = vcombine.low %v3000_v39, %v3004_v40  ;;  %v2964_v61 = vld [vmem:[#allocation12 + $0xae0] sm:$0xff]  ;;  %v958_v40 = vsub.s32 5, %v8103_v13 }
 0x299   :  { %v7377_v50 = vcombine.high %v2960_v60, %v2964_v61  ;;  %v2952_v2 = vld [vmem:[#allocation12 + $0xa80] sm:$0xff]  ;;  %v7376_v7 = vcombine.low %v2960_v60, %v2964_v61  ;;  %v955_v44 = vrot.slane %v8141_v41, %v954_v36 }
 0x29a   :  { %5779 = vmatpush1.bf16.msra.mxu0 %v7312_v48  ;;  %v7537_v48 = vcombine.high %v3120_v49, %v3124_v54  ;;  %v2956_v3 = vld [vmem:[#allocation12 + $0xaa0] sm:$0xff] }
 0x29b   :  { %5780 = vmatprep.subr.bf16.mxu0 %v7305_v63  ;;  %5814 = vmatpush1.bf16.msra.mxu1 %v7464_v0  ;;  %v3112_v63 = vld [vmem:[#allocation12 + $0xf80] sm:$0xff]  ;;  %v7369_v8 = vcombine.high %v2952_v2, %v2956_v3  ;;  %v7368_v22 = vcombine.low %v2952_v2, %v2956_v3 }
 0x29c   :  { %5815 = vmatprep.subr.bf16.mxu1 %v7457_v53  ;;  %v3116_v0 = vld [vmem:[#allocation12 + $0xfa0] sm:$0xff]  ;;  %v7536_v53 = vcombine.low %v3120_v49, %v3124_v54 }
 0x29d   :  { %v2944_v10 = vld [vmem:[#allocation12 + $0xa40] sm:$0xff] }
 0x29e   :  { %5781 = vmatpush1.bf16.msra.mxu0 %v7304_v4  ;;  %v7529_v4 = vcombine.high %v3112_v63, %v3116_v0  ;;  %v2948_v12 = vld [vmem:[#allocation12 + $0xa60] sm:$0xff] }
 0x29f   :  { %5782 = vmatprep.subr.bf16.mxu0 %v7297_v5  ;;  %5816 = vmatpush1.bf16.msra.mxu1 %v7456_v6  ;;  %v3104_v5 = vld [vmem:[#allocation12 + $0xf40] sm:$0xff]  ;;  %v7361_v23 = vcombine.high %v2944_v10, %v2948_v12  ;;  %v7360_v29 = vcombine.low %v2944_v10, %v2948_v12  ;;  %v2665_v10 = vld [vmem:[#allocation12 + $0x188] sm:$0xff] }
 0x2a0   :  { %5817 = vmatprep.subr.bf16.mxu1 %v7449_v9  ;;  %v3108_v6 = vld [vmem:[#allocation12 + $0xf60] sm:$0xff]  ;;  %v7528_v9 = vcombine.low %v3112_v63, %v3116_v0  ;;  %v2669_v12 = vld [vmem:[#allocation12 + $0x1a8] sm:$0xff] }
 0x2a1   :  { %v2936_v15 = vld [vmem:[#allocation12 + $0xa00] sm:$0xff] }
 0x2a2   :  { %5783 = vmatpush1.bf16.msra.mxu0 %v7296_v16  ;;  %v7521_v16 = vcombine.high %v3104_v5, %v3108_v6  ;;  %v2940_v25 = vld [vmem:[#allocation12 + $0xa20] sm:$0xff] }
 0x2a3   :  { %5784 = vmatprep.subr.bf16.mxu0 %v7289_v19  ;;  %5818 = vmatpush1.bf16.msra.mxu1 %v7448_v21  ;;  %v3096_v19 = vld [vmem:[#allocation12 + $0xf00] sm:$0xff]  ;;  %v7353_v30 = vcombine.high %v2936_v15, %v2940_v25  ;;  %v7352_v37 = vcombine.low %v2936_v15, %v2940_v25  ;;  %v2661_v15 = vld [vmem:[#allocation12 + $0x168] sm:$0xff]  ;;  %v7082_v25 = vcombine.low %v2665_v10, %v2669_v12 }
 0x2a4   :  { %5819 = vmatprep.subr.bf16.mxu1 %v7441_v24  ;;  %v3100_v21 = vld [vmem:[#allocation12 + $0xf20] sm:$0xff]  ;;  %v7520_v24 = vcombine.low %v3104_v5, %v3108_v6 }
 0x2a6   :  { %5785 = vmatpush1.bf16.msra.mxu0 %v7288_v26  ;;  %v7513_v26 = vcombine.high %v3096_v19, %v3100_v21 }
 0x2a7   :  { %5786 = vmatprep.subr.bf16.mxu0 %v7409_v27  ;;  %5820 = vmatpush1.bf16.msra.mxu1 %v7440_v28  ;;  %v3088_v27 = vld [vmem:[#allocation12 + $0xec0] sm:$0xff] }
 0x2a8   :  { %5821 = vmatprep.subr.bf16.mxu1 %v7433_v31  ;;  %v3092_v28 = vld [vmem:[#allocation12 + $0xee0] sm:$0xff]  ;;  %v7512_v31 = vcombine.low %v3096_v19, %v3100_v21  ;;  %v7090_v21 = vcombine.low %v8187_v32, %v8189_v18 }
 0x2a9   :  { %v7504_v39 = vcombine.low %v3088_v27, %v3092_v28 }
 0x2aa   :  { %5787 = vmatpush2.bf16.msra.mxu0 %v7408_v33  ;;  %v7505_v33 = vcombine.high %v3088_v27, %v3092_v28  ;;  %v2649_v27 = vld [vmem:[#allocation12 + $0x108] sm:$0xff] }
 0x2ab   :  { %5788 = vmatprep.subr.bf16.mxu0 %v7401_v34  ;;  %5822 = vmatpush1.bf16.msra.mxu1 %v7432_v35  ;;  %v3080_v34 = vld [vmem:[#allocation12 + $0xe80] sm:$0xff]  ;;  %v2653_v28 = vld [vmem:[#allocation12 + $0x128] sm:$0xff] }
 0x2ac   :  { %5823 = vmatprep.subr.bf16.mxu1 %v7425_v38  ;;  %v3084_v35 = vld [vmem:[#allocation12 + $0xea0] sm:$0xff]  ;;  %v7091_v38 = vcombine.high %v8187_v32, %v8189_v18  ;;  %v2645_v32 = vld [vmem:[#allocation12 + $0xe8] sm:$0xff]  ;;  %v7066_v18 = vcombine.low %v2649_v27, %v2653_v28 }
 0x2ad   :  { %v7496_v46 = vcombine.low %v3080_v34, %v3084_v35 }
 0x2ae   :  { %5789 = vmatpush2.bf16.msra.mxu0 %v7400_v42  ;;  %v7497_v42 = vcombine.high %v3080_v34, %v3084_v35  ;;  %v2633_v34 = vld [vmem:[#allocation12 + $0x88] sm:$0xff] }
 0x2af   :  { %5790 = vmatprep.subr.bf16.mxu0 %v7393_v43  ;;  %5824 = vmatpush1.bf16.msra.mxu1 %v7424_v45  ;;  %v3072_v43 = vld [vmem:[#allocation12 + $0xe40] sm:$0xff]  ;;  %v2637_v35 = vld [vmem:[#allocation12 + $0xa8] sm:$0xff] }
 0x2b0   :  { %5825 = vmatprep.subr.bf16.mxu1 %v7417_v47  ;;  %v3076_v45 = vld [vmem:[#allocation12 + $0xe60] sm:$0xff]  ;;  %v959_v47 = vrot.slane %v8141_v41, %v958_v40  ;;  %v7050_v40 = vcombine.low %v2633_v34, %v2637_v35 }
 0x2b1   :  { %v7489_v49 = vcombine.high %v3072_v43, %v3076_v45 }
 0x2b2   :  { %5791 = vmatpush2.bf16.msra.mxu0 %v7392_v55  ;;  %v3064_v55 = vld [vmem:[#allocation12 + $0xe00] sm:$0xff] }
 0x2b3   :  { %5792 = vmatprep.subr.bf16.mxu0 %v7385_v57  ;;  %5826 = vmatpush1.bf16.msra.mxu1 %v7416_v58  ;;  %v3068_v57 = vld [vmem:[#allocation12 + $0xe20] sm:$0xff] }
 0x2b4   :  { %5827 = vmatprep.subr.bf16.mxu1 %v7537_v48  ;;  %v7488_v48 = vcombine.low %v3072_v43, %v3076_v45  ;;  %v7480_v5 = vcombine.low %v3064_v55, %v3068_v57  ;;  %v2617_v43 = vld [vmem:[#allocation12 + $0x8] sm:$0xff] }
 0x2b5   :  { %v2621_v45 = vld [vmem:[#allocation12 + $0x28] sm:$0xff] }
 0x2b6   :  { %5793 = vmatpush2.bf16.msra.mxu0 %v7384_v1 }
 0x2b7   :  { %5794 = vmatprep.subr.bf16.mxu0 %v7377_v50  ;;  %5828 = vmatpush2.bf16.msra.mxu1 %v7536_v53  ;;  %v7481_v50 = vcombine.high %v3064_v55, %v3068_v57  ;;  %v2729_v57 = vld [vmem:[#allocation12 + $0x388] sm:$0xff] }
 0x2b8   :  { %5829 = vmatprep.subr.bf16.mxu1 %v7529_v4 }
 0x2ba   :  { %5795 = vmatpush2.bf16.msra.mxu0 %v7376_v7 }
 0x2bb   :  { %5796 = vmatprep.subr.bf16.mxu0 %v7369_v8  ;;  %5830 = vmatpush2.bf16.msra.mxu1 %v7528_v9  ;;  %v7219_v8 = vcombine.high %v8179_v59, %v8181_v51 }
 0x2bc   :  { %5831 = vmatprep.subr.bf16.mxu1 %v7521_v16 }
 0x2be   :  { %5797 = vmatpush2.bf16.msra.mxu0 %v7368_v22 }
 0x2bf   :  { %5798 = vmatprep.subr.bf16.mxu0 %v7361_v23  ;;  %5832 = vmatpush2.bf16.msra.mxu1 %v7520_v24  ;;  %v7083_v23 = vcombine.high %v2665_v10, %v2669_v12  ;;  %v2657_v24 = vld [vmem:[#allocation12 + $0x148] sm:$0xff] }
 0x2c0   :  { %5833 = vmatprep.subr.bf16.mxu1 %v7513_v26  ;;  %v7075_v26 = vcombine.high %v2657_v24, %v2661_v15 }
 0x2c2   :  { %5799 = vmatpush2.bf16.msra.mxu0 %v7360_v29  ;;  %v7074_v29 = vcombine.low %v2657_v24, %v2661_v15  ;;  %v7745_v24 = vld [vmem:[#allocation11] sm:$0xff] }
 0x2c3   :  { %5800 = vmatprep.subr.bf16.mxu0 %v7353_v30  ;;  %5834 = vmatpush2.bf16.msra.mxu1 %v7512_v31  ;;  %v7067_v30 = vcombine.high %v2649_v27, %v2653_v28  ;;  %v2641_v31 = vld [vmem:[#allocation12 + $0xc8] sm:$0xff] }
 0x2c4   :  { %5835 = vmatprep.subr.bf16.mxu1 %v7505_v33  ;;  %v7059_v33 = vcombine.high %v2641_v31, %v2645_v32  ;;  %v7058_v36 = vcombine.low %v2641_v31, %v2645_v32 }
 0x2c6   :  { %5801 = vmatpush2.bf16.msra.mxu0 %v7352_v37  ;;  %v7051_v37 = vcombine.high %v2633_v34, %v2637_v35 }
 0x2c7   :  { %5852 = vmatprep.subr.bf16.mxu0 %v7091_v38  ;;  %5836 = vmatpush2.bf16.msra.mxu1 %v7504_v39  ;;  %v2625_v38 = vld [vmem:[#allocation12 + $0x48] sm:$0xff] }
 0x2c8   :  { %5837 = vmatprep.subr.bf16.mxu1 %v7497_v42  ;;  %v2629_v39 = vld [vmem:[#allocation12 + $0x68] sm:$0xff] }
 0x2c9   :  { %v2454_v54 = vpop.f32.mrf.mxu0  ;;  %v7043_v42 = vcombine.high %v2625_v38, %v2629_v39 }
 0x2ca   :  { %v2455_v58 = vadd.f32 %v2454_v54, %v955_v44  ;;  %v2495_v60 = vpop.f32.mrf.mxu1  ;;  %v7042_v44 = vcombine.low %v2625_v38, %v2629_v39  ;;  %v7034_v54 = vcombine.low %v2617_v43, %v2621_v45  ;;  %v2929_v38 = vld [vmem:[#allocation12 + $0x9c8] sm:$0xff] }
 0x2cb   :  { %v2456_v61 = vpop.f32.mrf.mxu0  ;;  %5838 = vmatpush2.bf16.msra.mxu1 %v7496_v46  ;;  %v7035_v46 = vcombine.high %v2617_v43, %v2621_v45  ;;  %v2933_v39 = vld [vmem:[#allocation12 + $0x9e8] sm:$0xff] }
 0x2cc   :  { %v2496_v63 = vadd.f32 %v2495_v60, %v2455_v58  ;;  %v2457_v0 = vadd.f32 %v2456_v61, %v959_v47  ;;  %v2497_v1 = vpop.f32.mrf.mxu1  ;;  %5839 = vmatprep.subr.bf16.mxu1 %v7489_v49  ;;  %v2737_v47 = vld [vmem:[#allocation12 + $0x3c8] sm:$0xff] }
 0x2cd   :  { %v2458_v53 = vpop.f32.mrf.mxu0  ;;  %v2741_v49 = vld [vmem:[#allocation12 + $0x3e8] sm:$0xff] }
 0x2ce   :  { %vm2588_vm8 = vcmp.gt.f32.partialorder %v2496_v63, 0.0  ;;  %v2596_v2 = vmul.f32 0.2, %v2496_v63  ;;  %v2498_v3 = vadd.f32 %v2497_v1, %v2457_v0  ;;  %v2499_v41 = vpop.f32.mrf.mxu1  ;;  %v7155_v55 = vcombine.high %v2737_v47, %v2741_v49  ;;  %v2733_v58 = vld [vmem:[#allocation12 + $0x3a8] sm:$0xff] }
 0x2cf   :  { %v2459_v4 = vpop.f32.mrf.mxu0  ;;  %5840 = vmatpush2.bf16.msra.mxu1 %v7488_v48  ;;  %v7154_v60 = vcombine.low %v2737_v47, %v2741_v49  ;;  %v7147_v61 = vcombine.high %v2729_v57, %v2733_v58  ;;  %v2721_v48 = vld [vmem:[#allocation12 + $0x348] sm:$0xff]  ;;  %v7146_v0 = vcombine.low %v2729_v57, %v2733_v58  ;;  %v7347_v49 = vcombine.high %v2929_v38, %v2933_v39 }
 0x2d0   :  { %vm2589_vm9 = vcmp.gt.f32.partialorder %v2498_v3, 0.0  ;;  %v2597_v6 = vmul.f32 0.2, %v2498_v3  ;;  %v2500_v7 = vpop.f32.mrf.mxu1  ;;  %5841 = vmatprep.subr.bf16.mxu1 %v7481_v50  ;;  %v2604_v9 = vsel %vm2588_vm8, %v2496_v63, %v2596_v2  ;;  %v2725_v63 = vld [vmem:[#allocation12 + $0x368] sm:$0xff] }
 0x2d1   :  { %v8203_v22 = vpack.c.bf16 %v2604_v9, %v2604_v9  ;;  %v7139_v1 = vcombine.high %v2721_v48, %v2725_v63  ;;  %v2713_v50 = vld [vmem:[#allocation12 + $0x308] sm:$0xff]  ;;  %v7138_v2 = vcombine.low %v2721_v48, %v2725_v63  ;;  %v962_v9 = vsub.s32 6, %v8103_v13 }
 0x2d2   :  { %v2605_v16 = vsel %vm2589_vm9, %v2498_v3, %v2597_v6  ;;  %v2717_v53 = vld [vmem:[#allocation12 + $0x328] sm:$0xff]  ;;  %v7346_v63 = vcombine.low %v2929_v38, %v2933_v39 }
 0x2d3   :  { %v8199_v19 = vpack.c.bf16 %v2605_v16, %v2605_v16  ;;  %5842 = vmatpush2.bf16.msra.mxu1 %v7480_v5  ;;  %v7131_v3 = vcombine.high %v2713_v50, %v2717_v53  ;;  %v2705_v41 = vld [vmem:[#allocation12 + $0x2c8] sm:$0xff]  ;;  %v7130_v5 = vcombine.low %v2713_v50, %v2717_v53  ;;  %v966_v16 = vsub.s32 7, %v8103_v13 }
 0x2d4   :  { %5893 = vmatprep.subr.bf16.mxu1 %v7219_v8  ;;  %v2709_v4 = vld [vmem:[#allocation12 + $0x2e8] sm:$0xff]  ;;  %v963_v15 = vrot.slane %v7745_v24, %v962_v9 }
 0x2d5   :  { %5802 = vmatprep.mubr.bf16.mxu0 %v8199_v19  ;;  %v7123_v6 = vcombine.high %v2705_v41, %v2709_v4  ;;  %v2697_v7 = vld [vmem:[#allocation12 + $0x288] sm:$0xff]  ;;  %v7122_v10 = vcombine.low %v2705_v41, %v2709_v4 }
 0x2d6   :  { %5803 = vmatmul.mubr.bf16.vlgmr.msra.gmra.mxu0 %v8203_v22  ;;  %v2701_v8 = vld [vmem:[#allocation12 + $0x2a8] sm:$0xff] }
 0x2d7   :  { %5853 = vmatpush1.bf16.msra.mxu0 %v7090_v21  ;;  %5884 = vmatprep.mubr.bf16.mxu0 %v8151_v20  ;;  %v7115_v12 = vcombine.high %v2697_v7, %v2701_v8  ;;  %v2689_v21 = vld [vmem:[#allocation12 + $0x248] sm:$0xff] }
 0x2d8   :  { %5854 = vmatprep.subr.bf16.mxu0 %v7083_v23  ;;  %v2693_v23 = vld [vmem:[#allocation12 + $0x268] sm:$0xff] }
 0x2d9   :  { %v7107_v27 = vcombine.high %v2689_v21, %v2693_v23  ;;  %v2797_v58 = vld [vmem:[#allocation12 + $0x5a8] sm:$0xff] }
 0x2da   :  { %v2917_v41 = vld [vmem:[#allocation12 + $0x968] sm:$0xff] }
 0x2db   :  { %5855 = vmatpush1.bf16.msra.mxu0 %v7082_v25  ;;  %v7114_v25 = vcombine.low %v2697_v7, %v2701_v8  ;;  %v2777_v8 = vld [vmem:[#allocation12 + $0x508] sm:$0xff] }
 0x2dc   :  { %5856 = vmatprep.subr.bf16.mxu0 %v7075_v26  ;;  %v967_v26 = vrot.slane %v7745_v24, %v966_v16  ;;  %v2781_v9 = vld [vmem:[#allocation12 + $0x528] sm:$0xff] }
 0x2dd   :  { %v7195_v51 = vcombine.high %v2777_v8, %v2781_v9  ;;  %v2897_v24 = vld [vmem:[#allocation12 + $0x8c8] sm:$0xff] }
 0x2de   :  { %v2885_v38 = vld [vmem:[#allocation12 + $0x868] sm:$0xff] }
 0x2df   :  { %5857 = vmatpush1.bf16.msra.mxu0 %v7074_v29  ;;  %v2681_v29 = vld [vmem:[#allocation12 + $0x208] sm:$0xff] }
 0x2e0   :  { %5858 = vmatprep.subr.bf16.mxu0 %v7067_v30  ;;  %v2685_v30 = vld [vmem:[#allocation12 + $0x228] sm:$0xff] }
 0x2e3   :  { %5859 = vmatpush1.bf16.msra.mxu0 %v7066_v18 }
 0x2e4   :  { %5860 = vmatprep.subr.bf16.mxu0 %v7059_v33  ;;  %v7106_v33 = vcombine.low %v2689_v21, %v2693_v23  ;;  %v2769_v21 = vld [vmem:[#allocation12 + $0x4c8] sm:$0xff] }
 0x2e5   :  { %v2773_v23 = vld [vmem:[#allocation12 + $0x4e8] sm:$0xff] }
 0x2e7   :  { %5861 = vmatpush1.bf16.msra.mxu0 %v7058_v36  ;;  %v7099_v36 = vcombine.high %v2681_v29, %v2685_v30 }
 0x2e8   :  { %5862 = vmatprep.subr.bf16.mxu0 %v7051_v37 }
 0x2eb   :  { %5863 = vmatpush1.bf16.msra.mxu0 %v7050_v40 }
 0x2ec   :  { %5864 = vmatprep.subr.bf16.mxu0 %v7043_v42 }
 0x2ef   :  { %5865 = vmatpush1.bf16.msra.mxu0 %v7042_v44  ;;  %v7098_v44 = vcombine.low %v2681_v29, %v2685_v30  ;;  %v2761_v29 = vld [vmem:[#allocation12 + $0x488] sm:$0xff] }
 0x2f0   :  { %5866 = vmatprep.subr.bf16.mxu0 %v7035_v46  ;;  %v2765_v30 = vld [vmem:[#allocation12 + $0x4a8] sm:$0xff] }
 0x2f1   :  { %v7178_v39 = vcombine.low %v2761_v29, %v2765_v30 }
 0x2f3   :  { %5867 = vmatpush1.bf16.msra.mxu0 %v7034_v54 }
 0x2f4   :  { %5868 = vmatprep.subr.bf16.mxu0 %v7155_v55  ;;  %v2793_v55 = vld [vmem:[#allocation12 + $0x588] sm:$0xff] }
 0x2f5   :  { %v7211_v50 = vcombine.high %v2793_v55, %v2797_v58  ;;  %v7210_v4 = vcombine.low %v2793_v55, %v2797_v58  ;;  %v2865_v58 = vld [vmem:[#allocation12 + $0x7c8] sm:$0xff] }
 0x2f7   :  { %5869 = vmatpush2.bf16.msra.mxu0 %v7154_v60  ;;  %v2921_v60 = vld [vmem:[#allocation12 + $0x988] sm:$0xff] }
 0x2f8   :  { %5870 = vmatprep.subr.bf16.mxu0 %v7147_v61  ;;  %v2925_v61 = vld [vmem:[#allocation12 + $0x9a8] sm:$0xff] }
 0x2f9   :  { %v7339_v53 = vcombine.high %v2921_v60, %v2925_v61 }
 0x2fb   :  { %5871 = vmatpush2.bf16.msra.mxu0 %v7146_v0 }
 0x2fc   :  { %5872 = vmatprep.subr.bf16.mxu0 %v7139_v1  ;;  %v2785_v1 = vld [vmem:[#allocation12 + $0x548] sm:$0xff] }
 0x2ff   :  { %5873 = vmatpush2.bf16.msra.mxu0 %v7138_v2  ;;  %v2789_v2 = vld [vmem:[#allocation12 + $0x568] sm:$0xff] }
 0x300   :  { %5874 = vmatprep.subr.bf16.mxu0 %v7131_v3  ;;  %v2913_v3 = vld [vmem:[#allocation12 + $0x948] sm:$0xff]  ;;  %v7202_v16 = vcombine.low %v2785_v1, %v2789_v2 }
 0x301   :  { %v7331_v7 = vcombine.high %v2913_v3, %v2917_v41  ;;  %v7330_v59 = vcombine.low %v2913_v3, %v2917_v41  ;;  %v2857_v3 = vld [vmem:[#allocation12 + $0x788] sm:$0xff] }
 0x302   :  { %v2861_v41 = vld [vmem:[#allocation12 + $0x7a8] sm:$0xff] }
 0x303   :  { %5875 = vmatpush2.bf16.msra.mxu0 %v7130_v5  ;;  %v7338_v5 = vcombine.low %v2921_v60, %v2925_v61  ;;  %v2869_v60 = vld [vmem:[#allocation12 + $0x7e8] sm:$0xff] }
 0x304   :  { %5876 = vmatprep.subr.bf16.mxu0 %v7123_v6  ;;  %v7203_v6 = vcombine.high %v2785_v1, %v2789_v2  ;;  %v2993_v61 = vld [vmem:[#allocation12 + $0xbc8] sm:$0xff] }
 0x307   :  { %5877 = vmatpush2.bf16.msra.mxu0 %v7122_v10  ;;  %v2905_v10 = vld [vmem:[#allocation12 + $0x908] sm:$0xff] }
 0x308   :  { %5878 = vmatprep.subr.bf16.mxu0 %v7115_v12  ;;  %v2909_v12 = vld [vmem:[#allocation12 + $0x928] sm:$0xff] }
 0x309   :  { %v2536_v28 = vpop.f32.mrf.mxu0 }
 0x30a   :  { %v2537_v31 = vadd.f32 %v2536_v28, %v963_v15  ;;  %v2577_v32 = vpop.f32.mrf.mxu1  ;;  %v2901_v15 = vld [vmem:[#allocation12 + $0x8e8] sm:$0xff] }
 0x30b   :  { %5879 = vmatpush2.bf16.msra.mxu0 %v7114_v25  ;;  %v2538_v18 = vpop.f32.mrf.mxu0  ;;  %v7194_v25 = vcombine.low %v2777_v8, %v2781_v9  ;;  %v7315_v28 = vcombine.high %v2897_v24, %v2901_v15  ;;  %v7275_v8 = vcombine.high %v2857_v3, %v2861_v41 }
 0x30c   :  { %v2578_v34 = vadd.f32 %v2577_v32, %v2537_v31  ;;  %v2539_v35 = vadd.f32 %v2538_v18, %v967_v26  ;;  %v2579_v13 = vpop.f32.mrf.mxu1  ;;  %5880 = vmatprep.subr.bf16.mxu0 %v7107_v27  ;;  %v7322_v26 = vcombine.low %v2905_v10, %v2909_v12  ;;  %v7187_v27 = vcombine.high %v2769_v21, %v2773_v23  ;;  %v2889_v31 = vld [vmem:[#allocation12 + $0x888] sm:$0xff] }
 0x30d   :  { %v2540_v37 = vpop.f32.mrf.mxu0  ;;  %v2893_v32 = vld [vmem:[#allocation12 + $0x8a8] sm:$0xff]  ;;  %v7186_v18 = vcombine.low %v2769_v21, %v2773_v23 }
 0x30e   :  { %vm2590_vm10 = vcmp.gt.f32.partialorder %v2578_v34, 0.0  ;;  %v2598_v40 = vmul.f32 0.2, %v2578_v34  ;;  %v2580_v42 = vadd.f32 %v2579_v13, %v2539_v35  ;;  %v2581_v43 = vpop.f32.mrf.mxu1  ;;  %v7307_v35 = vcombine.high %v2889_v31, %v2893_v32  ;;  %v2753_v13 = vld [vmem:[#allocation12 + $0x448] sm:$0xff] }
 0x30f   :  { %5881 = vmatpush2.bf16.msra.mxu0 %v7106_v33  ;;  %v2541_v45 = vpop.f32.mrf.mxu0  ;;  %v7314_v33 = vcombine.low %v2897_v24, %v2901_v15  ;;  %v2881_v37 = vld [vmem:[#allocation12 + $0x848] sm:$0xff] }
 0x310   :  { %vm2591_vm11 = vcmp.gt.f32.partialorder %v2580_v42, 0.0  ;;  %v2599_v46 = vmul.f32 0.2, %v2580_v42  ;;  %v2582_v47 = vpop.f32.mrf.mxu1  ;;  %5882 = vmatprep.subr.bf16.mxu0 %v7099_v36  ;;  %v2606_v54 = vsel %vm2590_vm10, %v2578_v34, %v2598_v40  ;;  %v7179_v34 = vcombine.high %v2761_v29, %v2765_v30  ;;  %v2757_v36 = vld [vmem:[#allocation12 + $0x468] sm:$0xff] }
 0x311   :  { %v8212_v0 = vpack.c.bf16 %v2606_v54, %v2606_v54  ;;  %v7306_v40 = vcombine.low %v2889_v31, %v2893_v32  ;;  %v7299_v43 = vcombine.high %v2881_v37, %v2885_v38  ;;  %v2745_v45 = vld [vmem:[#allocation12 + $0x408] sm:$0xff]  ;;  %v7298_v54 = vcombine.low %v2881_v37, %v2885_v38 }
 0x312   :  { %v2607_v57 = vsel %vm2591_vm11, %v2580_v42, %v2599_v46  ;;  %v7171_v42 = vcombine.high %v2753_v13, %v2757_v36  ;;  %v2873_v46 = vld [vmem:[#allocation12 + $0x808] sm:$0xff] }
 0x313   :  { %v8210_v48 = vpack.c.bf16 %v2607_v57, %v2607_v57  ;;  %5883 = vmatpush2.bf16.msra.mxu0 %v7098_v44  ;;  %v2749_v44 = vld [vmem:[#allocation12 + $0x428] sm:$0xff] }
 0x314   :  { %5934 = vmatprep.subr.bf16.mxu0 %v7347_v49  ;;  %v2877_v47 = vld [vmem:[#allocation12 + $0x828] sm:$0xff]  ;;  %v7170_v49 = vcombine.low %v2753_v13, %v2757_v36  ;;  %v7163_v55 = vcombine.high %v2745_v45, %v2749_v44  ;;  %v7162_v1 = vcombine.low %v2745_v45, %v2749_v44 }
 0x315   :  { %5843 = vmatprep.mubr.bf16.mxu1 %v8210_v48  ;;  %v7291_v57 = vcombine.high %v2873_v46, %v2877_v47  ;;  %v2841_v24 = vld [vmem:[#allocation12 + $0x708] sm:$0xff] }
 0x316   :  { %5885 = vmatmul.mubr.bf16.vlgmr.msra.gmra.mxu0 %v8167_v11  ;;  %5844 = vmatmul.mubr.bf16.vlgmr.msra.gmra.mxu1 %v8212_v0  ;;  %v2845_v15 = vld [vmem:[#allocation12 + $0x728] sm:$0xff] }
 0x317   :  { %5894 = vmatpush1.bf16.msra.mxu1 %v7218_v62  ;;  %5935 = vmatpush1.bf16.msra.mxu0 %v7346_v63  ;;  %v7323_v62 = vcombine.high %v2905_v10, %v2909_v12  ;;  %v2997_v63 = vld [vmem:[#allocation12 + $0xbe8] sm:$0xff]  ;;  %v7259_v29 = vcombine.high %v2841_v24, %v2845_v15 }
 0x318   :  { %5966 = vmatprep.mubr.bf16.mxu0 %v8199_v19  ;;  %5925 = vmatprep.mubr.bf16.mxu1 %v8173_v52  ;;  %v7411_v2 = vcombine.high %v2993_v61, %v2997_v63  ;;  %v2849_v10 = vld [vmem:[#allocation12 + $0x748] sm:$0xff] }
 0x319   :  { %5895 = vmatprep.subr.bf16.mxu1 %v7211_v50  ;;  %5936 = vmatprep.subr.bf16.mxu0 %v7339_v53  ;;  %v7290_v50 = vcombine.low %v2873_v46, %v2877_v47  ;;  %v7283_v53 = vcombine.high %v2865_v58, %v2869_v60  ;;  %v2853_v12 = vld [vmem:[#allocation12 + $0x768] sm:$0xff] }
 0x31a   :  { %v7267_v21 = vcombine.high %v2849_v10, %v2853_v12  ;;  %v2833_v31 = vld [vmem:[#allocation12 + $0x6c8] sm:$0xff] }
 0x31b   :  { %5896 = vmatpush1.bf16.msra.mxu1 %v7210_v4  ;;  %5937 = vmatpush1.bf16.msra.mxu0 %v7338_v5  ;;  %v2985_v4 = vld [vmem:[#allocation12 + $0xb88] sm:$0xff] }
 0x31c   :  { %5897 = vmatprep.subr.bf16.mxu1 %v7203_v6  ;;  %5938 = vmatprep.subr.bf16.mxu0 %v7331_v7  ;;  %v2989_v5 = vld [vmem:[#allocation12 + $0xba8] sm:$0xff]  ;;  %v7282_v6 = vcombine.low %v2865_v58, %v2869_v60  ;;  %v7410_v7 = vcombine.low %v2993_v61, %v2997_v63 }
 0x31d   :  { %v7403_v9 = vcombine.high %v2985_v4, %v2989_v5  ;;  %v2837_v32 = vld [vmem:[#allocation12 + $0x6e8] sm:$0xff] }
 0x31e   :  { %v7251_v13 = vcombine.high %v2833_v31, %v2837_v32  ;;  %v2825_v37 = vld [vmem:[#allocation12 + $0x688] sm:$0xff] }
 0x31f   :  { %5898 = vmatpush1.bf16.msra.mxu1 %v7202_v16  ;;  %5939 = vmatpush1.bf16.msra.mxu0 %v7330_v59  ;;  %v2977_v16 = vld [vmem:[#allocation12 + $0xb48] sm:$0xff] }
 0x320   :  { %5899 = vmatprep.subr.bf16.mxu1 %v7195_v51  ;;  %5940 = vmatprep.subr.bf16.mxu0 %v7323_v62  ;;  %v2981_v59 = vld [vmem:[#allocation12 + $0xb68] sm:$0xff]  ;;  %v7274_v51 = vcombine.low %v2857_v3, %v2861_v41  ;;  %v7402_v62 = vcombine.low %v2985_v4, %v2989_v5 }
 0x321   :  { %v7395_v23 = vcombine.high %v2977_v16, %v2981_v59  ;;  %v2829_v38 = vld [vmem:[#allocation12 + $0x6a8] sm:$0xff] }
 0x322   :  { %v7243_v45 = vcombine.high %v2825_v37, %v2829_v38  ;;  %v2817_v46 = vld [vmem:[#allocation12 + $0x648] sm:$0xff] }
 0x323   :  { %5900 = vmatpush1.bf16.msra.mxu1 %v7194_v25  ;;  %5941 = vmatpush1.bf16.msra.mxu0 %v7322_v26  ;;  %v2969_v25 = vld [vmem:[#allocation12 + $0xb08] sm:$0xff] }
 0x324   :  { %5901 = vmatprep.subr.bf16.mxu1 %v7187_v27  ;;  %5942 = vmatprep.subr.bf16.mxu0 %v7315_v28  ;;  %v2973_v26 = vld [vmem:[#allocation12 + $0xb28] sm:$0xff]  ;;  %v7266_v27 = vcombine.low %v2849_v10, %v2853_v12  ;;  %v7394_v28 = vcombine.low %v2977_v16, %v2981_v59  ;;  %v2678_v10 = vld [vmem:[#allocation12 + $0x1f0] sm:$0xff] }
 0x325   :  { %v7387_v30 = vcombine.high %v2969_v25, %v2973_v26  ;;  %v2821_v47 = vld [vmem:[#allocation12 + $0x668] sm:$0xff] }
 0x326   :  { %v7235_v58 = vcombine.high %v2817_v46, %v2821_v47  ;;  %v2809_v61 = vld [vmem:[#allocation12 + $0x608] sm:$0xff]  ;;  %v7234_v3 = vcombine.low %v2817_v46, %v2821_v47 }
 0x327   :  { %5902 = vmatpush1.bf16.msra.mxu1 %v7186_v18  ;;  %5943 = vmatpush1.bf16.msra.mxu0 %v7314_v33  ;;  %v2961_v18 = vld [vmem:[#allocation12 + $0xac8] sm:$0xff] }
 0x328   :  { %5903 = vmatprep.subr.bf16.mxu1 %v7179_v34  ;;  %5944 = vmatprep.subr.bf16.mxu0 %v7307_v35  ;;  %v2965_v33 = vld [vmem:[#allocation12 + $0xae8] sm:$0xff]  ;;  %v7258_v34 = vcombine.low %v2841_v24, %v2845_v15  ;;  %v7386_v35 = vcombine.low %v2969_v25, %v2973_v26  ;;  %v2666_v24 = vld [vmem:[#allocation12 + $0x190] sm:$0xff] }
 0x329   :  { %v7379_v36 = vcombine.high %v2961_v18, %v2965_v33  ;;  %v2670_v15 = vld [vmem:[#allocation12 + $0x1b0] sm:$0xff] }
 0x32b   :  { %5904 = vmatpush1.bf16.msra.mxu1 %v7178_v39  ;;  %5945 = vmatpush1.bf16.msra.mxu0 %v7306_v40  ;;  %v2953_v39 = vld [vmem:[#allocation12 + $0xa88] sm:$0xff] }
 0x32c   :  { %5905 = vmatprep.subr.bf16.mxu1 %v7171_v42  ;;  %5946 = vmatprep.subr.bf16.mxu0 %v7299_v43  ;;  %v2957_v40 = vld [vmem:[#allocation12 + $0xaa8] sm:$0xff]  ;;  %v7250_v42 = vcombine.low %v2833_v31, %v2837_v32  ;;  %v7378_v43 = vcombine.low %v2961_v18, %v2965_v33  ;;  %v2658_v32 = vld [vmem:[#allocation12 + $0x150] sm:$0xff] }
 0x32d   :  { %v7371_v44 = vcombine.high %v2953_v39, %v2957_v40  ;;  %v2662_v18 = vld [vmem:[#allocation12 + $0x170] sm:$0xff] }
 0x32e   :  { %v7076_v47 = vcombine.low %v2658_v32, %v2662_v18 }
 0x32f   :  { %5906 = vmatpush1.bf16.msra.mxu1 %v7170_v49  ;;  %5947 = vmatpush1.bf16.msra.mxu0 %v7298_v54  ;;  %v2945_v49 = vld [vmem:[#allocation12 + $0xa48] sm:$0xff] }
 0x330   :  { %5907 = vmatprep.subr.bf16.mxu1 %v7163_v55  ;;  %5948 = vmatprep.subr.bf16.mxu0 %v7291_v57  ;;  %v2949_v54 = vld [vmem:[#allocation12 + $0xa68] sm:$0xff]  ;;  %v7242_v55 = vcombine.low %v2825_v37, %v2829_v38  ;;  %v7370_v57 = vcombine.low %v2953_v39, %v2957_v40  ;;  %v7077_v38 = vcombine.high %v2658_v32, %v2662_v18  ;;  %v2742_v32 = vld [vmem:[#allocation12 + $0x3f0] sm:$0xff] }
 0x331   :  { %v7363_v60 = vcombine.high %v2945_v49, %v2949_v54  ;;  %v7362_v41 = vcombine.low %v2945_v49, %v2949_v54  ;;  %v3033_v39 = vld [vmem:[#allocation12 + $0xd08] sm:$0xff] }
 0x332   :  { %v3037_v40 = vld [vmem:[#allocation12 + $0xd28] sm:$0xff] }
 0x333   :  { %5908 = vmatpush1.bf16.msra.mxu1 %v7162_v1  ;;  %5949 = vmatpush1.bf16.msra.mxu0 %v7290_v50  ;;  %v2813_v1 = vld [vmem:[#allocation12 + $0x628] sm:$0xff]  ;;  %v7451_v49 = vcombine.high %v3033_v39, %v3037_v40 }
 0x334   :  { %5909 = vmatprep.subr.bf16.mxu1 %v7283_v53  ;;  %5950 = vmatprep.subr.bf16.mxu0 %v7411_v2  ;;  %v2937_v50 = vld [vmem:[#allocation12 + $0xa08] sm:$0xff]  ;;  %v7227_v4 = vcombine.high %v2809_v61, %v2813_v1  ;;  %v7226_v16 = vcombine.low %v2809_v61, %v2813_v1  ;;  %v7450_v61 = vcombine.low %v3033_v39, %v3037_v40  ;;  %v2730_v39 = vld [vmem:[#allocation12 + $0x390] sm:$0xff] }
 0x335   :  { %v2941_v53 = vld [vmem:[#allocation12 + $0xa28] sm:$0xff]  ;;  %v2734_v40 = vld [vmem:[#allocation12 + $0x3b0] sm:$0xff] }
 0x336   :  { %v7355_v5 = vcombine.high %v2937_v50, %v2941_v53  ;;  %v7354_v59 = vcombine.low %v2937_v50, %v2941_v53  ;;  %v3017_v53 = vld [vmem:[#allocation12 + $0xc88] sm:$0xff] }
 0x337   :  { %5910 = vmatpush2.bf16.msra.mxu1 %v7282_v6  ;;  %5951 = vmatpush2.bf16.msra.mxu0 %v7410_v7  ;;  %v3057_v6 = vld [vmem:[#allocation12 + $0xdc8] sm:$0xff] }
 0x338   :  { %5911 = vmatprep.subr.bf16.mxu1 %v7275_v8  ;;  %5952 = vmatprep.subr.bf16.mxu0 %v7403_v9  ;;  %v3061_v8 = vld [vmem:[#allocation12 + $0xde8] sm:$0xff]  ;;  %v2674_v9 = vld [vmem:[#allocation12 + $0x1d0] sm:$0xff] }
 0x339   :  { %v7474_v25 = vcombine.low %v3057_v6, %v3061_v8  ;;  %v7092_v26 = vcombine.low %v2674_v9, %v2678_v10 }
 0x33b   :  { %5912 = vmatpush2.bf16.msra.mxu1 %v7274_v51  ;;  %5953 = vmatpush2.bf16.msra.mxu0 %v7402_v62  ;;  %v7475_v51 = vcombine.high %v3057_v6, %v3061_v8  ;;  %v7093_v62 = vcombine.high %v2674_v9, %v2678_v10  ;;  %v3009_v8 = vld [vmem:[#allocation12 + $0xc48] sm:$0xff]  ;;  %v2626_v10 = vld [vmem:[#allocation12 + $0x50] sm:$0xff] }
 0x33c   :  { %5913 = vmatprep.subr.bf16.mxu1 %v7267_v21  ;;  %5954 = vmatprep.subr.bf16.mxu0 %v7395_v23  ;;  %v3049_v21 = vld [vmem:[#allocation12 + $0xd88] sm:$0xff] }
 0x33d   :  { %v3053_v23 = vld [vmem:[#allocation12 + $0xda8] sm:$0xff] }
 0x33e   :  { %v3013_v9 = vld [vmem:[#allocation12 + $0xc68] sm:$0xff] }
 0x33f   :  { %5914 = vmatpush2.bf16.msra.mxu1 %v7266_v27  ;;  %5955 = vmatpush2.bf16.msra.mxu0 %v7394_v28  ;;  %v7467_v27 = vcombine.high %v3049_v21, %v3053_v23  ;;  %v7085_v28 = vcombine.high %v2666_v24, %v2670_v15 }
 0x340   :  { %5915 = vmatprep.subr.bf16.mxu1 %v7259_v29  ;;  %5956 = vmatprep.subr.bf16.mxu0 %v7387_v30  ;;  %v3041_v29 = vld [vmem:[#allocation12 + $0xd48] sm:$0xff] }
 0x341   :  { %v3045_v30 = vld [vmem:[#allocation12 + $0xd68] sm:$0xff] }
 0x343   :  { %5916 = vmatpush2.bf16.msra.mxu1 %v7258_v34  ;;  %5957 = vmatpush2.bf16.msra.mxu0 %v7386_v35  ;;  %v7466_v34 = vcombine.low %v3049_v21, %v3053_v23  ;;  %v3001_v21 = vld [vmem:[#allocation12 + $0xc08] sm:$0xff] }
 0x344   :  { %5917 = vmatprep.subr.bf16.mxu1 %v7251_v13  ;;  %5958 = vmatprep.subr.bf16.mxu0 %v7379_v36  ;;  %v7084_v13 = vcombine.low %v2666_v24, %v2670_v15  ;;  %v7459_v36 = vcombine.high %v3041_v29, %v3045_v30  ;;  %v3005_v23 = vld [vmem:[#allocation12 + $0xc28] sm:$0xff]  ;;  %v2618_v24 = vld [vmem:[#allocation12 + $0x10] sm:$0xff] }
 0x345   :  { %v2622_v15 = vld [vmem:[#allocation12 + $0x30] sm:$0xff]  ;;  %v7418_v18 = vcombine.low %v3001_v21, %v3005_v23 }
 0x347   :  { %5918 = vmatpush2.bf16.msra.mxu1 %v7250_v42  ;;  %5959 = vmatpush2.bf16.msra.mxu0 %v7378_v43  ;;  %v2650_v43 = vld [vmem:[#allocation12 + $0x110] sm:$0xff] }
 0x348   :  { %5919 = vmatprep.subr.bf16.mxu1 %v7243_v45  ;;  %5960 = vmatprep.subr.bf16.mxu0 %v7371_v44  ;;  %v2654_v45 = vld [vmem:[#allocation12 + $0x130] sm:$0xff]  ;;  %v7458_v44 = vcombine.low %v3041_v29, %v3045_v30  ;;  %v3121_v29 = vld [vmem:[#allocation12 + $0xfc8] sm:$0xff] }
 0x349   :  { %v5722_v63 = vpop.f32.mrf.mxu0  ;;  %v7069_v54 = vcombine.high %v2650_v43, %v2654_v45  ;;  %v3125_v30 = vld [vmem:[#allocation12 + $0xfe8] sm:$0xff] }
 0x34b   :  { %5920 = vmatpush2.bf16.msra.mxu1 %v7242_v55  ;;  %5961 = vmatpush2.bf16.msra.mxu0 %v7370_v57  ;;  %v5724_v2 = vpop.f32.mrf.mxu0  ;;  %v3025_v55 = vld [vmem:[#allocation12 + $0xcc8] sm:$0xff] }
 0x34c   :  { %5921 = vmatprep.subr.bf16.mxu1 %v7235_v58  ;;  %5962 = vmatprep.subr.bf16.mxu0 %v7363_v60  ;;  %v3029_v57 = vld [vmem:[#allocation12 + $0xce8] sm:$0xff]  ;;  %v2642_v58 = vld [vmem:[#allocation12 + $0xd0] sm:$0xff] }
 0x34d   :  { %v5726_v7 = vpop.f32.mrf.mxu0  ;;  %v2646_v60 = vld [vmem:[#allocation12 + $0xf0] sm:$0xff]  ;;  %v7443_v1 = vcombine.high %v3025_v55, %v3029_v57 }
 0x34e   :  { %v7061_v50 = vcombine.high %v2642_v58, %v2646_v60 }
 0x34f   :  { %5922 = vmatpush2.bf16.msra.mxu1 %v7234_v3  ;;  %5963 = vmatpush2.bf16.msra.mxu0 %v7362_v41  ;;  %v5727_v12 = vpop.f32.mrf.mxu0  ;;  %v2634_v3 = vld [vmem:[#allocation12 + $0x90] sm:$0xff] }
 0x350   :  { %5923 = vmatprep.subr.bf16.mxu1 %v7227_v4  ;;  %5964 = vmatprep.subr.bf16.mxu0 %v7355_v5  ;;  %v2638_v41 = vld [vmem:[#allocation12 + $0xb0] sm:$0xff]  ;;  %v7442_v4 = vcombine.low %v3025_v55, %v3029_v57  ;;  %v7060_v5 = vcombine.low %v2642_v58, %v2646_v60  ;;  %v7148_v57 = vcombine.low %v2730_v39, %v2734_v40 }
 0x351   :  { %v7053_v7 = vcombine.high %v2634_v3, %v2638_v41  ;;  %v2630_v12 = vld [vmem:[#allocation12 + $0x70] sm:$0xff] }
 0x353   :  { %5924 = vmatpush2.bf16.msra.mxu1 %v7226_v16  ;;  %5965 = vmatpush2.bf16.msra.mxu0 %v7354_v59  ;;  %v7052_v59 = vcombine.low %v2634_v3, %v2638_v41 }
 0x354   :  { %5975 = vmatprep.subr.bf16.mxu1 %v7475_v51  ;;  %6016 = vmatprep.subr.bf16.mxu0 %v7093_v62  ;;  %v7427_v51 = vcombine.high %v3009_v8, %v3013_v9  ;;  %v7045_v62 = vcombine.high %v2626_v10, %v2630_v12 }
 0x356   :  { %5926 = vmatmul.mubr.bf16.vlgmr.msra.gmra.mxu1 %v8177_v56  ;;  %5967 = vmatmul.mubr.bf16.vlgmr.msra.gmra.mxu0 %v8203_v22  ;;  %v5763_v31 = vpop.f32.mrf.mxu1 }
 0x357   :  { %v8224_v33 = vadd.f32 %v5763_v31, %v5722_v63  ;;  %5976 = vmatpush1.bf16.msra.mxu1 %v7474_v25  ;;  %6007 = vmatprep.mubr.bf16.mxu1 %v8210_v48  ;;  %v7068_v63 = vcombine.low %v2650_v43, %v2654_v45  ;;  %v7426_v25 = vcombine.low %v3009_v8, %v3013_v9  ;;  %v2738_v31 = vld [vmem:[#allocation12 + $0x3d0] sm:$0xff] }
 0x358   :  { %6017 = vmatpush1.bf16.msra.mxu0 %v7092_v26  ;;  %6048 = vmatprep.mubr.bf16.mxu0 %v8151_v20  ;;  %v5765_v35 = vpop.f32.mrf.mxu1  ;;  %v7044_v26 = vcombine.low %v2626_v10, %v2630_v12  ;;  %v7156_v43 = vcombine.low %v2738_v31, %v2742_v32 }
 0x359   :  { %v8228_v37 = vadd.f32 %v5765_v35, %v5724_v2  ;;  %5977 = vmatprep.subr.bf16.mxu1 %v7467_v27  ;;  %6018 = vmatprep.subr.bf16.mxu0 %v7085_v28  ;;  %v3021_v2 = vld [vmem:[#allocation12 + $0xca8] sm:$0xff]  ;;  %v7419_v27 = vcombine.high %v3001_v21, %v3005_v23  ;;  %v7037_v28 = vcombine.high %v2618_v24, %v2622_v15 }
 0x35a   :  { %v5767_v42 = vpop.f32.mrf.mxu1  ;;  %v7435_v6 = vcombine.high %v3017_v53, %v3021_v2  ;;  %v7434_v16 = vcombine.low %v3017_v53, %v3021_v2  ;;  %v7539_v35 = vcombine.high %v3121_v29, %v3125_v30 }
 0x35b   :  { %5978 = vmatpush1.bf16.msra.mxu1 %v7466_v34  ;;  %v7036_v34 = vcombine.low %v2618_v24, %v2622_v15  ;;  %v7538_v42 = vcombine.low %v3121_v29, %v3125_v30 }
 0x35c   :  { %6019 = vmatpush1.bf16.msra.mxu0 %v7084_v13  ;;  %v5768_v46 = vpop.f32.mrf.mxu1  ;;  %5979 = vmatprep.subr.bf16.mxu1 %v7459_v36  ;;  %v7157_v13 = vcombine.high %v2738_v31, %v2742_v32  ;;  %v3113_v36 = vld [vmem:[#allocation12 + $0xf88] sm:$0xff] }
 0x35d   :  { %6020 = vmatprep.subr.bf16.mxu0 %v7077_v38  ;;  %v3117_v38 = vld [vmem:[#allocation12 + $0xfa8] sm:$0xff] }
 0x35e   :  { %v7531_v45 = vcombine.high %v3113_v36, %v3117_v38  ;;  %v3105_v46 = vld [vmem:[#allocation12 + $0xf48] sm:$0xff]  ;;  %v7530_v55 = vcombine.low %v3113_v36, %v3117_v38 }
 0x35f   :  { %5980 = vmatpush1.bf16.msra.mxu1 %v7458_v44  ;;  %v7149_v44 = vcombine.high %v2730_v39, %v2734_v40 }
 0x360   :  { %6021 = vmatpush1.bf16.msra.mxu0 %v7076_v47  ;;  %5981 = vmatprep.subr.bf16.mxu1 %v7451_v49  ;;  %v3109_v47 = vld [vmem:[#allocation12 + $0xf68] sm:$0xff]  ;;  %v2722_v49 = vld [vmem:[#allocation12 + $0x350] sm:$0xff] }
 0x361   :  { %6022 = vmatprep.subr.bf16.mxu0 %v7069_v54  ;;  %v2726_v54 = vld [vmem:[#allocation12 + $0x370] sm:$0xff]  ;;  %v7523_v58 = vcombine.high %v3105_v46, %v3109_v47  ;;  %v7522_v53 = vcombine.low %v3105_v46, %v3109_v47 }
 0x362   :  { %v7141_v60 = vcombine.high %v2722_v49, %v2726_v54  ;;  %v7140_v2 = vcombine.low %v2722_v49, %v2726_v54 }
 0x363   :  { %5982 = vmatpush1.bf16.msra.mxu1 %v7450_v61  ;;  %v3097_v61 = vld [vmem:[#allocation12 + $0xf08] sm:$0xff] }
 0x364   :  { %6023 = vmatpush1.bf16.msra.mxu0 %v7068_v63  ;;  %5983 = vmatprep.subr.bf16.mxu1 %v7443_v1  ;;  %v3101_v63 = vld [vmem:[#allocation12 + $0xf28] sm:$0xff]  ;;  %v2714_v1 = vld [vmem:[#allocation12 + $0x310] sm:$0xff] }
 0x365   :  { %6024 = vmatprep.subr.bf16.mxu0 %v7061_v50  ;;  %v2718_v50 = vld [vmem:[#allocation12 + $0x330] sm:$0xff]  ;;  %v7515_v3 = vcombine.high %v3097_v61, %v3101_v63  ;;  %v7514_v8 = vcombine.low %v3097_v61, %v3101_v63 }
 0x366   :  { %v7133_v41 = vcombine.high %v2714_v1, %v2718_v50  ;;  %v7132_v9 = vcombine.low %v2714_v1, %v2718_v50  ;;  %v2926_v61 = vld [vmem:[#allocation12 + $0x9b0] sm:$0xff] }
 0x367   :  { %5984 = vmatpush1.bf16.msra.mxu1 %v7442_v4  ;;  %v3089_v4 = vld [vmem:[#allocation12 + $0xec8] sm:$0xff]  ;;  %v2786_v50 = vld [vmem:[#allocation12 + $0x550] sm:$0xff] }
 0x368   :  { %6025 = vmatpush1.bf16.msra.mxu0 %v7060_v5  ;;  %5985 = vmatprep.subr.bf16.mxu1 %v7435_v6  ;;  %v3093_v5 = vld [vmem:[#allocation12 + $0xee8] sm:$0xff]  ;;  %v2706_v6 = vld [vmem:[#allocation12 + $0x2d0] sm:$0xff] }
 0x369   :  { %6026 = vmatprep.subr.bf16.mxu0 %v7053_v7  ;;  %v2710_v7 = vld [vmem:[#allocation12 + $0x2f0] sm:$0xff]  ;;  %v7507_v10 = vcombine.high %v3089_v4, %v3093_v5  ;;  %v7506_v21 = vcombine.low %v3089_v4, %v3093_v5 }
 0x36a   :  { %v7125_v12 = vcombine.high %v2706_v6, %v2710_v7  ;;  %v7124_v23 = vcombine.low %v2706_v6, %v2710_v7  ;;  %v2918_v4 = vld [vmem:[#allocation12 + $0x970] sm:$0xff] }
 0x36b   :  { %5986 = vmatpush1.bf16.msra.mxu1 %v7434_v16  ;;  %v3081_v16 = vld [vmem:[#allocation12 + $0xe88] sm:$0xff] }
 0x36c   :  { %6027 = vmatpush1.bf16.msra.mxu0 %v7052_v59  ;;  %5987 = vmatprep.subr.bf16.mxu1 %v7427_v51  ;;  %v3085_v59 = vld [vmem:[#allocation12 + $0xea8] sm:$0xff]  ;;  %v2698_v51 = vld [vmem:[#allocation12 + $0x290] sm:$0xff] }
 0x36d   :  { %6028 = vmatprep.subr.bf16.mxu0 %v7045_v62  ;;  %v2702_v62 = vld [vmem:[#allocation12 + $0x2b0] sm:$0xff]  ;;  %v7499_v24 = vcombine.high %v3081_v16, %v3085_v59  ;;  %v7498_v29 = vcombine.low %v3081_v16, %v3085_v59 }
 0x36e   :  { %v7117_v15 = vcombine.high %v2698_v51, %v2702_v62  ;;  %v7116_v30 = vcombine.low %v2698_v51, %v2702_v62  ;;  %v2778_v16 = vld [vmem:[#allocation12 + $0x510] sm:$0xff] }
 0x36f   :  { %5988 = vmatpush1.bf16.msra.mxu1 %v7426_v25  ;;  %v3073_v25 = vld [vmem:[#allocation12 + $0xe48] sm:$0xff]  ;;  %v2782_v59 = vld [vmem:[#allocation12 + $0x530] sm:$0xff] }
 0x370   :  { %6029 = vmatpush1.bf16.msra.mxu0 %v7044_v26  ;;  %5989 = vmatprep.subr.bf16.mxu1 %v7419_v27  ;;  %v3077_v26 = vld [vmem:[#allocation12 + $0xe68] sm:$0xff]  ;;  %v2690_v27 = vld [vmem:[#allocation12 + $0x250] sm:$0xff] }
 0x371   :  { %6030 = vmatprep.subr.bf16.mxu0 %v7037_v28  ;;  %v2694_v28 = vld [vmem:[#allocation12 + $0x270] sm:$0xff]  ;;  %v7491_v31 = vcombine.high %v3073_v25, %v3077_v26  ;;  %v7490_v36 = vcombine.low %v3073_v25, %v3077_v26 }
 0x372   :  { %v7109_v32 = vcombine.high %v2690_v27, %v2694_v28  ;;  %v7108_v38 = vcombine.low %v2690_v27, %v2694_v28  ;;  %v2906_v51 = vld [vmem:[#allocation12 + $0x910] sm:$0xff] }
 0x373   :  { %5990 = vmatpush1.bf16.msra.mxu1 %v7418_v18  ;;  %v3065_v18 = vld [vmem:[#allocation12 + $0xe08] sm:$0xff]  ;;  %v2910_v62 = vld [vmem:[#allocation12 + $0x930] sm:$0xff] }
 0x374   :  { %6031 = vmatpush1.bf16.msra.mxu0 %v7036_v34  ;;  %5991 = vmatprep.subr.bf16.mxu1 %v7539_v35  ;;  %v3069_v34 = vld [vmem:[#allocation12 + $0xe28] sm:$0xff]  ;;  %v2682_v35 = vld [vmem:[#allocation12 + $0x210] sm:$0xff]  ;;  %v7325_v25 = vcombine.high %v2906_v51, %v2910_v62 }
 0x375   :  { %6032 = vmatprep.subr.bf16.mxu0 %v7157_v13  ;;  %v2686_v13 = vld [vmem:[#allocation12 + $0x230] sm:$0xff]  ;;  %v7483_v39 = vcombine.high %v3065_v18, %v3069_v34  ;;  %v7482_v46 = vcombine.low %v3065_v18, %v3069_v34 }
 0x376   :  { %v7101_v40 = vcombine.high %v2682_v35, %v2686_v13  ;;  %v7100_v47 = vcombine.low %v2682_v35, %v2686_v13  ;;  %v2770_v26 = vld [vmem:[#allocation12 + $0x4d0] sm:$0xff] }
 0x377   :  { %5992 = vmatpush2.bf16.msra.mxu1 %v7538_v42  ;;  %v2802_v42 = vld [vmem:[#allocation12 + $0x5d0] sm:$0xff] }
 0x378   :  { %6033 = vmatpush2.bf16.msra.mxu0 %v7156_v43  ;;  %5993 = vmatprep.subr.bf16.mxu1 %v7531_v45  ;;  %v2806_v43 = vld [vmem:[#allocation12 + $0x5f0] sm:$0xff] }
 0x379   :  { %6034 = vmatprep.subr.bf16.mxu0 %v7149_v44  ;;  %v2930_v45 = vld [vmem:[#allocation12 + $0x9d0] sm:$0xff]  ;;  %v7221_v49 = vcombine.high %v2802_v42, %v2806_v43 }
 0x37a   :  { %v2934_v44 = vld [vmem:[#allocation12 + $0x9f0] sm:$0xff] }
 0x37b   :  { %5994 = vmatpush2.bf16.msra.mxu1 %v7530_v55  ;;  %v7349_v54 = vcombine.high %v2930_v45, %v2934_v44  ;;  %v2794_v55 = vld [vmem:[#allocation12 + $0x590] sm:$0xff]  ;;  %v7348_v63 = vcombine.low %v2930_v45, %v2934_v44 }
 0x37c   :  { %6035 = vmatpush2.bf16.msra.mxu0 %v7148_v57  ;;  %5995 = vmatprep.subr.bf16.mxu1 %v7523_v58  ;;  %v2798_v57 = vld [vmem:[#allocation12 + $0x5b0] sm:$0xff]  ;;  %v7220_v58 = vcombine.low %v2802_v42, %v2806_v43 }
 0x37d   :  { %6036 = vmatprep.subr.bf16.mxu0 %v7141_v60  ;;  %v2922_v60 = vld [vmem:[#allocation12 + $0x990] sm:$0xff]  ;;  %v7213_v1 = vcombine.high %v2794_v55, %v2798_v57  ;;  %v7212_v6 = vcombine.low %v2794_v55, %v2798_v57 }
 0x37e   :  { %v2898_v27 = vld [vmem:[#allocation12 + $0x8d0] sm:$0xff] }
 0x37f   :  { %5996 = vmatpush2.bf16.msra.mxu1 %v7522_v53  ;;  %v2790_v53 = vld [vmem:[#allocation12 + $0x570] sm:$0xff] }
 0x380   :  { %6037 = vmatpush2.bf16.msra.mxu0 %v7140_v2  ;;  %5997 = vmatprep.subr.bf16.mxu1 %v7515_v3  ;;  %v7341_v3 = vcombine.high %v2922_v60, %v2926_v61  ;;  %v2902_v28 = vld [vmem:[#allocation12 + $0x8f0] sm:$0xff] }
 0x381   :  { %6038 = vmatprep.subr.bf16.mxu0 %v7133_v41  ;;  %v2914_v41 = vld [vmem:[#allocation12 + $0x950] sm:$0xff] }
 0x382   :  { %v2762_v18 = vld [vmem:[#allocation12 + $0x490] sm:$0xff] }
 0x383   :  { %5998 = vmatpush2.bf16.msra.mxu1 %v7514_v8  ;;  %v7340_v8 = vcombine.low %v2922_v60, %v2926_v61  ;;  %v2766_v34 = vld [vmem:[#allocation12 + $0x4b0] sm:$0xff] }
 0x384   :  { %6039 = vmatpush2.bf16.msra.mxu0 %v7132_v9  ;;  %5999 = vmatprep.subr.bf16.mxu1 %v7507_v10  ;;  %v7205_v9 = vcombine.high %v2786_v50, %v2790_v53  ;;  %v2890_v35 = vld [vmem:[#allocation12 + $0x890] sm:$0xff] }
 0x385   :  { %6040 = vmatprep.subr.bf16.mxu0 %v7125_v12  ;;  %v7333_v12 = vcombine.high %v2914_v41, %v2918_v4  ;;  %v2894_v13 = vld [vmem:[#allocation12 + $0x8b0] sm:$0xff] }
 0x386   :  { %v2754_v42 = vld [vmem:[#allocation12 + $0x450] sm:$0xff] }
 0x387   :  { %6000 = vmatpush2.bf16.msra.mxu1 %v7506_v21  ;;  %v7204_v21 = vcombine.low %v2786_v50, %v2790_v53  ;;  %v2758_v43 = vld [vmem:[#allocation12 + $0x470] sm:$0xff] }
 0x388   :  { %6041 = vmatpush2.bf16.msra.mxu0 %v7124_v23  ;;  %6001 = vmatprep.subr.bf16.mxu1 %v7499_v24  ;;  %v7332_v24 = vcombine.low %v2914_v41, %v2918_v4  ;;  %v2882_v45 = vld [vmem:[#allocation12 + $0x850] sm:$0xff]  ;;  %v7172_v61 = vcombine.low %v2754_v42, %v2758_v43 }
 0x389   :  { %6042 = vmatprep.subr.bf16.mxu0 %v7117_v15  ;;  %v7197_v15 = vcombine.high %v2778_v16, %v2782_v59  ;;  %v2886_v44 = vld [vmem:[#allocation12 + $0x870] sm:$0xff] }
 0x38a   :  { %v2746_v55 = vld [vmem:[#allocation12 + $0x410] sm:$0xff] }
 0x38b   :  { %6002 = vmatpush2.bf16.msra.mxu1 %v7498_v29  ;;  %v7196_v29 = vcombine.low %v2778_v16, %v2782_v59  ;;  %v2750_v57 = vld [vmem:[#allocation12 + $0x430] sm:$0xff] }
 0x38c   :  { %6043 = vmatpush2.bf16.msra.mxu0 %v7116_v30  ;;  %6003 = vmatprep.subr.bf16.mxu1 %v7491_v31  ;;  %v7324_v30 = vcombine.low %v2906_v51, %v2910_v62  ;;  %v2878_v60 = vld [vmem:[#allocation12 + $0x830] sm:$0xff]  ;;  %v7164_v4 = vcombine.low %v2746_v55, %v2750_v57 }
 0x38d   :  { %6044 = vmatprep.subr.bf16.mxu0 %v7109_v32  ;;  %v7317_v32 = vcombine.high %v2898_v27, %v2902_v28  ;;  %v2866_v53 = vld [vmem:[#allocation12 + $0x7d0] sm:$0xff] }
 0x38e   :  { %v2998_v41 = vld [vmem:[#allocation12 + $0xbf0] sm:$0xff] }
 0x38f   :  { %6004 = vmatpush2.bf16.msra.mxu1 %v7490_v36  ;;  %v2986_v16 = vld [vmem:[#allocation12 + $0xb90] sm:$0xff] }
 0x390   :  { %6045 = vmatpush2.bf16.msra.mxu0 %v7108_v38  ;;  %6005 = vmatprep.subr.bf16.mxu1 %v7483_v39  ;;  %v7316_v38 = vcombine.low %v2898_v27, %v2902_v28  ;;  %v7181_v39 = vcombine.high %v2762_v18, %v2766_v34  ;;  %v2990_v59 = vld [vmem:[#allocation12 + $0xbb0] sm:$0xff] }
 0x391   :  { %6046 = vmatprep.subr.bf16.mxu0 %v7101_v40  ;;  %v7309_v40 = vcombine.high %v2890_v35, %v2894_v13 }
 0x393   :  { %6006 = vmatpush2.bf16.msra.mxu1 %v7482_v46  ;;  %v7180_v46 = vcombine.low %v2762_v18, %v2766_v34 }
 0x394   :  { %6047 = vmatpush2.bf16.msra.mxu0 %v7100_v47  ;;  %6057 = vmatprep.subr.bf16.mxu1 %v7221_v49  ;;  %v7308_v47 = vcombine.low %v2890_v35, %v2894_v13  ;;  %v7173_v49 = vcombine.high %v2754_v42, %v2758_v43 }
 0x395   :  { %6098 = vmatprep.subr.bf16.mxu0 %v7349_v54  ;;  %v7301_v54 = vcombine.high %v2882_v45, %v2886_v44 }
 0x396   :  { %6008 = vmatmul.mubr.bf16.vlgmr.msra.gmra.mxu1 %v8212_v0  ;;  %v5804_v2 = vpop.f32.mrf.mxu0 }
 0x397   :  { %6049 = vmatmul.mubr.bf16.vlgmr.msra.gmra.mxu0 %v8167_v11  ;;  %v8233_v5 = vadd.f32 %v5804_v2, %v8224_v33  ;;  %6058 = vmatpush1.bf16.msra.mxu1 %v7220_v58  ;;  %v2874_v58 = vld [vmem:[#allocation12 + $0x810] sm:$0xff] }
 0x398   :  { %6089 = vmatprep.mubr.bf16.mxu1 %v8173_v52  ;;  %6099 = vmatpush1.bf16.msra.mxu0 %v7348_v63  ;;  %v5806_v7 = vpop.f32.mrf.mxu0  ;;  %v7300_v63 = vcombine.low %v2882_v45, %v2886_v44  ;;  %v7293_v50 = vcombine.high %v2874_v58, %v2878_v60  ;;  %v2870_v2 = vld [vmem:[#allocation12 + $0x7f0] sm:$0xff] }
 0x399   :  { %6130 = vmatprep.mubr.bf16.mxu0 %v8199_v19  ;;  %v8238_v10 = vadd.f32 %v5806_v7, %v8228_v37  ;;  %6059 = vmatprep.subr.bf16.mxu1 %v7213_v1  ;;  %v2774_v37 = vld [vmem:[#allocation12 + $0x4f0] sm:$0xff]  ;;  %v7165_v1 = vcombine.high %v2746_v55, %v2750_v57  ;;  %v7285_v7 = vcombine.high %v2866_v53, %v2870_v2 }
 0x39a   :  { %6100 = vmatprep.subr.bf16.mxu0 %v7341_v3  ;;  %v5808_v33 = vpop.f32.mrf.mxu0  ;;  %v7189_v31 = vcombine.high %v2770_v26, %v2774_v37  ;;  %v7188_v36 = vcombine.low %v2770_v26, %v2774_v37  ;;  %v2994_v3 = vld [vmem:[#allocation12 + $0xbd0] sm:$0xff]  ;;  %v7404_v37 = vcombine.low %v2986_v16, %v2990_v59 }
 0x39b   :  { %6060 = vmatpush1.bf16.msra.mxu1 %v7212_v6  ;;  %v7292_v6 = vcombine.low %v2874_v58, %v2878_v60  ;;  %v7284_v33 = vcombine.low %v2866_v53, %v2870_v2  ;;  %v7412_v51 = vcombine.low %v2994_v3, %v2998_v41 }
 0x39c   :  { %6101 = vmatpush1.bf16.msra.mxu0 %v7340_v8  ;;  %v5809_v23 = vpop.f32.mrf.mxu0  ;;  %6061 = vmatprep.subr.bf16.mxu1 %v7205_v9  ;;  %v7413_v8 = vcombine.high %v2994_v3, %v2998_v41  ;;  %v2858_v9 = vld [vmem:[#allocation12 + $0x790] sm:$0xff] }
 0x39d   :  { %6102 = vmatprep.subr.bf16.mxu0 %v7333_v12  ;;  %v2862_v12 = vld [vmem:[#allocation12 + $0x7b0] sm:$0xff] }
 0x39e   :  { %v7277_v62 = vcombine.high %v2858_v9, %v2862_v12  ;;  %v2850_v23 = vld [vmem:[#allocation12 + $0x750] sm:$0xff]  ;;  %v7276_v26 = vcombine.low %v2858_v9, %v2862_v12 }
 0x39f   :  { %6062 = vmatpush1.bf16.msra.mxu1 %v7204_v21  ;;  %v7405_v21 = vcombine.high %v2986_v16, %v2990_v59 }
 0x3a0   :  { %6103 = vmatpush1.bf16.msra.mxu0 %v7332_v24  ;;  %6063 = vmatprep.subr.bf16.mxu1 %v7197_v15  ;;  %v2854_v24 = vld [vmem:[#allocation12 + $0x770] sm:$0xff] }
 0x3a1   :  { %6104 = vmatprep.subr.bf16.mxu0 %v7325_v25  ;;  %v2978_v15 = vld [vmem:[#allocation12 + $0xb50] sm:$0xff]  ;;  %v7269_v27 = vcombine.high %v2850_v23, %v2854_v24  ;;  %v7268_v18 = vcombine.low %v2850_v23, %v2854_v24 }
 0x3a2   :  { %v2982_v25 = vld [vmem:[#allocation12 + $0xb70] sm:$0xff] }
 0x3a3   :  { %6064 = vmatpush1.bf16.msra.mxu1 %v7196_v29  ;;  %v7397_v28 = vcombine.high %v2978_v15, %v2982_v25  ;;  %v2842_v29 = vld [vmem:[#allocation12 + $0x710] sm:$0xff]  ;;  %v7396_v34 = vcombine.low %v2978_v15, %v2982_v25 }
 0x3a4   :  { %6105 = vmatpush1.bf16.msra.mxu0 %v7324_v30  ;;  %6065 = vmatprep.subr.bf16.mxu1 %v7189_v31  ;;  %v2846_v30 = vld [vmem:[#allocation12 + $0x730] sm:$0xff] }
 0x3a5   :  { %6106 = vmatprep.subr.bf16.mxu0 %v7317_v32  ;;  %v2970_v31 = vld [vmem:[#allocation12 + $0xb10] sm:$0xff]  ;;  %v7261_v35 = vcombine.high %v2842_v29, %v2846_v30  ;;  %v7260_v42 = vcombine.low %v2842_v29, %v2846_v30  ;;  %v2671_v29 = vld [vmem:[#allocation12 + $0x1b8] sm:$0xff] }
 0x3a6   :  { %v2974_v32 = vld [vmem:[#allocation12 + $0xb30] sm:$0xff] }
 0x3a7   :  { %6066 = vmatpush1.bf16.msra.mxu1 %v7188_v36  ;;  %v7389_v13 = vcombine.high %v2970_v31, %v2974_v32  ;;  %v2834_v36 = vld [vmem:[#allocation12 + $0x6d0] sm:$0xff]  ;;  %v7388_v43 = vcombine.low %v2970_v31, %v2974_v32 }
 0x3a8   :  { %6107 = vmatpush1.bf16.msra.mxu0 %v7316_v38  ;;  %6067 = vmatprep.subr.bf16.mxu1 %v7181_v39  ;;  %v2838_v38 = vld [vmem:[#allocation12 + $0x6f0] sm:$0xff] }
 0x3a9   :  { %6108 = vmatprep.subr.bf16.mxu0 %v7309_v40  ;;  %v2962_v39 = vld [vmem:[#allocation12 + $0xad0] sm:$0xff]  ;;  %v7253_v45 = vcombine.high %v2834_v36, %v2838_v38  ;;  %v7252_v55 = vcombine.low %v2834_v36, %v2838_v38  ;;  %v2659_v36 = vld [vmem:[#allocation12 + $0x158] sm:$0xff] }
 0x3aa   :  { %v2966_v40 = vld [vmem:[#allocation12 + $0xaf0] sm:$0xff]  ;;  %v2663_v38 = vld [vmem:[#allocation12 + $0x178] sm:$0xff] }
 0x3ab   :  { %6068 = vmatpush1.bf16.msra.mxu1 %v7180_v46  ;;  %v7381_v44 = vcombine.high %v2962_v39, %v2966_v40  ;;  %v2826_v46 = vld [vmem:[#allocation12 + $0x690] sm:$0xff]  ;;  %v7380_v57 = vcombine.low %v2962_v39, %v2966_v40 }
 0x3ac   :  { %6109 = vmatpush1.bf16.msra.mxu0 %v7308_v47  ;;  %6069 = vmatprep.subr.bf16.mxu1 %v7173_v49  ;;  %v2830_v47 = vld [vmem:[#allocation12 + $0x6b0] sm:$0xff] }
 0x3ad   :  { %6110 = vmatprep.subr.bf16.mxu0 %v7301_v54  ;;  %v2954_v49 = vld [vmem:[#allocation12 + $0xa90] sm:$0xff]  ;;  %v7245_v58 = vcombine.high %v2826_v46, %v2830_v47  ;;  %v7244_v53 = vcombine.low %v2826_v46, %v2830_v47  ;;  %v7079_v47 = vcombine.high %v2659_v36, %v2663_v38 }
 0x3ae   :  { %v2958_v54 = vld [vmem:[#allocation12 + $0xab0] sm:$0xff] }
 0x3af   :  { %6070 = vmatpush1.bf16.msra.mxu1 %v7172_v61  ;;  %v7373_v60 = vcombine.high %v2954_v49, %v2958_v54  ;;  %v2818_v61 = vld [vmem:[#allocation12 + $0x650] sm:$0xff]  ;;  %v7372_v2 = vcombine.low %v2954_v49, %v2958_v54 }
 0x3b0   :  { %6111 = vmatpush1.bf16.msra.mxu0 %v7300_v63  ;;  %6071 = vmatprep.subr.bf16.mxu1 %v7165_v1  ;;  %v2822_v63 = vld [vmem:[#allocation12 + $0x670] sm:$0xff] }
 0x3b1   :  { %6112 = vmatprep.subr.bf16.mxu0 %v7293_v50  ;;  %v2946_v1 = vld [vmem:[#allocation12 + $0xa50] sm:$0xff]  ;;  %v7237_v3 = vcombine.high %v2818_v61, %v2822_v63  ;;  %v7236_v9 = vcombine.low %v2818_v61, %v2822_v63 }
 0x3b2   :  { %v2950_v50 = vld [vmem:[#allocation12 + $0xa70] sm:$0xff] }
 0x3b3   :  { %6072 = vmatpush1.bf16.msra.mxu1 %v7164_v4  ;;  %v7365_v41 = vcombine.high %v2946_v1, %v2950_v50  ;;  %v2810_v4 = vld [vmem:[#allocation12 + $0x610] sm:$0xff]  ;;  %v7364_v12 = vcombine.low %v2946_v1, %v2950_v50  ;;  %v7078_v1 = vcombine.low %v2659_v36, %v2663_v38 }
 0x3b4   :  { %6113 = vmatpush1.bf16.msra.mxu0 %v7292_v6  ;;  %6073 = vmatprep.subr.bf16.mxu1 %v7285_v7  ;;  %v2814_v6 = vld [vmem:[#allocation12 + $0x630] sm:$0xff] }
 0x3b5   :  { %6114 = vmatprep.subr.bf16.mxu0 %v7413_v8  ;;  %v2938_v7 = vld [vmem:[#allocation12 + $0xa10] sm:$0xff]  ;;  %v7229_v16 = vcombine.high %v2810_v4, %v2814_v6  ;;  %v7228_v23 = vcombine.low %v2810_v4, %v2814_v6 }
 0x3b6   :  { %v2942_v8 = vld [vmem:[#allocation12 + $0xa30] sm:$0xff] }
 0x3b7   :  { %6074 = vmatpush2.bf16.msra.mxu1 %v7284_v33  ;;  %v7357_v59 = vcombine.high %v2938_v7, %v2942_v8  ;;  %v3058_v33 = vld [vmem:[#allocation12 + $0xdd0] sm:$0xff]  ;;  %v7356_v24 = vcombine.low %v2938_v7, %v2942_v8 }
 0x3b8   :  { %6115 = vmatpush2.bf16.msra.mxu0 %v7412_v51  ;;  %6075 = vmatprep.subr.bf16.mxu1 %v7277_v62  ;;  %v3062_v51 = vld [vmem:[#allocation12 + $0xdf0] sm:$0xff]  ;;  %v2675_v62 = vld [vmem:[#allocation12 + $0x1d8] sm:$0xff] }
 0x3b9   :  { %6116 = vmatprep.subr.bf16.mxu0 %v7405_v21  ;;  %v2679_v21 = vld [vmem:[#allocation12 + $0x1f8] sm:$0xff]  ;;  %v7477_v15 = vcombine.high %v3058_v33, %v3062_v51  ;;  %v3042_v32 = vld [vmem:[#allocation12 + $0xd50] sm:$0xff] }
 0x3ba   :  { %v7095_v25 = vcombine.high %v2675_v62, %v2679_v21  ;;  %v7094_v30 = vcombine.low %v2675_v62, %v2679_v21  ;;  %v3034_v49 = vld [vmem:[#allocation12 + $0xd10] sm:$0xff] }
 0x3bb   :  { %6076 = vmatpush2.bf16.msra.mxu1 %v7276_v26  ;;  %v3050_v26 = vld [vmem:[#allocation12 + $0xd90] sm:$0xff] }
 0x3bc   :  { %6117 = vmatpush2.bf16.msra.mxu0 %v7404_v37  ;;  %6077 = vmatprep.subr.bf16.mxu1 %v7269_v27  ;;  %v3054_v37 = vld [vmem:[#allocation12 + $0xdb0] sm:$0xff]  ;;  %v7476_v27 = vcombine.low %v3058_v33, %v3062_v51 }
 0x3bd   :  { %6118 = vmatprep.subr.bf16.mxu0 %v7397_v28  ;;  %v2667_v28 = vld [vmem:[#allocation12 + $0x198] sm:$0xff]  ;;  %v7469_v31 = vcombine.high %v3050_v26, %v3054_v37  ;;  %v7468_v40 = vcombine.low %v3050_v26, %v3054_v37  ;;  %v3026_v50 = vld [vmem:[#allocation12 + $0xcd0] sm:$0xff] }
 0x3be   :  { %v3018_v8 = vld [vmem:[#allocation12 + $0xc90] sm:$0xff] }
 0x3bf   :  { %6078 = vmatpush2.bf16.msra.mxu1 %v7268_v18  ;;  %v3046_v18 = vld [vmem:[#allocation12 + $0xd70] sm:$0xff] }
 0x3c0   :  { %6119 = vmatpush2.bf16.msra.mxu0 %v7396_v34  ;;  %6079 = vmatprep.subr.bf16.mxu1 %v7261_v35  ;;  %v3010_v21 = vld [vmem:[#allocation12 + $0xc50] sm:$0xff] }
 0x3c1   :  { %6120 = vmatprep.subr.bf16.mxu0 %v7389_v13  ;;  %v7087_v13 = vcombine.high %v2667_v28, %v2671_v29  ;;  %v3122_v36 = vld [vmem:[#allocation12 + $0xfd0] sm:$0xff] }
 0x3c2   :  { %v3126_v38 = vld [vmem:[#allocation12 + $0xff0] sm:$0xff] }
 0x3c3   :  { %6080 = vmatpush2.bf16.msra.mxu1 %v7260_v42 }
 0x3c4   :  { %6121 = vmatpush2.bf16.msra.mxu0 %v7388_v43  ;;  %6081 = vmatprep.subr.bf16.mxu1 %v7253_v45  ;;  %v7086_v45 = vcombine.low %v2667_v28, %v2671_v29  ;;  %v3002_v28 = vld [vmem:[#allocation12 + $0xc10] sm:$0xff] }
 0x3c5   :  { %6122 = vmatprep.subr.bf16.mxu0 %v7381_v44  ;;  %v7461_v44 = vcombine.high %v3042_v32, %v3046_v18  ;;  %v3006_v29 = vld [vmem:[#allocation12 + $0xc30] sm:$0xff] }
 0x3c7   :  { %6082 = vmatpush2.bf16.msra.mxu1 %v7252_v55 }
 0x3c8   :  { %6123 = vmatpush2.bf16.msra.mxu0 %v7380_v57  ;;  %6083 = vmatprep.subr.bf16.mxu1 %v7245_v58  ;;  %v2651_v57 = vld [vmem:[#allocation12 + $0x118] sm:$0xff] }
 0x3c9   :  { %6124 = vmatprep.subr.bf16.mxu0 %v7373_v60  ;;  %v2655_v58 = vld [vmem:[#allocation12 + $0x138] sm:$0xff]  ;;  %v7460_v60 = vcombine.low %v3042_v32, %v3046_v18 }
 0x3ca   :  { %v7070_v4 = vcombine.low %v2651_v57, %v2655_v58 }
 0x3cb   :  { %6084 = vmatpush2.bf16.msra.mxu1 %v7244_v53  ;;  %v3030_v53 = vld [vmem:[#allocation12 + $0xcf0] sm:$0xff] }
 0x3cc   :  { %6125 = vmatpush2.bf16.msra.mxu0 %v7372_v2  ;;  %6085 = vmatprep.subr.bf16.mxu1 %v7237_v3  ;;  %v2643_v2 = vld [vmem:[#allocation12 + $0xd8] sm:$0xff]  ;;  %v7445_v6 = vcombine.high %v3026_v50, %v3030_v53 }
 0x3cd   :  { %6126 = vmatprep.subr.bf16.mxu0 %v7365_v41  ;;  %v2647_v3 = vld [vmem:[#allocation12 + $0xf8] sm:$0xff] }
 0x3ce   :  { %v7063_v7 = vcombine.high %v2643_v2, %v2647_v3  ;;  %v7062_v33 = vcombine.low %v2643_v2, %v2647_v3 }
 0x3cf   :  { %6086 = vmatpush2.bf16.msra.mxu1 %v7236_v9  ;;  %v3022_v9 = vld [vmem:[#allocation12 + $0xcb0] sm:$0xff] }
 0x3d0   :  { %6127 = vmatpush2.bf16.msra.mxu0 %v7364_v12  ;;  %6087 = vmatprep.subr.bf16.mxu1 %v7229_v16  ;;  %v2635_v12 = vld [vmem:[#allocation12 + $0x98] sm:$0xff]  ;;  %v7437_v51 = vcombine.high %v3018_v8, %v3022_v9 }
 0x3d1   :  { %6128 = vmatprep.subr.bf16.mxu0 %v7357_v59  ;;  %v2639_v16 = vld [vmem:[#allocation12 + $0xb8] sm:$0xff]  ;;  %v7444_v59 = vcombine.low %v3026_v50, %v3030_v53 }
 0x3d2   :  { %v7055_v62 = vcombine.high %v2635_v12, %v2639_v16  ;;  %v7054_v26 = vcombine.low %v2635_v12, %v2639_v16  ;;  %v2727_v50 = vld [vmem:[#allocation12 + $0x378] sm:$0xff] }
 0x3d3   :  { %6088 = vmatpush2.bf16.msra.mxu1 %v7228_v23  ;;  %v3014_v23 = vld [vmem:[#allocation12 + $0xc70] sm:$0xff] }
 0x3d4   :  { %6129 = vmatpush2.bf16.msra.mxu0 %v7356_v24  ;;  %6139 = vmatprep.subr.bf16.mxu1 %v7477_v15  ;;  %v2627_v24 = vld [vmem:[#allocation12 + $0x58] sm:$0xff]  ;;  %v7429_v37 = vcombine.high %v3010_v21, %v3014_v23  ;;  %v7428_v32 = vcombine.low %v3010_v21, %v3014_v23 }
 0x3d5   :  { %6180 = vmatprep.subr.bf16.mxu0 %v7095_v25  ;;  %v2631_v15 = vld [vmem:[#allocation12 + $0x78] sm:$0xff]  ;;  %v7436_v25 = vcombine.low %v3018_v8, %v3022_v9 }
 0x3d6   :  { %v8240_v34 = vpop.f32.mrf.mxu0  ;;  %6090 = vmatmul.mubr.bf16.vlgmr.msra.gmra.mxu1 %v8177_v56  ;;  %v5845_v35 = vpop.f32.mrf.mxu1  ;;  %v7046_v18 = vcombine.low %v2627_v24, %v2631_v15  ;;  %v2719_v8 = vld [vmem:[#allocation12 + $0x338] sm:$0xff] }
 0x3d7   :  { %6131 = vmatmul.mubr.bf16.vlgmr.msra.gmra.mxu0 %v8203_v22  ;;  %v8245_v39 = vadd.f32 %v5845_v35, %v8233_v5  ;;  %6140 = vmatpush1.bf16.msra.mxu1 %v7476_v27  ;;  %v3038_v5 = vld [vmem:[#allocation12 + $0xd30] sm:$0xff]  ;;  %v7047_v27 = vcombine.high %v2627_v24, %v2631_v15  ;;  %v7421_v35 = vcombine.high %v3002_v28, %v3006_v29  ;;  %v2711_v21 = vld [vmem:[#allocation12 + $0x2f8] sm:$0xff] }
 0x3d8   :  { %6171 = vmatprep.mubr.bf16.mxu1 %v8210_v48  ;;  %6181 = vmatpush1.bf16.msra.mxu0 %v7094_v30  ;;  %v8248_v42 = vpop.f32.mrf.mxu0  ;;  %v5847_v43 = vpop.f32.mrf.mxu1  ;;  %v7452_v41 = vcombine.low %v3034_v49, %v3038_v5  ;;  %v2619_v30 = vld [vmem:[#allocation12 + $0x18] sm:$0xff] }
 0x3d9   :  { %6212 = vmatprep.mubr.bf16.mxu0 %v8151_v20  ;;  %v8252_v46 = vadd.f32 %v5847_v43, %v8238_v10  ;;  %6141 = vmatprep.subr.bf16.mxu1 %v7469_v31  ;;  %v7453_v20 = vcombine.high %v3034_v49, %v3038_v5  ;;  %v7071_v10 = vcombine.high %v2651_v57, %v2655_v58  ;;  %v2623_v31 = vld [vmem:[#allocation12 + $0x38] sm:$0xff]  ;;  %v3114_v5 = vld [vmem:[#allocation12 + $0xf90] sm:$0xff] }
 0x3da   :  { %v5890_v54 = vpop.f32.mrf.mxu0  ;;  %6182 = vmatprep.subr.bf16.mxu0 %v7087_v13  ;;  %v5849_v55 = vpop.f32.mrf.mxu1  ;;  %v7039_v13 = vcombine.high %v2619_v30, %v2623_v31  ;;  %v2743_v43 = vld [vmem:[#allocation12 + $0x3f8] sm:$0xff]  ;;  %v7540_v58 = vcombine.low %v3122_v36, %v3126_v38 }
 0x3db   :  { %6142 = vmatpush1.bf16.msra.mxu1 %v7468_v40  ;;  %v2739_v40 = vld [vmem:[#allocation12 + $0x3d8] sm:$0xff]  ;;  %v3118_v54 = vld [vmem:[#allocation12 + $0xfb0] sm:$0xff] }
 0x3dc   :  { %6183 = vmatpush1.bf16.msra.mxu0 %v7086_v45  ;;  %v5891_v61 = vpop.f32.mrf.mxu0  ;;  %v5850_v63 = vpop.f32.mrf.mxu1  ;;  %6143 = vmatprep.subr.bf16.mxu1 %v7461_v44  ;;  %v7420_v45 = vcombine.low %v3002_v28, %v3006_v29  ;;  %v7038_v44 = vcombine.low %v2619_v30, %v2623_v31  ;;  %v7159_v49 = vcombine.high %v2739_v40, %v2743_v43  ;;  %v2731_v55 = vld [vmem:[#allocation12 + $0x398] sm:$0xff] }
 0x3dd   :  { %6184 = vmatprep.subr.bf16.mxu0 %v7079_v47  ;;  %v7541_v47 = vcombine.high %v3122_v36, %v3126_v38  ;;  %v2735_v57 = vld [vmem:[#allocation12 + $0x3b8] sm:$0xff]  ;;  %v7533_v61 = vcombine.high %v3114_v5, %v3118_v54  ;;  %v7532_v53 = vcombine.low %v3114_v5, %v3118_v54 }
 0x3de   :  { %v7151_v63 = vcombine.high %v2731_v55, %v2735_v57  ;;  %v7150_v2 = vcombine.low %v2731_v55, %v2735_v57  ;;  %v2703_v28 = vld [vmem:[#allocation12 + $0x2b8] sm:$0xff] }
 0x3df   :  { %6144 = vmatpush1.bf16.msra.mxu1 %v7460_v60  ;;  %v7158_v60 = vcombine.low %v2739_v40, %v2743_v43  ;;  %v2695_v36 = vld [vmem:[#allocation12 + $0x278] sm:$0xff] }
 0x3e0   :  { %6185 = vmatpush1.bf16.msra.mxu0 %v7078_v1  ;;  %6145 = vmatprep.subr.bf16.mxu1 %v7453_v20  ;;  %v3106_v1 = vld [vmem:[#allocation12 + $0xf50] sm:$0xff]  ;;  %v2687_v5 = vld [vmem:[#allocation12 + $0x238] sm:$0xff] }
 0x3e1   :  { %6186 = vmatprep.subr.bf16.mxu0 %v7071_v10  ;;  %v3110_v20 = vld [vmem:[#allocation12 + $0xf70] sm:$0xff]  ;;  %v2723_v10 = vld [vmem:[#allocation12 + $0x358] sm:$0xff] }
 0x3e2   :  { %v7525_v3 = vcombine.high %v3106_v1, %v3110_v20  ;;  %v7524_v9 = vcombine.low %v3106_v1, %v3110_v20  ;;  %v7142_v12 = vcombine.low %v2723_v10, %v2727_v50  ;;  %v2935_v1 = vld [vmem:[#allocation12 + $0x9f8] sm:$0xff] }
 0x3e3   :  { %6146 = vmatpush1.bf16.msra.mxu1 %v7452_v41  ;;  %v7143_v41 = vcombine.high %v2723_v10, %v2727_v50 }
 0x3e4   :  { %6187 = vmatpush1.bf16.msra.mxu0 %v7070_v4  ;;  %6147 = vmatprep.subr.bf16.mxu1 %v7445_v6  ;;  %v3098_v4 = vld [vmem:[#allocation12 + $0xf10] sm:$0xff] }
 0x3e5   :  { %6188 = vmatprep.subr.bf16.mxu0 %v7063_v7  ;;  %v3102_v6 = vld [vmem:[#allocation12 + $0xf30] sm:$0xff]  ;;  %v2715_v7 = vld [vmem:[#allocation12 + $0x318] sm:$0xff] }
 0x3e6   :  { %v7517_v16 = vcombine.high %v3098_v4, %v3102_v6  ;;  %v7516_v23 = vcombine.low %v3098_v4, %v3102_v6  ;;  %v7134_v24 = vcombine.low %v2715_v7, %v2719_v8  ;;  %v2923_v4 = vld [vmem:[#allocation12 + $0x998] sm:$0xff] }
 0x3e7   :  { %6148 = vmatpush1.bf16.msra.mxu1 %v7444_v59  ;;  %v7135_v59 = vcombine.high %v2715_v7, %v2719_v8  ;;  %v2927_v6 = vld [vmem:[#allocation12 + $0x9b8] sm:$0xff] }
 0x3e8   :  { %6189 = vmatpush1.bf16.msra.mxu0 %v7062_v33  ;;  %6149 = vmatprep.subr.bf16.mxu1 %v7437_v51  ;;  %v3090_v33 = vld [vmem:[#allocation12 + $0xed0] sm:$0xff] }
 0x3e9   :  { %6190 = vmatprep.subr.bf16.mxu0 %v7055_v62  ;;  %v3094_v51 = vld [vmem:[#allocation12 + $0xef0] sm:$0xff]  ;;  %v2707_v62 = vld [vmem:[#allocation12 + $0x2d8] sm:$0xff] }
 0x3ea   :  { %v7509_v15 = vcombine.high %v3090_v33, %v3094_v51  ;;  %v7508_v29 = vcombine.low %v3090_v33, %v3094_v51  ;;  %v7126_v30 = vcombine.low %v2707_v62, %v2711_v21  ;;  %v7343_v33 = vcombine.high %v2923_v4, %v2927_v6  ;;  %v2915_v51 = vld [vmem:[#allocation12 + $0x958] sm:$0xff] }
 0x3eb   :  { %6150 = vmatpush1.bf16.msra.mxu1 %v7436_v25  ;;  %v7127_v25 = vcombine.high %v2707_v62, %v2711_v21  ;;  %v2919_v62 = vld [vmem:[#allocation12 + $0x978] sm:$0xff] }
 0x3ec   :  { %6191 = vmatpush1.bf16.msra.mxu0 %v7054_v26  ;;  %6151 = vmatprep.subr.bf16.mxu1 %v7429_v37  ;;  %v3082_v26 = vld [vmem:[#allocation12 + $0xe90] sm:$0xff] }
 0x3ed   :  { %6192 = vmatprep.subr.bf16.mxu0 %v7047_v27  ;;  %v3086_v37 = vld [vmem:[#allocation12 + $0xeb0] sm:$0xff]  ;;  %v2699_v27 = vld [vmem:[#allocation12 + $0x298] sm:$0xff] }
 0x3ee   :  { %v7501_v31 = vcombine.high %v3082_v26, %v3086_v37  ;;  %v7500_v38 = vcombine.low %v3082_v26, %v3086_v37  ;;  %v7118_v40 = vcombine.low %v2699_v27, %v2703_v28 }
 0x3ef   :  { %6152 = vmatpush1.bf16.msra.mxu1 %v7428_v32  ;;  %v7119_v32 = vcombine.high %v2699_v27, %v2703_v28  ;;  %v7335_v28 = vcombine.high %v2915_v51, %v2919_v62 }
 0x3f0   :  { %6193 = vmatpush1.bf16.msra.mxu0 %v7046_v18  ;;  %6153 = vmatprep.subr.bf16.mxu1 %v7421_v35  ;;  %v3074_v18 = vld [vmem:[#allocation12 + $0xe50] sm:$0xff] }
 0x3f1   :  { %6194 = vmatprep.subr.bf16.mxu0 %v7039_v13  ;;  %v3078_v35 = vld [vmem:[#allocation12 + $0xe70] sm:$0xff]  ;;  %v2691_v13 = vld [vmem:[#allocation12 + $0x258] sm:$0xff] }
 0x3f2   :  { %v7493_v43 = vcombine.high %v3074_v18, %v3078_v35  ;;  %v7492_v54 = vcombine.low %v3074_v18, %v3078_v35  ;;  %v7110_v55 = vcombine.low %v2691_v13, %v2695_v36 }
 0x3f3   :  { %6154 = vmatpush1.bf16.msra.mxu1 %v7420_v45  ;;  %v7111_v45 = vcombine.high %v2691_v13, %v2695_v36 }
 0x3f4   :  { %6195 = vmatpush1.bf16.msra.mxu0 %v7038_v44  ;;  %6155 = vmatprep.subr.bf16.mxu1 %v7541_v47  ;;  %v3066_v44 = vld [vmem:[#allocation12 + $0xe10] sm:$0xff] }
 0x3f5   :  { %6196 = vmatprep.subr.bf16.mxu0 %v7159_v49  ;;  %v3070_v47 = vld [vmem:[#allocation12 + $0xe30] sm:$0xff]  ;;  %v2683_v49 = vld [vmem:[#allocation12 + $0x218] sm:$0xff] }
 0x3f6   :  { %v7485_v57 = vcombine.high %v3066_v44, %v3070_v47  ;;  %v7484_v20 = vcombine.low %v3066_v44, %v3070_v47  ;;  %v7102_v10 = vcombine.low %v2683_v49, %v2687_v5 }
 0x3f7   :  { %6156 = vmatpush2.bf16.msra.mxu1 %v7540_v58  ;;  %v7103_v58 = vcombine.high %v2683_v49, %v2687_v5 }
 0x3f8   :  { %6197 = vmatpush2.bf16.msra.mxu0 %v7158_v60  ;;  %6157 = vmatprep.subr.bf16.mxu1 %v7533_v61  ;;  %v2803_v60 = vld [vmem:[#allocation12 + $0x5d8] sm:$0xff] }
 0x3f9   :  { %6198 = vmatprep.subr.bf16.mxu0 %v7151_v63  ;;  %v2807_v61 = vld [vmem:[#allocation12 + $0x5f8] sm:$0xff] }
 0x3fa   :  { %v2931_v63 = vld [vmem:[#allocation12 + $0x9d8] sm:$0xff]  ;;  %v7223_v50 = vcombine.high %v2803_v60, %v2807_v61 }
 0x3fb   :  { %6158 = vmatpush2.bf16.msra.mxu1 %v7532_v53  ;;  %v7351_v53 = vcombine.high %v2931_v63, %v2935_v1  ;;  %v7350_v7 = vcombine.low %v2931_v63, %v2935_v1 }
 0x3fc   :  { %6199 = vmatpush2.bf16.msra.mxu0 %v7150_v2  ;;  %6159 = vmatprep.subr.bf16.mxu1 %v7525_v3  ;;  %v2795_v2 = vld [vmem:[#allocation12 + $0x598] sm:$0xff] }
 0x3fd   :  { %6200 = vmatprep.subr.bf16.mxu0 %v7143_v41  ;;  %v2799_v3 = vld [vmem:[#allocation12 + $0x5b8] sm:$0xff]  ;;  %v7222_v41 = vcombine.low %v2803_v60, %v2807_v61 }
 0x3fe   :  { %v7215_v8 = vcombine.high %v2795_v2, %v2799_v3 }
 0x3ff   :  { %6160 = vmatpush2.bf16.msra.mxu1 %v7524_v9  ;;  %v2787_v9 = vld [vmem:[#allocation12 + $0x558] sm:$0xff] }
 0x400   :  { %6201 = vmatpush2.bf16.msra.mxu0 %v7142_v12  ;;  %6161 = vmatprep.subr.bf16.mxu1 %v7517_v16  ;;  %v2791_v12 = vld [vmem:[#allocation12 + $0x578] sm:$0xff] }
 0x401   :  { %6202 = vmatprep.subr.bf16.mxu0 %v7135_v59  ;;  %v7207_v26 = vcombine.high %v2787_v9, %v2791_v12  ;;  %v7206_v18 = vcombine.low %v2787_v9, %v2791_v12  ;;  %v2879_v9 = vld [vmem:[#allocation12 + $0x838] sm:$0xff] }
 0x403   :  { %6162 = vmatpush2.bf16.msra.mxu1 %v7516_v23  ;;  %v7214_v23 = vcombine.low %v2795_v2, %v2799_v3 }
 0x404   :  { %6203 = vmatpush2.bf16.msra.mxu0 %v7134_v24  ;;  %6163 = vmatprep.subr.bf16.mxu1 %v7509_v15 }
 0x405   :  { %6204 = vmatprep.subr.bf16.mxu0 %v7127_v25  ;;  %v7342_v25 = vcombine.low %v2923_v4, %v2927_v6  ;;  %v2747_v6 = vld [vmem:[#allocation12 + $0x418] sm:$0xff] }
 0x407   :  { %6164 = vmatpush2.bf16.msra.mxu1 %v7508_v29  ;;  %v2783_v29 = vld [vmem:[#allocation12 + $0x538] sm:$0xff] }
 0x408   :  { %6205 = vmatpush2.bf16.msra.mxu0 %v7126_v30  ;;  %6165 = vmatprep.subr.bf16.mxu1 %v7501_v31  ;;  %v2907_v31 = vld [vmem:[#allocation12 + $0x918] sm:$0xff] }
 0x409   :  { %6206 = vmatprep.subr.bf16.mxu0 %v7119_v32 }
 0x40b   :  { %6166 = vmatpush2.bf16.msra.mxu1 %v7500_v38  ;;  %v2771_v38 = vld [vmem:[#allocation12 + $0x4d8] sm:$0xff] }
 0x40c   :  { %6207 = vmatpush2.bf16.msra.mxu0 %v7118_v40  ;;  %6167 = vmatprep.subr.bf16.mxu1 %v7493_v43  ;;  %v2775_v40 = vld [vmem:[#allocation12 + $0x4f8] sm:$0xff] }
 0x40d   :  { %6208 = vmatprep.subr.bf16.mxu0 %v7111_v45  ;;  %v2899_v43 = vld [vmem:[#allocation12 + $0x8d8] sm:$0xff]  ;;  %v7191_v49 = vcombine.high %v2771_v38, %v2775_v40  ;;  %v7190_v60 = vcombine.low %v2771_v38, %v2775_v40 }
 0x40e   :  { %v2903_v45 = vld [vmem:[#allocation12 + $0x8f8] sm:$0xff] }
 0x40f   :  { %6168 = vmatpush2.bf16.msra.mxu1 %v7492_v54  ;;  %v7319_v5 = vcombine.high %v2899_v43, %v2903_v45  ;;  %v2763_v54 = vld [vmem:[#allocation12 + $0x498] sm:$0xff]  ;;  %v7318_v61 = vcombine.low %v2899_v43, %v2903_v45 }
 0x410   :  { %6209 = vmatpush2.bf16.msra.mxu0 %v7110_v55  ;;  %6169 = vmatprep.subr.bf16.mxu1 %v7485_v57  ;;  %v2767_v55 = vld [vmem:[#allocation12 + $0x4b8] sm:$0xff] }
 0x411   :  { %6210 = vmatprep.subr.bf16.mxu0 %v7103_v58  ;;  %v2891_v57 = vld [vmem:[#allocation12 + $0x898] sm:$0xff]  ;;  %v7183_v63 = vcombine.high %v2763_v54, %v2767_v55  ;;  %v7182_v2 = vcombine.low %v2763_v54, %v2767_v55 }
 0x412   :  { %v2895_v58 = vld [vmem:[#allocation12 + $0x8b8] sm:$0xff] }
 0x413   :  { %6170 = vmatpush2.bf16.msra.mxu1 %v7484_v20  ;;  %v7311_v1 = vcombine.high %v2891_v57, %v2895_v58  ;;  %v2755_v20 = vld [vmem:[#allocation12 + $0x458] sm:$0xff]  ;;  %v7310_v3 = vcombine.low %v2891_v57, %v2895_v58 }
 0x414   :  { %6211 = vmatpush2.bf16.msra.mxu0 %v7102_v10  ;;  %6221 = vmatprep.subr.bf16.mxu1 %v7223_v50  ;;  %v2759_v10 = vld [vmem:[#allocation12 + $0x478] sm:$0xff] }
 0x415   :  { %6262 = vmatprep.subr.bf16.mxu0 %v7351_v53  ;;  %v2883_v50 = vld [vmem:[#allocation12 + $0x858] sm:$0xff]  ;;  %v7174_v12 = vcombine.low %v2755_v20, %v2759_v10 }
 0x416   :  { %v5927_v16 = vpop.f32.mrf.mxu1  ;;  %v5968_v59 = vpop.f32.mrf.mxu0  ;;  %6172 = vmatmul.mubr.bf16.vlgmr.msra.gmra.mxu1 %v8212_v0  ;;  %v2887_v53 = vld [vmem:[#allocation12 + $0x878] sm:$0xff] }
 0x417   :  { %v5928_v21 = vadd.f32 %v5927_v16, %v8240_v34  ;;  %6213 = vmatmul.mubr.bf16.vlgmr.msra.gmra.mxu0 %v8167_v11  ;;  %6222 = vmatpush1.bf16.msra.mxu1 %v7222_v41  ;;  %v2779_v34 = vld [vmem:[#allocation12 + $0x518] sm:$0xff]  ;;  %v7175_v41 = vcombine.high %v2755_v20, %v2759_v10  ;;  %v7303_v4 = vcombine.high %v2883_v50, %v2887_v53 }
 0x418   :  { %6253 = vmatprep.mubr.bf16.mxu1 %v8173_v52  ;;  %6263 = vmatpush1.bf16.msra.mxu0 %v7350_v7  ;;  %v5929_v24 = vpop.f32.mrf.mxu1  ;;  %v5970_v15 = vpop.f32.mrf.mxu0  ;;  %v2911_v52 = vld [vmem:[#allocation12 + $0x938] sm:$0xff]  ;;  %v7199_v36 = vcombine.high %v2779_v34, %v2783_v29  ;;  %v7198_v44 = vcombine.low %v2779_v34, %v2783_v29  ;;  %v7302_v16 = vcombine.low %v2883_v50, %v2887_v53 }
 0x419   :  { %v8258_v37 = vadd.f32 %v5968_v59, %v5928_v21  ;;  %6294 = vmatprep.mubr.bf16.mxu0 %v8199_v19  ;;  %v5930_v27 = vadd.f32 %v5929_v24, %v8248_v42  ;;  %6223 = vmatprep.subr.bf16.mxu1 %v7215_v8  ;;  %v7334_v19 = vcombine.low %v2915_v51, %v2919_v62  ;;  %v2751_v7 = vld [vmem:[#allocation12 + $0x438] sm:$0xff] }
 0x41a   :  { %v5931_v11 = vpop.f32.mrf.mxu1  ;;  %v5972_v30 = vpop.f32.mrf.mxu0  ;;  %6264 = vmatprep.subr.bf16.mxu0 %v7343_v33  ;;  %v7327_v42 = vcombine.high %v2907_v31, %v2911_v52  ;;  %v7326_v47 = vcombine.low %v2907_v31, %v2911_v52  ;;  %v2875_v8 = vld [vmem:[#allocation12 + $0x818] sm:$0xff]  ;;  %v7167_v59 = vcombine.high %v2747_v6, %v2751_v7  ;;  %v7166_v24 = vcombine.low %v2747_v6, %v2751_v7 }
 0x41b   :  { %v8262_v32 = vadd.f32 %v5970_v15, %v5930_v27  ;;  %6224 = vmatpush1.bf16.msra.mxu1 %v7214_v23  ;;  %v7295_v33 = vcombine.high %v2875_v8, %v2879_v9  ;;  %v2867_v51 = vld [vmem:[#allocation12 + $0x7d8] sm:$0xff]  ;;  %v7294_v15 = vcombine.low %v2875_v8, %v2879_v9 }
 0x41c   :  { %6265 = vmatpush1.bf16.msra.mxu0 %v7342_v25  ;;  %v5932_v35 = vpop.f32.mrf.mxu1  ;;  %v5973_v13 = vpop.f32.mrf.mxu0  ;;  %6225 = vmatprep.subr.bf16.mxu1 %v7207_v26  ;;  %v2871_v62 = vld [vmem:[#allocation12 + $0x7f8] sm:$0xff] }
 0x41d   :  { %6266 = vmatprep.subr.bf16.mxu0 %v7335_v28  ;;  %v2995_v21 = vld [vmem:[#allocation12 + $0xbd8] sm:$0xff]  ;;  %v7287_v25 = vcombine.high %v2867_v51, %v2871_v62  ;;  %v7286_v11 = vcombine.low %v2867_v51, %v2871_v62 }
 0x41e   :  { %v2999_v23 = vld [vmem:[#allocation12 + $0xbf8] sm:$0xff] }
 0x41f   :  { %6226 = vmatpush1.bf16.msra.mxu1 %v7206_v18  ;;  %v7415_v26 = vcombine.high %v2995_v21, %v2999_v23  ;;  %v2859_v27 = vld [vmem:[#allocation12 + $0x798] sm:$0xff]  ;;  %v7414_v30 = vcombine.low %v2995_v21, %v2999_v23 }
 0x420   :  { %6267 = vmatpush1.bf16.msra.mxu0 %v7334_v19  ;;  %6227 = vmatprep.subr.bf16.mxu1 %v7199_v36  ;;  %v2863_v28 = vld [vmem:[#allocation12 + $0x7b8] sm:$0xff] }
 0x421   :  { %6268 = vmatprep.subr.bf16.mxu0 %v7327_v42  ;;  %v2987_v34 = vld [vmem:[#allocation12 + $0xb98] sm:$0xff]  ;;  %v7279_v31 = vcombine.high %v2859_v27, %v2863_v28  ;;  %v7278_v36 = vcombine.low %v2859_v27, %v2863_v28 }
 0x422   :  { %v2991_v29 = vld [vmem:[#allocation12 + $0xbb8] sm:$0xff] }
 0x423   :  { %6228 = vmatpush1.bf16.msra.mxu1 %v7198_v44  ;;  %v7407_v52 = vcombine.high %v2987_v34, %v2991_v29  ;;  %v2851_v18 = vld [vmem:[#allocation12 + $0x758] sm:$0xff]  ;;  %v7406_v42 = vcombine.low %v2987_v34, %v2991_v29 }
 0x424   :  { %6269 = vmatpush1.bf16.msra.mxu0 %v7326_v47  ;;  %6229 = vmatprep.subr.bf16.mxu1 %v7191_v49  ;;  %v2855_v35 = vld [vmem:[#allocation12 + $0x778] sm:$0xff] }
 0x425   :  { %6270 = vmatprep.subr.bf16.mxu0 %v7319_v5  ;;  %v2979_v13 = vld [vmem:[#allocation12 + $0xb58] sm:$0xff]  ;;  %v7271_v38 = vcombine.high %v2851_v18, %v2855_v35  ;;  %v7270_v49 = vcombine.low %v2851_v18, %v2855_v35 }
 0x426   :  { %v2983_v19 = vld [vmem:[#allocation12 + $0xb78] sm:$0xff] }
 0x427   :  { %6230 = vmatpush1.bf16.msra.mxu1 %v7190_v60  ;;  %v7399_v40 = vcombine.high %v2979_v13, %v2983_v19  ;;  %v2843_v43 = vld [vmem:[#allocation12 + $0x718] sm:$0xff]  ;;  %v7398_v5 = vcombine.low %v2979_v13, %v2983_v19 }
 0x428   :  { %6271 = vmatpush1.bf16.msra.mxu0 %v7318_v61  ;;  %6231 = vmatprep.subr.bf16.mxu1 %v7183_v63  ;;  %v2847_v45 = vld [vmem:[#allocation12 + $0x738] sm:$0xff] }
 0x429   :  { %6272 = vmatprep.subr.bf16.mxu0 %v7311_v1  ;;  %v2971_v44 = vld [vmem:[#allocation12 + $0xb18] sm:$0xff]  ;;  %v7263_v54 = vcombine.high %v2843_v43, %v2847_v45  ;;  %v7262_v63 = vcombine.low %v2843_v43, %v2847_v45 }
 0x42a   :  { %v2975_v47 = vld [vmem:[#allocation12 + $0xb38] sm:$0xff] }
 0x42b   :  { %6232 = vmatpush1.bf16.msra.mxu1 %v7182_v2  ;;  %v7391_v55 = vcombine.high %v2971_v44, %v2975_v47  ;;  %v2835_v57 = vld [vmem:[#allocation12 + $0x6d8] sm:$0xff]  ;;  %v7390_v1 = vcombine.low %v2971_v44, %v2975_v47 }
 0x42c   :  { %6273 = vmatpush1.bf16.msra.mxu0 %v7310_v3  ;;  %6233 = vmatprep.subr.bf16.mxu1 %v7175_v41  ;;  %v2839_v58 = vld [vmem:[#allocation12 + $0x6f8] sm:$0xff] }
 0x42d   :  { %6274 = vmatprep.subr.bf16.mxu0 %v7303_v4  ;;  %v2963_v60 = vld [vmem:[#allocation12 + $0xad8] sm:$0xff]  ;;  %v7255_v20 = vcombine.high %v2835_v57, %v2839_v58  ;;  %v7254_v41 = vcombine.low %v2835_v57, %v2839_v58 }
 0x42e   :  { %v2967_v61 = vld [vmem:[#allocation12 + $0xaf8] sm:$0xff] }
 0x42f   :  { %6234 = vmatpush1.bf16.msra.mxu1 %v7174_v12  ;;  %v7383_v10 = vcombine.high %v2963_v60, %v2967_v61  ;;  %v2827_v50 = vld [vmem:[#allocation12 + $0x698] sm:$0xff]  ;;  %v7382_v4 = vcombine.low %v2963_v60, %v2967_v61 }
 0x430   :  { %6275 = vmatpush1.bf16.msra.mxu0 %v7302_v16  ;;  %6235 = vmatprep.subr.bf16.mxu1 %v7167_v59  ;;  %v2831_v53 = vld [vmem:[#allocation12 + $0x6b8] sm:$0xff] }
 0x431   :  { %6276 = vmatprep.subr.bf16.mxu0 %v7295_v33  ;;  %v2955_v2 = vld [vmem:[#allocation12 + $0xa98] sm:$0xff]  ;;  %v7247_v6 = vcombine.high %v2827_v50, %v2831_v53  ;;  %v7246_v59 = vcombine.low %v2827_v50, %v2831_v53 }
 0x432   :  { %v2959_v3 = vld [vmem:[#allocation12 + $0xab8] sm:$0xff] }
 0x433   :  { %6236 = vmatpush1.bf16.msra.mxu1 %v7166_v24  ;;  %v7375_v7 = vcombine.high %v2955_v2, %v2959_v3  ;;  %v2819_v8 = vld [vmem:[#allocation12 + $0x658] sm:$0xff]  ;;  %v7374_v33 = vcombine.low %v2955_v2, %v2959_v3 }
 0x434   :  { %6277 = vmatpush1.bf16.msra.mxu0 %v7294_v15  ;;  %6237 = vmatprep.subr.bf16.mxu1 %v7287_v25  ;;  %v2823_v9 = vld [vmem:[#allocation12 + $0x678] sm:$0xff] }
 0x435   :  { %6278 = vmatprep.subr.bf16.mxu0 %v7415_v26  ;;  %v2947_v12 = vld [vmem:[#allocation12 + $0xa58] sm:$0xff]  ;;  %v7239_v51 = vcombine.high %v2819_v8, %v2823_v9  ;;  %v7238_v25 = vcombine.low %v2819_v8, %v2823_v9 }
 0x436   :  { %v2951_v16 = vld [vmem:[#allocation12 + $0xa78] sm:$0xff] }
 0x437   :  { %6238 = vmatpush2.bf16.msra.mxu1 %v7286_v11  ;;  %v7367_v62 = vcombine.high %v2947_v12, %v2951_v16  ;;  %v2811_v21 = vld [vmem:[#allocation12 + $0x618] sm:$0xff]  ;;  %v7366_v26 = vcombine.low %v2947_v12, %v2951_v16 }
 0x438   :  { %6279 = vmatpush2.bf16.msra.mxu0 %v7414_v30  ;;  %6239 = vmatprep.subr.bf16.mxu1 %v7279_v31  ;;  %v2815_v23 = vld [vmem:[#allocation12 + $0x638] sm:$0xff] }
 0x439   :  { %6280 = vmatprep.subr.bf16.mxu0 %v7407_v52  ;;  %v2939_v24 = vld [vmem:[#allocation12 + $0xa18] sm:$0xff]  ;;  %v7231_v27 = vcombine.high %v2811_v21, %v2815_v23  ;;  %v7230_v11 = vcombine.low %v2811_v21, %v2815_v23 }
 0x43a   :  { %v2943_v15 = vld [vmem:[#allocation12 + $0xa38] sm:$0xff] }
 0x43b   :  { %6240 = vmatpush2.bf16.msra.mxu1 %v7278_v36  ;;  %v7359_v28 = vcombine.high %v2939_v24, %v2943_v15  ;;  %v3059_v34 = vld [vmem:[#allocation12 + $0xdd8] sm:$0xff]  ;;  %v7358_v30 = vcombine.low %v2939_v24, %v2943_v15 }
 0x43c   :  { %6281 = vmatpush2.bf16.msra.mxu0 %v7406_v42  ;;  %6241 = vmatprep.subr.bf16.mxu1 %v7271_v38  ;;  %v3063_v29 = vld [vmem:[#allocation12 + $0xdf8] sm:$0xff] }
 0x43d   :  { %6282 = vmatprep.subr.bf16.mxu0 %v7399_v40  ;;  %v7479_v31 = vcombine.high %v3059_v34, %v3063_v29  ;;  %v3051_v52 = vld [vmem:[#allocation12 + $0xd98] sm:$0xff]  ;;  %v7478_v35 = vcombine.low %v3059_v34, %v3063_v29 }
 0x43e   :  { %v3055_v18 = vld [vmem:[#allocation12 + $0xdb8] sm:$0xff] }
 0x43f   :  { %6242 = vmatpush2.bf16.msra.mxu1 %v7270_v49  ;;  %v7471_v13 = vcombine.high %v3051_v52, %v3055_v18  ;;  %v3043_v19 = vld [vmem:[#allocation12 + $0xd58] sm:$0xff]  ;;  %v7470_v43 = vcombine.low %v3051_v52, %v3055_v18 }
 0x440   :  { %6283 = vmatpush2.bf16.msra.mxu0 %v7398_v5  ;;  %6243 = vmatprep.subr.bf16.mxu1 %v7263_v54  ;;  %v3047_v36 = vld [vmem:[#allocation12 + $0xd78] sm:$0xff] }
 0x441   :  { %6284 = vmatprep.subr.bf16.mxu0 %v7391_v55  ;;  %v7463_v44 = vcombine.high %v3043_v19, %v3047_v36  ;;  %v3039_v5 = vld [vmem:[#allocation12 + $0xd38] sm:$0xff] }
 0x442   :  { %v3027_v61 = vld [vmem:[#allocation12 + $0xcd8] sm:$0xff] }
 0x443   :  { %6244 = vmatpush2.bf16.msra.mxu1 %v7262_v63  ;;  %v3031_v63 = vld [vmem:[#allocation12 + $0xcf8] sm:$0xff] }
 0x444   :  { %6285 = vmatpush2.bf16.msra.mxu0 %v7390_v1  ;;  %6245 = vmatprep.subr.bf16.mxu1 %v7255_v20  ;;  %v7447_v1 = vcombine.high %v3027_v61, %v3031_v63  ;;  %v3019_v20 = vld [vmem:[#allocation12 + $0xc98] sm:$0xff]  ;;  %v7446_v50 = vcombine.low %v3027_v61, %v3031_v63 }
 0x445   :  { %6286 = vmatprep.subr.bf16.mxu0 %v7383_v10  ;;  %v3023_v10 = vld [vmem:[#allocation12 + $0xcb8] sm:$0xff] }
 0x446   :  { %v7439_v53 = vcombine.high %v3019_v20, %v3023_v10  ;;  %v3011_v2 = vld [vmem:[#allocation12 + $0xc58] sm:$0xff] }
 0x447   :  { %6246 = vmatpush2.bf16.msra.mxu1 %v7254_v41  ;;  %v3015_v3 = vld [vmem:[#allocation12 + $0xc78] sm:$0xff]  ;;  %v7438_v41 = vcombine.low %v3019_v20, %v3023_v10 }
 0x448   :  { %6287 = vmatpush2.bf16.msra.mxu0 %v7382_v4  ;;  %6247 = vmatprep.subr.bf16.mxu1 %v7247_v6  ;;  %v7431_v4 = vcombine.high %v3011_v2, %v3015_v3  ;;  %v3003_v6 = vld [vmem:[#allocation12 + $0xc18] sm:$0xff]  ;;  %v7430_v8 = vcombine.low %v3011_v2, %v3015_v3 }
 0x449   :  { %6288 = vmatprep.subr.bf16.mxu0 %v7375_v7  ;;  %v3007_v7 = vld [vmem:[#allocation12 + $0xc38] sm:$0xff] }
 0x44a   :  { %v7423_v9 = vcombine.high %v3003_v6, %v3007_v7  ;;  %v3123_v12 = vld [vmem:[#allocation12 + $0xfd8] sm:$0xff] }
 0x44b   :  { %6248 = vmatpush2.bf16.msra.mxu1 %v7246_v59  ;;  %v3127_v16 = vld [vmem:[#allocation12 + $0xff8] sm:$0xff]  ;;  %v7422_v59 = vcombine.low %v3003_v6, %v3007_v7  ;;  %v7704_v6 = vld [vmem:[#allocation15 + $0x44] ss:$8 sps:$4 sm:$0xff]  }
 0x44c   :  { %6289 = vmatpush2.bf16.msra.mxu0 %v7374_v33  ;;  %6249 = vmatprep.subr.bf16.mxu1 %v7239_v51  ;;  %v7543_v33 = vcombine.high %v3123_v12, %v3127_v16  ;;  %v3115_v51 = vld [vmem:[#allocation12 + $0xf98] sm:$0xff]  ;;  %v7542_v21 = vcombine.low %v3123_v12, %v3127_v16  ;;  %v7708_v12 = vld [vmem:[#allocation15 + $0x20] ss:$8 sps:$4 sm:$0xff]  }
 0x44d   :  { %6290 = vmatprep.subr.bf16.mxu0 %v7367_v62  ;;  %v3119_v62 = vld [vmem:[#allocation12 + $0xfb8] sm:$0xff] }
 0x44e   :  { %v7535_v23 = vcombine.high %v3115_v51, %v3119_v62  ;;  %v3107_v24 = vld [vmem:[#allocation12 + $0xf58] sm:$0xff] }
 0x44f   :  { %6250 = vmatpush2.bf16.msra.mxu1 %v7238_v25  ;;  %v3111_v15 = vld [vmem:[#allocation12 + $0xf78] sm:$0xff]  ;;  %v7534_v25 = vcombine.low %v3115_v51, %v3119_v62  ;;  %v7714_v51 = vld [vmem:[#allocation15] ss:$8 sps:$4 sm:$0xff]  }
 0x450   :  { %6291 = vmatpush2.bf16.msra.mxu0 %v7366_v26  ;;  %6251 = vmatprep.subr.bf16.mxu1 %v7231_v27  ;;  %v7527_v26 = vcombine.high %v3107_v24, %v3111_v15  ;;  %v3099_v27 = vld [vmem:[#allocation12 + $0xf18] sm:$0xff]  ;;  %v7526_v34 = vcombine.low %v3107_v24, %v3111_v15  ;;  %v7720_v24 = vld [vmem:[#allocation15 + $0xe0] ss:$8 sps:$4 sm:$0xff]  }
 0x451   :  { %6292 = vmatprep.subr.bf16.mxu0 %v7359_v28  ;;  %v3103_v28 = vld [vmem:[#allocation12 + $0xf38] sm:$0xff] }
 0x452   :  { %v7519_v29 = vcombine.high %v3099_v27, %v3103_v28  ;;  %v3083_v18 = vld [vmem:[#allocation12 + $0xe98] sm:$0xff] }
 0x453   :  { %6252 = vmatpush2.bf16.msra.mxu1 %v7230_v11  ;;  %v3091_v11 = vld [vmem:[#allocation12 + $0xed8] sm:$0xff] }
 0x454   :  { %6293 = vmatpush2.bf16.msra.mxu0 %v7358_v30  ;;  %6303 = vmatprep.subr.bf16.mxu1 %v7479_v31  ;;  %v3095_v30 = vld [vmem:[#allocation12 + $0xef8] sm:$0xff]  ;;  %v7518_v31 = vcombine.low %v3099_v27, %v3103_v28  ;;  %v7726_v27 = vld [vmem:[#allocation15 + $0xc0] ss:$8 sps:$4 sm:$0xff]  }
 0x455   :  { %v7511_v52 = vcombine.high %v3091_v11, %v3095_v30  ;;  %v7693_v2 = vld [vmem:[#allocation15 + $0x70] ss:$8 sps:$4 sm:$0xff]   ;;  %v7695_v3 = vld [vmem:[#allocation15 + $0x74] ss:$8 sps:$4 sm:$0xff]  }
 0x456   :  { %v6009_v42 = vpop.f32.mrf.mxu1  ;;  %6254 = vmatmul.mubr.bf16.vlgmr.msra.gmra.mxu1 %v8177_v56  ;;  %6570 = vmatprep.subr.bf16.mxu0 %v7695_v3  ;;  %v7707_v7 = vld [vmem:[#allocation15 + $0x34] ss:$8 sps:$4 sm:$0xff]  }
 0x457   :  { %v8266_v38 = vadd.f32 %v6009_v42, %v8258_v37  ;;  %v8268_v40 = vpop.f32.mrf.mxu0  ;;  %6295 = vmatmul.mubr.bf16.vlgmr.msra.gmra.mxu0 %v8203_v22  ;;  %6304 = vmatpush1.bf16.msra.mxu1 %v7478_v35  ;;  %v3035_v37 = vld [vmem:[#allocation12 + $0xd18] sm:$0xff] }
 0x458   :  { %6335 = vmatprep.mubr.bf16.mxu1 %v8210_v48  ;;  %v6011_v45 = vpop.f32.mrf.mxu1  ;;  %6305 = vmatprep.subr.bf16.mxu1 %v7471_v13  ;;  %v7462_v48 = vcombine.low %v3043_v19, %v3047_v36  ;;  %v7455_v58 = vcombine.high %v3035_v37, %v3039_v5  ;;  %v3087_v35 = vld [vmem:[#allocation12 + $0xeb8] sm:$0xff]  ;;  %v7510_v13 = vcombine.low %v3091_v11, %v3095_v30  ;;  %v7734_v11 = vld [vmem:[#allocation15 + $0xa4] ss:$8 sps:$4 sm:$0xff]  }
 0x459   :  { %v6344_v47 = vmax.f32 %v8245_v39, %v8266_v38  ;;  %v8275_v49 = vadd.f32 %v6011_v45, %v8262_v32  ;;  %v8277_v56 = vpop.f32.mrf.mxu0  ;;  %v7454_v32 = vcombine.low %v3035_v37, %v3039_v5  ;;  %v7503_v19 = vcombine.high %v3083_v18, %v3087_v35  ;;  %v3075_v36 = vld [vmem:[#allocation12 + $0xe58] sm:$0xff]  ;;  %6571 = vmatpush1.bf16.msra.mxu0 %v7693_v2 }
 0x45a   :  { %v6013_v54 = vpop.f32.mrf.mxu1  ;;  %v3079_v42 = vld [vmem:[#allocation12 + $0xe78] sm:$0xff] }
 0x45b   :  { %v6345_v22 = vmax.f32 %v8252_v46, %v8275_v49  ;;  %v6054_v55 = vpop.f32.mrf.mxu0  ;;  %6306 = vmatpush1.bf16.msra.mxu1 %v7470_v43  ;;  %v7502_v43 = vcombine.low %v3083_v18, %v3087_v35  ;;  %v7495_v45 = vcombine.high %v3075_v36, %v3079_v42  ;;  %v3071_v37 = vld [vmem:[#allocation12 + $0xe38] sm:$0xff]  ;;  %v7494_v5 = vcombine.low %v3075_v36, %v3079_v42 }
 0x45c   :  { %v6014_v57 = vpop.f32.mrf.mxu1  ;;  %6307 = vmatprep.subr.bf16.mxu1 %v7463_v44  ;;  %v3067_v44 = vld [vmem:[#allocation12 + $0xe18] sm:$0xff] }
 0x45d   :  { %v6055_v60 = vpop.f32.mrf.mxu0  ;;  %v7487_v54 = vcombine.high %v3067_v44, %v3071_v37  ;;  %v7486_v55 = vcombine.low %v3067_v44, %v3071_v37  ;;  %v7713_v16 = vld [vmem:[#allocation15 + $0x14] ss:$8 sps:$4 sm:$0xff]   ;;  %v7735_v44 = vld [vmem:[#allocation15 + $0x90] ss:$8 sps:$4 sm:$0xff]  }
 0x45e   :  { %v7719_v62 = vld [vmem:[#allocation15 + $0xf4] ss:$8 sps:$4 sm:$0xff]  }
 0x45f   :  { %6308 = vmatpush1.bf16.msra.mxu1 %v7462_v48  ;;  %v7725_v15 = vld [vmem:[#allocation15 + $0xd4] ss:$8 sps:$4 sm:$0xff]  }
 0x460   :  { %6309 = vmatprep.subr.bf16.mxu1 %v7455_v58  ;;  %v7731_v28 = vld [vmem:[#allocation15 + $0xb4] ss:$8 sps:$4 sm:$0xff]  }
 0x461   :  { %v7737_v42 = vld [vmem:[#allocation15 + $0x94] ss:$8 sps:$4 sm:$0xff]  }
 0x463   :  { %6310 = vmatpush1.bf16.msra.mxu1 %v7454_v32 }
 0x464   :  { %6311 = vmatprep.subr.bf16.mxu1 %v7447_v1 }
 0x467   :  { %6312 = vmatpush1.bf16.msra.mxu1 %v7446_v50 }
 0x468   :  { %6313 = vmatprep.subr.bf16.mxu1 %v7439_v53 }
 0x46b   :  { %6314 = vmatpush1.bf16.msra.mxu1 %v7438_v41  ;;  %v7698_v41 = vld [vmem:[#allocation15 + $0x64] ss:$8 sps:$4 sm:$0xff]  }
 0x46c   :  { %6315 = vmatprep.subr.bf16.mxu1 %v7431_v4  ;;  %6572 = vmatprep.subr.bf16.mxu0 %v7698_v41  ;;  %v7699_v4 = vld [vmem:[#allocation15 + $0x50] ss:$8 sps:$4 sm:$0xff]  }
 0x46f   :  { %6316 = vmatpush1.bf16.msra.mxu1 %v7430_v8  ;;  %v7705_v8 = vld [vmem:[#allocation15 + $0x30] ss:$8 sps:$4 sm:$0xff]  }
 0x470   :  { %6317 = vmatprep.subr.bf16.mxu1 %v7423_v9  ;;  %v7710_v9 = vld [vmem:[#allocation15 + $0x24] ss:$8 sps:$4 sm:$0xff]  }
 0x473   :  { %6318 = vmatpush1.bf16.msra.mxu1 %v7422_v59  ;;  %v7711_v59 = vld [vmem:[#allocation15 + $0x10] ss:$8 sps:$4 sm:$0xff]  }
 0x474   :  { %6319 = vmatprep.subr.bf16.mxu1 %v7543_v33  ;;  %v7716_v33 = vld [vmem:[#allocation15 + $0x4] ss:$8 sps:$4 sm:$0xff]  }
 0x477   :  { %6320 = vmatpush2.bf16.msra.mxu1 %v7542_v21  ;;  %v7717_v21 = vld [vmem:[#allocation15 + $0xf0] ss:$8 sps:$4 sm:$0xff]  }
 0x478   :  { %6321 = vmatprep.subr.bf16.mxu1 %v7535_v23  ;;  %v7722_v23 = vld [vmem:[#allocation15 + $0xe4] ss:$8 sps:$4 sm:$0xff]  }
 0x47b   :  { %6322 = vmatpush2.bf16.msra.mxu1 %v7534_v25  ;;  %v7723_v25 = vld [vmem:[#allocation15 + $0xd0] ss:$8 sps:$4 sm:$0xff]  }
 0x47c   :  { %6323 = vmatprep.subr.bf16.mxu1 %v7527_v26  ;;  %v7728_v26 = vld [vmem:[#allocation15 + $0xc4] ss:$8 sps:$4 sm:$0xff]  }
 0x47f   :  { %6324 = vmatpush2.bf16.msra.mxu1 %v7526_v34  ;;  %v7729_v34 = vld [vmem:[#allocation15 + $0xb0] ss:$8 sps:$4 sm:$0xff]  }
 0x480   :  { %6325 = vmatprep.subr.bf16.mxu1 %v7519_v29 }
 0x483   :  { %6326 = vmatpush2.bf16.msra.mxu1 %v7518_v31 }
 0x484   :  { %6327 = vmatprep.subr.bf16.mxu1 %v7511_v52  ;;  %v7732_v52 = vld [vmem:[#allocation15 + $0xa0] ss:$8 sps:$4 sm:$0xff]  }
 0x487   :  { %6328 = vmatpush2.bf16.msra.mxu1 %v7510_v13 }
 0x488   :  { %6329 = vmatprep.subr.bf16.mxu1 %v7503_v19 }
 0x48b   :  { %6330 = vmatpush2.bf16.msra.mxu1 %v7502_v43 }
 0x48c   :  { %6331 = vmatprep.subr.bf16.mxu1 %v7495_v45 }
 0x48f   :  { %6332 = vmatpush2.bf16.msra.mxu1 %v7494_v5 }
 0x490   :  { %6333 = vmatprep.subr.bf16.mxu1 %v7487_v54  ;;  %v7738_v54 = vld [vmem:[#allocation15 + $0x80] ss:$8 sps:$4 sm:$0xff]  }
 0x493   :  { %6334 = vmatpush2.bf16.msra.mxu1 %v7486_v55  ;;  %v7740_v55 = vld [vmem:[#allocation15 + $0x84] ss:$8 sps:$4 sm:$0xff]  }
 0x496   :  { %v6091_v48 = vpop.f32.mrf.mxu1  ;;  %6336 = vmatmul.mubr.bf16.vlgmr.msra.gmra.mxu1 %v8212_v0  ;;  %v7696_v0 = vld [vmem:[#allocation15 + $0x60] ss:$8 sps:$4 sm:$0xff]  }
 0x497   :  { %v6092_v57 = vadd.f32 %v6091_v48, %v8268_v40  ;;  %v6132_v58 = vpop.f32.mrf.mxu0  ;;  %v7701_v40 = vld [vmem:[#allocation15 + $0x54] ss:$8 sps:$4 sm:$0xff]   ;;  %6573 = vmatpush1.bf16.msra.mxu0 %v7696_v0 }
 0x498   :  { %v6093_v60 = vpop.f32.mrf.mxu1  ;;  %6574 = vmatprep.subr.bf16.mxu0 %v7701_v40 }
 0x499   :  { %v6133_v61 = vadd.f32 %v6132_v58, %v6092_v57  ;;  %v6094_v63 = vadd.f32 %v6093_v60, %v8277_v56  ;;  %v6134_v32 = vpop.f32.mrf.mxu0  ;;  %v7702_v56 = vld [vmem:[#allocation15 + $0x40] ss:$8 sps:$4 sm:$0xff]  }
 0x49a   :  { %v6095_v1 = vpop.f32.mrf.mxu1 }
 0x49b   :  { %v8284_v20 = vadd.f32 %v6134_v32, %v6094_v63  ;;  %v6136_v10 = vpop.f32.mrf.mxu0  ;;  %6575 = vmatpush1.bf16.msra.mxu0 %v7699_v4  ;;  %v6350_v63 = vld [vmem:[#allocation14] sm:$0x3] }
 0x49c   :  { %v6096_v50 = vpop.f32.mrf.mxu1  ;;  %6576 = vmatprep.subr.bf16.mxu0 %v7704_v6  ;;  %v6355_v10 = vrot.slane %v6350_v63, %v8106_v14  ;;  %v6359_v3 = vrot.slane %v6350_v63, %v8110_v17 }
 0x49d   :  { %v6137_v53 = vpop.f32.mrf.mxu0 }
 0x49f   :  { %6577 = vmatpush1.bf16.msra.mxu0 %v7702_v56 }
 0x4a0   :  { %6578 = vmatprep.subr.bf16.mxu0 %v7707_v7 }
 0x4a3   :  { %6579 = vmatpush1.bf16.msra.mxu0 %v7705_v8  ;;  %v6617_v8 = vld [vmem:[#allocation18] sm:$0x3] }
 0x4a4   :  { %6580 = vmatprep.subr.bf16.mxu0 %v7710_v9  ;;  %v6626_v9 = vrot.slane %v6617_v8, %v8110_v17 }
 0x4a7   :  { %6581 = vmatpush1.bf16.msra.mxu0 %v7708_v12  ;;  %v6630_v12 = vpack.c.bf16 %v6626_v9, %v6626_v9 }
 0x4a8   :  { %6582 = vmatprep.subr.bf16.mxu0 %v7713_v16  ;;  %v6633_v16 = vld [vmem:[#allocation2] sm:$0x1] }
 0x4a9   :  { %6675 = vmatprep.mubr.bf16.mxu1 %v6630_v12 }
 0x4ab   :  { %6583 = vmatpush1.bf16.msra.mxu0 %v7711_v59  ;;  %v7996_v59 = vmov 0  }
 0x4ac   :  { %6584 = vmatprep.subr.bf16.mxu0 %v7716_v33  ;;  %7594 = vset.pattern.permute.xlu0 %v7996_v59  ;;  %v6398_v33 = vld [vmem:[#allocation17] sm:$0x3] }
 0x4ad   :  { %6636 = vperm.xlu0 %7594, %v6633_v16  }
 0x4af   :  { %6585 = vmatpush1.bf16.msra.mxu0 %v7714_v51  ;;  %v6403_v51 = vrot.slane %v6398_v33, %v8106_v14 }
 0x4b0   :  { %6586 = vmatprep.subr.bf16.mxu0 %v7719_v62  ;;  %v6407_v62 = vrot.slane %v6398_v33, %v8110_v17 }
 0x4b3   :  { %6587 = vmatpush2.bf16.msra.mxu0 %v7717_v21 }
 0x4b4   :  { %6588 = vmatprep.subr.bf16.mxu0 %v7722_v23 }
 0x4b7   :  { %6589 = vmatpush2.bf16.msra.mxu0 %v7720_v24 }
 0x4b8   :  { %6590 = vmatprep.subr.bf16.mxu0 %v7725_v15 }
 0x4bb   :  { %6591 = vmatpush2.bf16.msra.mxu0 %v7723_v25 }
 0x4bc   :  { %6592 = vmatprep.subr.bf16.mxu0 %v7728_v26 }
 0x4bf   :  { %6593 = vmatpush2.bf16.msra.mxu0 %v7726_v27 }
 0x4c0   :  { %6594 = vmatprep.subr.bf16.mxu0 %v7731_v28 }
 0x4c3   :  { %6595 = vmatpush2.bf16.msra.mxu0 %v7729_v34 }
 0x4c4   :  { %6596 = vmatprep.subr.bf16.mxu0 %v7734_v11 }
 0x4c7   :  { %6597 = vmatpush2.bf16.msra.mxu0 %v7732_v52 }
 0x4c8   :  { %6598 = vmatprep.subr.bf16.mxu0 %v7737_v42 }
 0x4cb   :  { %6599 = vmatpush2.bf16.msra.mxu0 %v7735_v44 }
 0x4cc   :  { %6600 = vmatprep.subr.bf16.mxu0 %v7740_v55 }
 0x4cf   :  { %6601 = vmatpush2.bf16.msra.mxu0 %v7738_v54 }
 0x4d6   :  { %v6173_v29 = vpop.f32.mrf.mxu1 }
 0x4d7   :  { %v6174_v30 = vadd.f32 %v6173_v29, %v6133_v61  ;;  %v6214_v31 = vpop.f32.mrf.mxu0 }
 0x4d8   :  { %v6175_v18 = vpop.f32.mrf.mxu1 }
 0x4d9   :  { %v6346_v35 = vmax.f32 %v6344_v47, %v6174_v30  ;;  %v6176_v13 = vadd.f32 %v6175_v18, %v8284_v20  ;;  %v6216_v19 = vpop.f32.mrf.mxu0 }
 0x4da   :  { %v6177_v36 = vpop.f32.mrf.mxu1 }
 0x4db   :  { %v6347_v43 = vmax.f32 %v6345_v22, %v6176_v13  ;;  %v6218_v45 = vpop.f32.mrf.mxu0 }
 0x4dc   :  { %v6178_v37 = vpop.f32.mrf.mxu1 }
 0x4dd   :  { %v6219_v5 = vpop.f32.mrf.mxu0 }
 0x516   :  { %v6255_v39 = vpop.f32.mrf.mxu1 }
 0x517   :  { %v6256_v38 = vadd.f32 %v6255_v39, %v6214_v31  ;;  %v6296_v47 = vpop.f32.mrf.mxu0  ;;  %v6622_v31 = vrot.slane %v6617_v8, %v8106_v14 }
 0x518   :  { %v6257_v48 = vpop.f32.mrf.mxu1 }
 0x519   :  { %v6297_v57 = vadd.f32 %v6296_v47, %v6256_v38  ;;  %v6298_v58 = vpop.f32.mrf.mxu0  ;;  %v6258_v22 = vadd.f32 %v6257_v48, %v6216_v19  ;;  %v6629_v52 = vpack.c.bf16 %v6622_v31, %v6622_v31 }
 0x51a   :  { %v6259_v60 = vpop.f32.mrf.mxu1 }
 0x51b   :  { %v6300_v61 = vpop.f32.mrf.mxu0  ;;  %v6299_v1 = vadd.f32 %v6298_v58, %v6258_v22 }
 0x51c   :  { %v6260_v46 = vpop.f32.mrf.mxu1 }
 0x51d   :  { %v6301_v49 = vpop.f32.mrf.mxu0 }
 0x528   :  { %v6637_v17 = vpop.permute.xlu0 %6636 }
 0x529   :  { %v6642_v18 = vrot.slane %v6637_v17, %v8106_v14 }
 0x556   :  { %v6337_v32 = vpop.f32.mrf.mxu1 }
 0x557   :  { %v6338_v20 = vadd.f32 %v6337_v32, %v6297_v57 }
 0x558   :  { %v6339_v50 = vpop.f32.mrf.mxu1 }
 0x559   :  { %v6348_v53 = vmax.f32 %v6346_v35, %v6338_v20  ;;  %v6340_v2 = vadd.f32 %v6339_v50, %v6299_v1 }
 0x55a   :  { %v6341_v41 = vpop.f32.mrf.mxu1 }
 0x55b   :  { %v6349_v0 = vmax.f32 %v6347_v43, %v6340_v2  ;;  %v6362_v40 = vadd.f32 %v6355_v10, %v6348_v53 }
 0x55c   :  { %v6342_v4 = vpop.f32.mrf.mxu1 }
 0x55d   :  { %v6363_v6 = vadd.f32 %v6359_v3, %v6349_v0  ;;  %v6364_v7 = vpack.c.bf16 %v6362_v40, %v6362_v40 }
 0x55f   :  { %v6365_v56 = vpack.c.bf16 %v6363_v6, %v6363_v6 }
 0x561   :  { %6602 = vmatprep.mubr.bf16.mxu0 %v6365_v56 }
 0x562   :  { %6603 = vmatmul.mubr.bf16.vlgmr.msra.gmra.mxu0 %v6364_v7 }
 0x622   :  { %v6604_v21 = vpop.f32.mrf.mxu0 }
 0x623   :  { %v6605_v23 = vadd.f32 %v6604_v21, %v6403_v51 }
 0x624   :  { %v6606_v24 = vpop.f32.mrf.mxu0 }
 0x625   :  { %vm6611_vm12 = vcmp.gt.f32.partialorder %v6605_v23, 0.0  ;;  %v6613_v15 = vmul.f32 0.2, %v6605_v23  ;;  %v6607_v25 = vadd.f32 %v6606_v24, %v6407_v62 }
 0x626   :  { %v6608_v26 = vpop.f32.mrf.mxu0 }
 0x627   :  { %vm6612_vm13 = vcmp.gt.f32.partialorder %v6607_v25, 0.0  ;;  %v6614_v27 = vmul.f32 0.2, %v6607_v25  ;;  %v6615_v28 = vsel %vm6611_vm12, %v6605_v23, %v6613_v15 }
 0x628   :  { %v6609_v34 = vpop.f32.mrf.mxu0  ;;  %v6631_v30 = vpack.c.bf16 %v6615_v28, %v6615_v28 }
 0x629   :  { %v6616_v29 = vsel %vm6612_vm13, %v6607_v25, %v6614_v27 }
 0x62a   :  { %v6632_v11 = vpack.c.bf16 %v6616_v29, %v6616_v29 }
 0x62c   :  { %6657 = vmatprep.subr.bf16.mxu1 %v6632_v11 }
 0x62d   :  { %6658 = vmatpush1.bf16.xpose.msra.mxu1 %v6631_v30 }
 0x634   :  { %6676 = vmatmul.mubr.bf16.vlgmr.msra.gmra.mxu1 %v6629_v52 }
 0x6f4   :  { %v6677_v35 = vpop.f32.mrf.mxu1 }
 0x6f5   :  { %v6678_v13 = vadd.f32 %v6677_v35, %v6642_v18 }
 0x6f6   :  { %v6679_v19 = vpop.f32.mrf.mxu1 }
 0x6f7   :  { %v6683_v36 = vsub.f32 0.0, %v6678_v13 }
 0x6f8   :  { %v6680_v42 = vpop.f32.mrf.mxu1 }
 0x6f9   :  { %v6684_v43 = vmul.f32 1.442695, %v6683_v36 }
 0x6fa   :  { %v6681_v45 = vpop.f32.mrf.mxu1 }
 0x6fb   :  { %7741 = vpow2.f32 %v6684_v43 }
 0x708   :  { %v7742_v44 = vpop.eup %7741 }
 0x709   :  { %v6686_v37 = vadd.f32 1.0, %v7742_v44 }
 0x70b   :  { %7743 = vrcp.f32 %v6686_v37 }
 0x718   :  { %v7744_v5 = vpop.eup %7743 }
 0x719   :  { %6689 = vst.msk [vmem:[#allocation20] sm:$0x1] %vm6688_vm14, %v7744_v5 }
 0x71a   :  { %7957 = shalt.err (!%p7954_p12)
}
 0x71b   :  { %6699 = dma.vmem_to_hbm [thread:$0]  %s6697_s9, 16, %s8314_s11, [#allocation5]  }
 0x71c   :  { %7978 = dma.done.wait [#allocation5], 16  }
 0x71d   :  { %7979 = vsyncadd [#allocation5], 4294967280 }
 0x71e   :  { %6703 = vsyncpa [#allocation4], 1 }
 0x71f   :  { %6704 = vsyncpa [#allocation7], 1 }
 0x720   :  { %6705 = vsyncpa [#allocation10], 1 }
 0x721   :  { %6706 = vsyncpa [#allocation13], 1 }
 0x722   :  { %6707 = vsyncpa [#allocation16], 1 }
 0x723   :  { %6708 = vsyncpa [#allocation19], 1 }
 0x724   :  { %6709 = vsyncpa [#allocation5], 1 }

</bundles_post_ra>
